<compile_context>
chip_gen: v7x
topology: tpu7x:2x2x1
jax: 0.10.0
libtpu: 0.0.40
codegen_flags: <defaults>
</compile_context>

<pallas_src>
import functools

import jax
import jax.numpy as jnp
from jax.experimental import pallas as pl
from jax.experimental.pallas import tpu as pltpu

NEG_INF = -1e9
LANE = 128

# Row indices inside the packed per-layer "small parameter" blobs -------------
E_LN1G, E_LN1B, E_LN2G, E_LN2B, E_BQKV, E_BO, E_FC1B, E_FC2B = range(8)
E_ROWS = 8
(D_LN1G, D_LN1B, D_LN2G, D_LN2B, D_LN3G, D_LN3B,
 D_SBQKV, D_SBO, D_CBQ, D_CBKV, D_CBO, D_FC1B, D_FC2B) = range(13)
D_ROWS = 16
L_DENSEB, L_LNG, L_LNB = range(3)
L_ROWS = 8


# --------------------------- in-kernel helpers ------------------------------

def _row(blob, idx, width):
    """Static slice of one packed parameter row -> (1, width) f32."""
    return blob[idx:idx + 1, :width]


def _layer_norm(x, g, b, eps=1e-5):
    mu = jnp.mean(x, axis=-1, keepdims=True)
    xc = x - mu
    var = jnp.mean(xc * xc, axis=-1, keepdims=True)
    return xc * jax.lax.rsqrt(var + eps) * g + b


def _gelu(x):
    # TODO(synk): reference LMHead/FFN use erf-GELU; tanh approximation
    # (EUP-friendly on TPU) is numerically very close.
    return jax.nn.gelu(x, approximate=True)


def _mm(x_f32, w_bf16):
    """act(f32) x weight(bf16 value) with f32 accumulation on the MXU."""
    return jnp.dot(x_f32.astype(jnp.bfloat16), w_bf16,
                   preferred_element_type=jnp.float32)


def _mha(q, k, v, bias, wo, num_heads):
    """Multi-head attention + output projection, fully in registers.

    q:(Sq,D) k,v:(Sk,D) f32; bias broadcastable to (Sq,Sk); wo:(D,D) bf16.
    Heads use a statically-unrolled loop of 2-D matmuls; the head-concat is
    folded into the out-projection as a sum of per-head projections, and the
    softmax normalization is applied after the PV matmul.
    """
    _, D = q.shape
    Dh = D // num_heads
    scale = 1.0 / float(Dh) ** 0.5
    out = None
    for h in range(num_heads):
        sl = slice(h * Dh, (h + 1) * Dh)
        qh = (q[:, sl] * scale).astype(jnp.bfloat16)
        kh = k[:, sl].astype(jnp.bfloat16)
        vh = v[:, sl].astype(jnp.bfloat16)
        s = jnp.einsum('qd,kd->qk', qh, kh,
                       preferred_element_type=jnp.float32) + bias
        m = jnp.max(s, axis=-1, keepdims=True)
        p = jnp.exp(s - m)
        denom = jnp.sum(p, axis=-1, keepdims=True)
        o = jnp.dot(p.astype(jnp.bfloat16), vh,
                    preferred_element_type=jnp.float32)
        o = o * pl.reciprocal(denom, approx=True)       # divide -> EUP slot
        ph = jnp.dot(o.astype(jnp.bfloat16), wo[sl, :],
                     preferred_element_type=jnp.float32)
        out = ph if out is None else out + ph
    return out


# ----------------------------- fused stack kernel ---------------------------

def _pipet_stack_kernel(h_enc0_ref, h_dec0_ref, enc_len_ref, dec_len_ref,
                        dist_ref,
                        e_wqkv_ref, e_wo_ref, e_fc1_ref, e_fc2_ref, e_small_ref,
                        d_wqkv_ref, d_wo_ref, d_wq_ref, d_wkv_ref, d_cwo_ref,
                        d_fc1_ref, d_fc2_ref, d_small_ref,
                        lm_dense_ref, lm_proj_ref, lm_small_ref, lm_projb_ref,
                        enc_logits_ref, dec_logits_ref,
                        h_enc, h_dec,
                        *, num_heads, n_enc, n_dec):
    b = pl.program_id(0)
    l = pl.program_id(1)
    S_enc, D = h_enc.shape
    S_dec = h_dec.shape[0]

    # Residual streams live in VMEM scratch for the whole layer loop.
    @pl.when(l == 0)
    def _init():
        h_enc[...] = h_enc0_ref[0].astype(jnp.float32)
        h_dec[...] = h_dec0_ref[0].astype(jnp.float32)

    # ---- additive attention biases rebuilt from SMEM scalars (no O(S^2) DMA)
    enc_total = enc_len_ref[b, 0] + enc_len_ref[b, 1]
    dec_lx = dec_len_ref[b, 0]
    dec_total = dec_lx + dec_len_ref[b, 1]
    tx = dist_ref[b, 0]
    ty = dist_ref[b, 1]

    ek = jax.lax.broadcasted_iota(jnp.int32, (1, S_enc), 1)
    enc_key_bias = jnp.where(ek < enc_total, 0.0, NEG_INF)        # (1, S_enc)

    qpos = jax.lax.broadcasted_iota(jnp.int32, (S_dec, S_dec), 0)
    kpos = jax.lax.broadcasted_iota(jnp.int32, (S_dec, S_dec), 1)
    # TODO(synk): exact DecoderLayer `distance_mask` semantics not available in
    # the reference snippet; approximated as an additive per-key evolutionary
    # distance bias (tx over x tokens, ty over y tokens) on top of a
    # causal + padding mask.
    tok_dist = jnp.where(kpos < dec_lx, tx,
                         jnp.where(kpos < dec_total, ty, 0.0))
    dec_ok = jnp.logical_and(kpos <= qpos, kpos < dec_total)
    dec_self_bias = jnp.where(dec_ok, 0.0, NEG_INF) + tok_dist    # (S_dec,S_dec)

    # ---------------------------- encoder layer l ---------------------------
    esm = e_small_ref[0]
    he = h_enc[...]
    x = _layer_norm(he, _row(esm, E_LN1G, D), _row(esm, E_LN1B, D))
    qkv = _mm(x, e_wqkv_ref[0]) + _row(esm, E_BQKV, 3 * D)
    he = he + _mha(qkv[:, :D], qkv[:, D:2 * D], qkv[:, 2 * D:],
                   enc_key_bias, e_wo_ref[0], num_heads) + _row(esm, E_BO, D)
    x = _layer_norm(he, _row(esm, E_LN2G, D), _row(esm, E_LN2B, D))
    y = _gelu(_mm(x, e_fc1_ref[0]) + _row(esm, E_FC1B, 4 * D))
    he = he + _mm(y, e_fc2_ref[0]) + _row(esm, E_FC2B, D)
    h_enc[...] = he

    # ------------------------- paired decoder layer -------------------------
    def decoder_step():
        dsm = d_small_ref[0]
        hd = h_dec[...]
        # masked self attention
        x = _layer_norm(hd, _row(dsm, D_LN1G, D), _row(dsm, D_LN1B, D))
        qkv = _mm(x, d_wqkv_ref[0]) + _row(dsm, D_SBQKV, 3 * D)
        hd = hd + _mha(qkv[:, :D], qkv[:, D:2 * D], qkv[:, 2 * D:],
                       dec_self_bias, d_wo_ref[0], num_heads) \
                + _row(dsm, D_SBO, D)
        # cross attention (K/V from this layer's encoder output, VMEM-resident)
        x = _layer_norm(hd, _row(dsm, D_LN2G, D), _row(dsm, D_LN2B, D))
        q = _mm(x, d_wq_ref[0]) + _row(dsm, D_CBQ, D)
        kv = _mm(he, d_wkv_ref[0]) + _row(dsm, D_CBKV, 2 * D)
        hd = hd + _mha(q, kv[:, :D], kv[:, D:], enc_key_bias,
                       d_cwo_ref[0], num_heads) + _row(dsm, D_CBO, D)
        # feed-forward
        x = _layer_norm(hd, _row(dsm, D_LN3G, D), _row(dsm, D_LN3B, D))
        y = _gelu(_mm(x, d_fc1_ref[0]) + _row(dsm, D_FC1B, 4 * D))
        hd = hd + _mm(y, d_fc2_ref[0]) + _row(dsm, D_FC2B, D)
        h_dec[...] = hd

    if n_enc > n_dec:
        # reference: decoder runs only when n_dec - n_enc + i >= 0
        pl.when(l >= (n_enc - n_dec))(decoder_step)
    else:
        decoder_step()

    # ----------------- fused LM head (both streams) at last layer -----------
    @pl.when(l == n_enc - 1)
    def _lm_head():
        lsm = lm_small_ref[...]

        def head(hx):
            x = _gelu(_mm(hx, lm_dense_ref[...]) + _row(lsm, L_DENSEB, D))
            x = _layer_norm(x, _row(lsm, L_LNG, D), _row(lsm, L_LNB, D))
            return _mm(x, lm_proj_ref[...]) + lm_projb_ref[...]

        enc_logits_ref[0] = head(h_enc[...]).astype(enc_logits_ref.dtype)
        dec_logits_ref[0] = head(h_dec[...]).astype(dec_logits_ref.dtype)


# ----------------------------- pallas_call wrapper ---------------------------

def _act_spec(S, D):
    return pl.BlockSpec((1, S, D), lambda b, l: (b, 0, 0))


def _layer_spec(shape, offset=0, clamp=False):
    n = len(shape) - 1
    if clamp:
        idx = lambda b, l, _n=n, _o=offset: (jnp.maximum(l + _o, 0),) + (0,) * _n
    else:
        idx = lambda b, l, _n=n, _o=offset: (l + _o,) + (0,) * _n
    return pl.BlockSpec((1,) + tuple(shape[1:]), idx)


def _const_spec(shape):
    n = len(shape)
    return pl.BlockSpec(tuple(shape), lambda b, l, _n=n: (0,) * _n)


def _smem_spec():
    return pl.BlockSpec(memory_space=pltpu.MemorySpace.SMEM)


def pipet_stack(h_enc0, h_dec0, enc_len, dec_len, dist, prep, num_heads):
    B, S_enc, D = h_enc0.shape
    S_dec = h_dec0.shape[1]
    stk, lm = prep["stack"], prep["lm_head"]
    n_enc = stk["e_wqkv"].shape[0]
    n_dec = stk["d_wqkv"].shape[0]
    VP = lm["proj_w"].shape[1]
    off = n_dec - n_enc
    clamp = off < 0
    dls = lambda s: _layer_spec(s, offset=off, clamp=clamp)

    kernel = functools.partial(_pipet_stack_kernel, num_heads=num_heads,
                               n_enc=n_enc, n_dec=n_dec)
    return pl.pallas_call(
        kernel,
        grid=(B, n_enc),
        in_specs=[
            _act_spec(S_enc, D), _act_spec(S_dec, D),
            _smem_spec(), _smem_spec(), _smem_spec(),
            _layer_spec(stk["e_wqkv"].shape), _layer_spec(stk["e_wo"].shape),
            _layer_spec(stk["e_fc1"].shape), _layer_spec(stk["e_fc2"].shape),
            _layer_spec(stk["e_small"].shape),
            dls(stk["d_wqkv"].shape), dls(stk["d_wo"].shape),
            dls(stk["d_wq"].shape), dls(stk["d_wkv"].shape),
            dls(stk["d_cwo"].shape), dls(stk["d_fc1"].shape),
            dls(stk["d_fc2"].shape), dls(stk["d_small"].shape),
            _const_spec(lm["dense_w"].shape), _const_spec(lm["proj_w"].shape),
            _const_spec(lm["small"].shape), _const_spec(lm["proj_b"].shape),
        ],
        out_specs=(
            pl.BlockSpec((1, S_enc, VP), lambda b, l: (b, 0, 0)),
            pl.BlockSpec((1, S_dec, VP), lambda b, l: (b, 0, 0)),
        ),
        out_shape=(
            jax.ShapeDtypeStruct((B, S_enc, VP), jnp.float32),
            jax.ShapeDtypeStruct((B, S_dec, VP), jnp.float32),
        ),
        scratch_shapes=[pltpu.VMEM((S_enc, D), jnp.float32),
                        pltpu.VMEM((S_dec, D), jnp.float32)],
        compiler_params=pltpu.CompilerParams(
            dimension_semantics=("parallel", "arbitrary")),
    )(h_enc0, h_dec0, enc_len, dec_len, dist,
      stk["e_wqkv"], stk["e_wo"], stk["e_fc1"], stk["e_fc2"], stk["e_small"],
      stk["d_wqkv"], stk["d_wo"], stk["d_wq"], stk["d_wkv"], stk["d_cwo"],
      stk["d_fc1"], stk["d_fc2"], stk["d_small"],
      lm["dense_w"], lm["proj_w"], lm["small"], lm["proj_b"])


# ----------------------------- Pipet forward ---------------------------------

def pipet_forward(prep, enc_in, dec_in, enc_attn_mask, dec_attn_mask,
                  distances, num_heads):
    embed_w = prep["embed"]
    V = embed_w.shape[0]
    h_enc0 = jnp.take(embed_w, enc_in, axis=0)   # embedding lookup (JAX glue)
    h_dec0 = jnp.take(embed_w, dec_in, axis=0)
    enc_lp, dec_lp = pipet_stack(
        h_enc0, h_dec0,
        enc_attn_mask.astype(jnp.int32), dec_attn_mask.astype(jnp.int32),
        distances.astype(jnp.float32), prep, num_heads)
    return enc_lp[..., :V], dec_lp[..., :V]


# ----------------------------- parameter init / prep -------------------------

def _dense_init(key, fan_in, fan_out, scale=0.02):
    w = scale * jax.random.normal(key, (fan_in, fan_out), jnp.float32)
    b = jnp.zeros((fan_out,), jnp.float32)
    return w, b


def init_params(key, vocab_size, D, n_enc, n_dec):
    keys = iter(jax.random.split(key, 256))

    def attn_params():
        p = {}
        for name in ("q", "k", "v", "o"):
            w, b = _dense_init(next(keys), D, D)
            p["w" + name], p["b" + name] = w, b
        return p

    def ffn_params():
        fc1_w, fc1_b = _dense_init(next(keys), D, 4 * D)
        fc2_w, fc2_b = _dense_init(next(keys), 4 * D, D)
        return {"fc1_w": fc1_w, "fc1_b": fc1_b, "fc2_w": fc2_w, "fc2_b": fc2_b}

    def ln_params():
        return jnp.ones((D,), jnp.float32), jnp.zeros((D,), jnp.float32)

    params = {"embed": 0.02 * jax.random.normal(next(keys), (vocab_size, D),
                                                jnp.float32)}
    enc_layers = []
    for _ in range(n_enc):
        g1, b1 = ln_params(); g2, b2 = ln_params()
        enc_layers.append({"self_attn": attn_params(), "ffn": ffn_params(),
                           "ln1_g": g1, "ln1_b": b1, "ln2_g": g2, "ln2_b": b2})
    dec_layers = []
    for _ in range(n_dec):
        g1, b1 = ln_params(); g2, b2 = ln_params(); g3, b3 = ln_params()
        dec_layers.append({"self_attn": attn_params(),
                           "cross_attn": attn_params(), "ffn": ffn_params(),
                           "ln1_g": g1, "ln1_b": b1, "ln2_g": g2, "ln2_b": b2,
                           "ln3_g": g3, "ln3_b": b3})
    dense_w, dense_b = _dense_init(next(keys), D, D)
    lng, lnb = ln_params()
    params["enc_layers"] = enc_layers
    params["dec_layers"] = dec_layers
    params["lm_head"] = {"dense_w": dense_w, "dense_b": dense_b,
                         "ln_g": lng, "ln_b": lnb,
                         "bias": jnp.zeros((vocab_size,), jnp.float32)}
    return params


def prepare_params(params):
    """One-time kernel-friendly prep: fuse QKV / KV weights, stack per-layer
    weights along a leading layer axis (streamed by the BlockSpec pipeline),
    cast matmul weights to bf16 (f32 accumulation in-kernel), pack every tiny
    LN/bias vector into one lane-padded (rows, 128) blob per layer, and
    pre-transpose + lane-pad the tied-embedding projection."""
    embed = params["embed"]
    V, D = embed.shape
    W = ((max(LANE, 4 * D) + LANE - 1) // LANE) * LANE
    VP = ((V + LANE - 1) // LANE) * LANE
    bf = lambda x: x.astype(jnp.bfloat16)

    def rows(vs, n_rows):
        buf = jnp.zeros((n_rows, W), jnp.float32)
        for i, v in enumerate(vs):
            buf = buf.at[i, :v.shape[0]].set(v.astype(jnp.float32))
        return buf

    def qkv_w(p): return jnp.concatenate([p["wq"], p["wk"], p["wv"]], axis=1)
    def qkv_b(p): return jnp.concatenate([p["bq"], p["bk"], p["bv"]])
    def kv_w(p): return jnp.concatenate([p["wk"], p["wv"]], axis=1)
    def kv_b(p): return jnp.concatenate([p["bk"], p["bv"]])

    enc, dec = params["enc_layers"], params["dec_layers"]
    stack = {
        "e_wqkv": jnp.stack([bf(qkv_w(l["self_attn"])) for l in enc]),
        "e_wo":   jnp.stack([bf(l["self_attn"]["wo"]) for l in enc]),
        "e_fc1":  jnp.stack([bf(l["ffn"]["fc1_w"]) for l in enc]),
        "e_fc2":  jnp.stack([bf(l["ffn"]["fc2_w"]) for l in enc]),
        "e_small": jnp.stack([rows(
            [l["ln1_g"], l["ln1_b"], l["ln2_g"], l["ln2_b"],
             qkv_b(l["self_attn"]), l["self_attn"]["bo"],
             l["ffn"]["fc1_b"], l["ffn"]["fc2_b"]], E_ROWS) for l in enc]),
        "d_wqkv": jnp.stack([bf(qkv_w(l["self_attn"])) for l in dec]),
        "d_wo":   jnp.stack([bf(l["self_attn"]["wo"]) for l in dec]),
        "d_wq":   jnp.stack([bf(l["cross_attn"]["wq"]) for l in dec]),
        "d_wkv":  jnp.stack([bf(kv_w(l["cross_attn"])) for l in dec]),
        "d_cwo":  jnp.stack([bf(l["cross_attn"]["wo"]) for l in dec]),
        "d_fc1":  jnp.stack([bf(l["ffn"]["fc1_w"]) for l in dec]),
        "d_fc2":  jnp.stack([bf(l["ffn"]["fc2_w"]) for l in dec]),
        "d_small": jnp.stack([rows(
            [l["ln1_g"], l["ln1_b"], l["ln2_g"], l["ln2_b"],
             l["ln3_g"], l["ln3_b"],
             qkv_b(l["self_attn"]), l["self_attn"]["bo"],
             l["cross_attn"]["bq"], kv_b(l["cross_attn"]),
             l["cross_attn"]["bo"],
             l["ffn"]["fc1_b"], l["ffn"]["fc2_b"]], D_ROWS) for l in dec]),
    }

    lm = params["lm_head"]
    proj_w = jnp.zeros((D, VP), jnp.float32).at[:, :V].set(embed.T)
    proj_b = jnp.zeros((1, VP), jnp.float32).at[:, :V].set(lm["bias"][None, :])
    lm_head = {"dense_w": bf(lm["dense_w"]),
               "proj_w": bf(proj_w),
               "small": rows([lm["dense_b"], lm["ln_g"], lm["ln_b"]], L_ROWS),
               "proj_b": proj_b}
    return {"embed": embed, "stack": stack, "lm_head": lm_head}


# ----------------------------- main ------------------------------------------

if __name__ == "__main__":
    B, S, D, H = 2, 8, 32, 4          # batch, seq, embedding_dim, num_heads
    VOCAB = 33                         # protein vocab size (ESM-style)
    N_ENC, N_DEC = 2, 2

    key = jax.random.PRNGKey(0)
    k_param, k_enc, k_dec = jax.random.split(key, 3)
    params = init_params(k_param, VOCAB, D, N_ENC, N_DEC)
    prep = prepare_params(params)      # one-time fuse / stack / cast / pad

    enc_in = jax.random.randint(k_enc, (B, S), 0, VOCAB, dtype=jnp.int32)
    dec_in = jax.random.randint(k_dec, (B, S), 0, VOCAB, dtype=jnp.int32)
    # attn masks are per-(x, y) sub-sequence lengths; distances = (tx, ty)
    enc_attn_mask = jnp.array([[3, 4], [5, 3]], dtype=jnp.int32)
    dec_attn_mask = jnp.array([[4, 3], [3, 5]], dtype=jnp.int32)
    distances = jnp.array([[0.1, 0.5], [0.2, 0.3]], dtype=jnp.float32)

    fwd = jax.jit(functools.partial(pipet_forward, num_heads=H))
    enc_logits, dec_logits = fwd(prep, enc_in, dec_in,
                                 enc_attn_mask, dec_attn_mask, distances)
    jax.block_until_ready((enc_logits, dec_logits))

    assert enc_logits.shape == (B, S, VOCAB) and dec_logits.shape == (B, S, VOCAB)
    assert bool(jnp.all(jnp.isfinite(enc_logits)))
    assert bool(jnp.all(jnp.isfinite(dec_logits)))
    print("KERNEL_OK")
</pallas_src>

<mosaic_0001>
module attributes {stable_mosaic.version = 11 : i64} {
  func.func @_pipet_stack_kernel(%arg0: i32, %arg1: i32, %arg2: memref<1x8x32xf32, #tpu.memory_space<vmem>>, %arg3: memref<1x8x32xf32, #tpu.memory_space<vmem>>, %arg4: memref<2x2xi32, #tpu.memory_space<smem>>, %arg5: memref<2x2xi32, #tpu.memory_space<smem>>, %arg6: memref<2x2xf32, #tpu.memory_space<smem>>, %arg7: memref<1x32x96xbf16, #tpu.memory_space<vmem>>, %arg8: memref<1x32x32xbf16, #tpu.memory_space<vmem>>, %arg9: memref<1x32x128xbf16, #tpu.memory_space<vmem>>, %arg10: memref<1x128x32xbf16, #tpu.memory_space<vmem>>, %arg11: memref<1x8x128xf32, #tpu.memory_space<vmem>>, %arg12: memref<1x32x96xbf16, #tpu.memory_space<vmem>>, %arg13: memref<1x32x32xbf16, #tpu.memory_space<vmem>>, %arg14: memref<1x32x32xbf16, #tpu.memory_space<vmem>>, %arg15: memref<1x32x64xbf16, #tpu.memory_space<vmem>>, %arg16: memref<1x32x32xbf16, #tpu.memory_space<vmem>>, %arg17: memref<1x32x128xbf16, #tpu.memory_space<vmem>>, %arg18: memref<1x128x32xbf16, #tpu.memory_space<vmem>>, %arg19: memref<1x16x128xf32, #tpu.memory_space<vmem>>, %arg20: memref<32x32xbf16, #tpu.memory_space<vmem>>, %arg21: memref<32x128xbf16, #tpu.memory_space<vmem>>, %arg22: memref<8x128xf32, #tpu.memory_space<vmem>>, %arg23: memref<1x128xf32, #tpu.memory_space<vmem>>, %arg24: memref<1x8x128xf32, #tpu.memory_space<vmem>>, %arg25: memref<1x8x128xf32, #tpu.memory_space<vmem>>, %arg26: memref<8x32xf32, #tpu.memory_space<vmem>>, %arg27: memref<8x32xf32, #tpu.memory_space<vmem>>) attributes {dimension_semantics = [#tpu.dimension_semantics<parallel>, #tpu.dimension_semantics<arbitrary>], iteration_bounds = array<i64: 2, 2>, scalar_prefetch = 0 : i64, scratch_operands = 2 : i64, tpu.core_type = #tpu.core_type<tc>, window_params = [{transform_indices = @transform_0, window_bounds = array<i64: 1, 8, 32>}, {transform_indices = @transform_1, window_bounds = array<i64: 1, 8, 32>}, {transform_indices = @transform_2, window_bounds = array<i64: 2, 2>}, {transform_indices = @transform_3, window_bounds = array<i64: 2, 2>}, {transform_indices = @transform_4, window_bounds = array<i64: 2, 2>}, {transform_indices = @transform_5, window_bounds = array<i64: 1, 32, 96>}, {transform_indices = @transform_6, window_bounds = array<i64: 1, 32, 32>}, {transform_indices = @transform_7, window_bounds = array<i64: 1, 32, 128>}, {transform_indices = @transform_8, window_bounds = array<i64: 1, 128, 32>}, {transform_indices = @transform_9, window_bounds = array<i64: 1, 8, 128>}, {transform_indices = @transform_10, window_bounds = array<i64: 1, 32, 96>}, {transform_indices = @transform_11, window_bounds = array<i64: 1, 32, 32>}, {transform_indices = @transform_12, window_bounds = array<i64: 1, 32, 32>}, {transform_indices = @transform_13, window_bounds = array<i64: 1, 32, 64>}, {transform_indices = @transform_14, window_bounds = array<i64: 1, 32, 32>}, {transform_indices = @transform_15, window_bounds = array<i64: 1, 32, 128>}, {transform_indices = @transform_16, window_bounds = array<i64: 1, 128, 32>}, {transform_indices = @transform_17, window_bounds = array<i64: 1, 16, 128>}, {pipeline_mode = #tpu.pipeline_mode<synchronous>, transform_indices = @transform_18, window_bounds = array<i64: 32, 32>}, {pipeline_mode = #tpu.pipeline_mode<synchronous>, transform_indices = @transform_19, window_bounds = array<i64: 32, 128>}, {pipeline_mode = #tpu.pipeline_mode<synchronous>, transform_indices = @transform_20, window_bounds = array<i64: 8, 128>}, {pipeline_mode = #tpu.pipeline_mode<synchronous>, transform_indices = @transform_21, window_bounds = array<i64: 1, 128>}, {transform_indices = @transform_22, window_bounds = array<i64: 1, 8, 128>}, {transform_indices = @transform_23, window_bounds = array<i64: 1, 8, 128>}]} {
    %c0_i32 = arith.constant 0 : i32
    %0 = arith.cmpi eq, %arg1, %c0_i32 : i32
    %1 = arith.extui %0 : i1 to i32
    %c0_i32_0 = arith.constant 0 : i32
    %2 = arith.cmpi ne, %1, %c0_i32_0 : i32
    scf.if %2 {
      %c0_170 = arith.constant 0 : index
      %c0_171 = arith.constant 0 : index
      %c0_172 = arith.constant 0 : index
      %590 = vector.load %arg2[%c0_170, %c0_171, %c0_172] : memref<1x8x32xf32, #tpu.memory_space<vmem>>, vector<1x8x32xf32>
      %591 = vector.shape_cast %590 : vector<1x8x32xf32> to vector<8x32xf32>
      %c0_173 = arith.constant 0 : index
      %c0_174 = arith.constant 0 : index
      %592 = vector.load %arg26[%c0_173, %c0_174] : memref<8x32xf32, #tpu.memory_space<vmem>>, vector<8x32xf32>
      tpu.vector_store %arg26[%c0_173, %c0_174], %591 {strides = array<i32>} : memref<8x32xf32, #tpu.memory_space<vmem>>, vector<8x32xf32>,
      %c0_175 = arith.constant 0 : index
      %c0_176 = arith.constant 0 : index
      %c0_177 = arith.constant 0 : index
      %593 = vector.load %arg3[%c0_175, %c0_176, %c0_177] : memref<1x8x32xf32, #tpu.memory_space<vmem>>, vector<1x8x32xf32>
      %594 = vector.shape_cast %593 : vector<1x8x32xf32> to vector<8x32xf32>
      %c0_178 = arith.constant 0 : index
      %c0_179 = arith.constant 0 : index
      %595 = vector.load %arg27[%c0_178, %c0_179] : memref<8x32xf32, #tpu.memory_space<vmem>>, vector<8x32xf32>
      tpu.vector_store %arg27[%c0_178, %c0_179], %594 {strides = array<i32>} : memref<8x32xf32, #tpu.memory_space<vmem>>, vector<8x32xf32>,
    } else {
    }
    %3 = arith.index_cast %arg0 : i32 to index
    %c0 = arith.constant 0 : index
    %4 = memref.load %arg4[%3, %c0] : memref<2x2xi32, #tpu.memory_space<smem>>
    %5 = arith.index_cast %arg0 : i32 to index
    %c1 = arith.constant 1 : index
    %6 = memref.load %arg4[%5, %c1] : memref<2x2xi32, #tpu.memory_space<smem>>
    %7 = arith.addi %4, %6 : i32
    %8 = arith.index_cast %arg0 : i32 to index
    %c0_1 = arith.constant 0 : index
    %9 = memref.load %arg5[%8, %c0_1] : memref<2x2xi32, #tpu.memory_space<smem>>
    %10 = arith.index_cast %arg0 : i32 to index
    %c1_2 = arith.constant 1 : index
    %11 = memref.load %arg5[%10, %c1_2] : memref<2x2xi32, #tpu.memory_space<smem>>
    %12 = arith.addi %9, %11 : i32
    %13 = arith.index_cast %arg0 : i32 to index
    %c0_3 = arith.constant 0 : index
    %14 = memref.load %arg6[%13, %c0_3] : memref<2x2xf32, #tpu.memory_space<smem>>
    %15 = arith.index_cast %arg0 : i32 to index
    %c1_4 = arith.constant 1 : index
    %16 = memref.load %arg6[%15, %c1_4] : memref<2x2xf32, #tpu.memory_space<smem>>
    %17 = tpu.iota {dimensions = array<i32: 1>} : vector<1x8xi32>
    %18 = vector.broadcast %7 : i32 to vector<1x8xi32>
    %19 = arith.cmpi slt, %17, %18 : vector<1x8xi32>
    %cst = arith.constant 0.000000e+00 : f32
    %cst_5 = arith.constant -1.000000e+09 : f32
    %20 = vector.broadcast %cst : f32 to vector<1x8xf32>
    %21 = vector.broadcast %cst_5 : f32 to vector<1x8xf32>
    %22 = arith.select %19, %20, %21 : vector<1x8xi1>, vector<1x8xf32>
    %23 = tpu.iota {dimensions = array<i32: 0>} : vector<8x8xi32>
    %24 = tpu.iota {dimensions = array<i32: 1>} : vector<8x8xi32>
    %25 = vector.broadcast %9 : i32 to vector<8x8xi32>
    %26 = arith.cmpi slt, %24, %25 : vector<8x8xi32>
    %27 = vector.broadcast %12 : i32 to vector<8x8xi32>
    %28 = arith.cmpi slt, %24, %27 : vector<8x8xi32>
    %cst_6 = arith.constant 0.000000e+00 : f32
    %29 = vector.broadcast %16 : f32 to vector<8x8xf32>
    %30 = vector.broadcast %cst_6 : f32 to vector<8x8xf32>
    %31 = arith.select %28, %29, %30 : vector<8x8xi1>, vector<8x8xf32>
    %32 = vector.broadcast %14 : f32 to vector<8x8xf32>
    %33 = arith.select %26, %32, %31 : vector<8x8xi1>, vector<8x8xf32>
    %34 = arith.cmpi sle, %24, %23 : vector<8x8xi32>
    %35 = vector.broadcast %12 : i32 to vector<8x8xi32>
    %36 = arith.cmpi slt, %24, %35 : vector<8x8xi32>
    %37 = arith.andi %34, %36 : vector<8x8xi1>
    %cst_7 = arith.constant 0.000000e+00 : f32
    %cst_8 = arith.constant -1.000000e+09 : f32
    %38 = vector.broadcast %cst_7 : f32 to vector<8x8xf32>
    %39 = vector.broadcast %cst_8 : f32 to vector<8x8xf32>
    %40 = arith.select %37, %38, %39 : vector<8x8xi1>, vector<8x8xf32>
    %41 = arith.addf %40, %33 : vector<8x8xf32>
    %c0_9 = arith.constant 0 : index
    %c0_10 = arith.constant 0 : index
    %c0_11 = arith.constant 0 : index
    %42 = vector.load %arg11[%c0_9, %c0_10, %c0_11] : memref<1x8x128xf32, #tpu.memory_space<vmem>>, vector<1x8x128xf32>
    %43 = vector.shape_cast %42 : vector<1x8x128xf32> to vector<8x128xf32>
    %c0_12 = arith.constant 0 : index
    %c0_13 = arith.constant 0 : index
    %44 = vector.load %arg26[%c0_12, %c0_13] : memref<8x32xf32, #tpu.memory_space<vmem>>, vector<8x32xf32>
    %45 = vector.extract_strided_slice %43 {offsets = [0, 0], sizes = [1, 32], strides = [1, 1]} : vector<8x128xf32> to vector<1x32xf32>
    %46 = vector.extract_strided_slice %43 {offsets = [1, 0], sizes = [1, 32], strides = [1, 1]} : vector<8x128xf32> to vector<1x32xf32>
    %cst_14 = arith.constant dense<0.000000e+00> : vector<8xf32>
    %47 = vector.multi_reduction <add>, %44, %cst_14 [1] : vector<8x32xf32> to vector<8xf32>
    %48 = vector.shape_cast %47 : vector<8xf32> to vector<8x1xf32>
    %cst_15 = arith.constant 3.200000e+01 : f32
    %49 = vector.broadcast %cst_15 : f32 to vector<8x1xf32>
    %50 = arith.divf %48, %49 : vector<8x1xf32>
    %51 = vector.broadcast %50 : vector<8x1xf32> to vector<8x32xf32>
    %52 = arith.subf %44, %51 : vector<8x32xf32>
    %53 = arith.mulf %52, %52 : vector<8x32xf32>
    %cst_16 = arith.constant dense<0.000000e+00> : vector<8xf32>
    %54 = vector.multi_reduction <add>, %53, %cst_16 [1] : vector<8x32xf32> to vector<8xf32>
    %55 = vector.shape_cast %54 : vector<8xf32> to vector<8x1xf32>
    %cst_17 = arith.constant 3.200000e+01 : f32
    %56 = vector.broadcast %cst_17 : f32 to vector<8x1xf32>
    %57 = arith.divf %55, %56 : vector<8x1xf32>
    %cst_18 = arith.constant 9.99999974E-6 : f32
    %58 = vector.broadcast %cst_18 : f32 to vector<8x1xf32>
    %59 = arith.addf %57, %58 : vector<8x1xf32>
    %60 = math.rsqrt %59 : vector<8x1xf32>
    %61 = vector.broadcast %60 : vector<8x1xf32> to vector<8x32xf32>
    %62 = arith.mulf %52, %61 : vector<8x32xf32>
    %63 = vector.broadcast %45 : vector<1x32xf32> to vector<8x32xf32>
    %64 = arith.mulf %62, %63 : vector<8x32xf32>
    %65 = vector.broadcast %46 : vector<1x32xf32> to vector<8x32xf32>
    %66 = arith.addf %64, %65 : vector<8x32xf32>
    %c0_19 = arith.constant 0 : index
    %c0_20 = arith.constant 0 : index
    %c0_21 = arith.constant 0 : index
    %67 = vector.load %arg7[%c0_19, %c0_20, %c0_21] : memref<1x32x96xbf16, #tpu.memory_space<vmem>>, vector<1x32x96xbf16>
    %68 = vector.shape_cast %67 : vector<1x32x96xbf16> to vector<32x96xbf16>
    %69 = arith.truncf %66 : vector<8x32xf32> to vector<8x32xbf16>
    %cst_22 = arith.constant dense<0.000000e+00> : vector<8x96xf32>
    %70 = tpu.matmul %69, %68, %cst_22 {dimension_numbers = #tpu.dot_dimension_numbers<[1], [0], [0], [1], [0, 0, 1, 1], [], []>} : vector<8x32xbf16>, vector<32x96xbf16>, vector<8x96xf32> -> vector<8x96xf32>
    %71 = vector.extract_strided_slice %43 {offsets = [4, 0], sizes = [1, 96], strides = [1, 1]} : vector<8x128xf32> to vector<1x96xf32>
    %72 = vector.broadcast %71 : vector<1x96xf32> to vector<8x96xf32>
    %73 = arith.addf %70, %72 : vector<8x96xf32>
    %74 = vector.extract_strided_slice %73 {offsets = [0, 0], sizes = [8, 32], strides = [1, 1]} : vector<8x96xf32> to vector<8x32xf32>
    %75 = vector.extract_strided_slice %73 {offsets = [0, 32], sizes = [8, 32], strides = [1, 1]} : vector<8x96xf32> to vector<8x32xf32>
    %76 = vector.extract_strided_slice %73 {offsets = [0, 64], sizes = [8, 32], strides = [1, 1]} : vector<8x96xf32> to vector<8x32xf32>
    %c0_23 = arith.constant 0 : index
    %c0_24 = arith.constant 0 : index
    %c0_25 = arith.constant 0 : index
    %77 = vector.load %arg8[%c0_23, %c0_24, %c0_25] : memref<1x32x32xbf16, #tpu.memory_space<vmem>>, vector<1x32x32xbf16>
    %78 = vector.shape_cast %77 : vector<1x32x32xbf16> to vector<32x32xbf16>
    %79 = vector.extract_strided_slice %74 {offsets = [0, 0], sizes = [8, 8], strides = [1, 1]} : vector<8x32xf32> to vector<8x8xf32>
    %cst_26 = arith.constant 0.353553385 : f32
    %80 = vector.broadcast %cst_26 : f32 to vector<8x8xf32>
    %81 = arith.mulf %79, %80 : vector<8x8xf32>
    %82 = arith.truncf %81 : vector<8x8xf32> to vector<8x8xbf16>
    %83 = vector.extract_strided_slice %75 {offsets = [0, 0], sizes = [8, 8], strides = [1, 1]} : vector<8x32xf32> to vector<8x8xf32>
    %84 = arith.truncf %83 : vector<8x8xf32> to vector<8x8xbf16>
    %85 = vector.extract_strided_slice %76 {offsets = [0, 0], sizes = [8, 8], strides = [1, 1]} : vector<8x32xf32> to vector<8x8xf32>
    %86 = arith.truncf %85 : vector<8x8xf32> to vector<8x8xbf16>
    "tpu.trace_start"() <{level = 10 : i32, message = "qd,kd->qk"}> : () -> ()
    %cst_27 = arith.constant dense<0.000000e+00> : vector<8x8xf32>
    %87 = tpu.matmul %82, %84, %cst_27 {dimension_numbers = #tpu.dot_dimension_numbers<[1], [1], [0], [0], [0, 0, 1, 0], [], []>} : vector<8x8xbf16>, vector<8x8xbf16>, vector<8x8xf32> -> vector<8x8xf32>
    "tpu.trace_stop"() : () -> ()
    %88 = vector.broadcast %22 : vector<1x8xf32> to vector<8x8xf32>
    %89 = arith.addf %87, %88 : vector<8x8xf32>
    %cst_28 = arith.constant dense<0xFF800000> : vector<8xf32>
    %90 = vector.multi_reduction <maximumf>, %89, %cst_28 [1] : vector<8x8xf32> to vector<8xf32>
    %91 = vector.shape_cast %90 : vector<8xf32> to vector<8x1xf32>
    %92 = vector.broadcast %91 : vector<8x1xf32> to vector<8x8xf32>
    %93 = arith.subf %89, %92 : vector<8x8xf32>
    %94 = math.exp %93 : vector<8x8xf32>
    %cst_29 = arith.constant dense<0.000000e+00> : vector<8xf32>
    %95 = vector.multi_reduction <add>, %94, %cst_29 [1] : vector<8x8xf32> to vector<8xf32>
    %96 = vector.shape_cast %95 : vector<8xf32> to vector<8x1xf32>
    %97 = arith.truncf %94 : vector<8x8xf32> to vector<8x8xbf16>
    %cst_30 = arith.constant dense<0.000000e+00> : vector<8x8xf32>
    %98 = tpu.matmul %97, %86, %cst_30 {dimension_numbers = #tpu.dot_dimension_numbers<[1], [0], [0], [1], [0, 0, 1, 1], [], []>} : vector<8x8xbf16>, vector<8x8xbf16>, vector<8x8xf32> -> vector<8x8xf32>
    %99 = tpu.reciprocal %96 {approx = true} : vector<8x1xf32> -> vector<8x1xf32>
    %100 = vector.broadcast %99 : vector<8x1xf32> to vector<8x8xf32>
    %101 = arith.mulf %98, %100 : vector<8x8xf32>
    %102 = arith.truncf %101 : vector<8x8xf32> to vector<8x8xbf16>
    %103 = vector.extract_strided_slice %78 {offsets = [0, 0], sizes = [8, 32], strides = [1, 1]} : vector<32x32xbf16> to vector<8x32xbf16>
    %cst_31 = arith.constant dense<0.000000e+00> : vector<8x32xf32>
    %104 = tpu.matmul %102, %103, %cst_31 {dimension_numbers = #tpu.dot_dimension_numbers<[1], [0], [0], [1], [0, 0, 1, 1], [], []>} : vector<8x8xbf16>, vector<8x32xbf16>, vector<8x32xf32> -> vector<8x32xf32>
    %105 = vector.extract_strided_slice %74 {offsets = [0, 8], sizes = [8, 8], strides = [1, 1]} : vector<8x32xf32> to vector<8x8xf32>
    %cst_32 = arith.constant 0.353553385 : f32
    %106 = vector.broadcast %cst_32 : f32 to vector<8x8xf32>
    %107 = arith.mulf %105, %106 : vector<8x8xf32>
    %108 = arith.truncf %107 : vector<8x8xf32> to vector<8x8xbf16>
    %109 = vector.extract_strided_slice %75 {offsets = [0, 8], sizes = [8, 8], strides = [1, 1]} : vector<8x32xf32> to vector<8x8xf32>
    %110 = arith.truncf %109 : vector<8x8xf32> to vector<8x8xbf16>
    %111 = vector.extract_strided_slice %76 {offsets = [0, 8], sizes = [8, 8], strides = [1, 1]} : vector<8x32xf32> to vector<8x8xf32>
    %112 = arith.truncf %111 : vector<8x8xf32> to vector<8x8xbf16>
    "tpu.trace_start"() <{level = 10 : i32, message = "qd,kd->qk"}> : () -> ()
    %cst_33 = arith.constant dense<0.000000e+00> : vector<8x8xf32>
    %113 = tpu.matmul %108, %110, %cst_33 {dimension_numbers = #tpu.dot_dimension_numbers<[1], [1], [0], [0], [0, 0, 1, 0], [], []>} : vector<8x8xbf16>, vector<8x8xbf16>, vector<8x8xf32> -> vector<8x8xf32>
    "tpu.trace_stop"() : () -> ()
    %114 = vector.broadcast %22 : vector<1x8xf32> to vector<8x8xf32>
    %115 = arith.addf %113, %114 : vector<8x8xf32>
    %cst_34 = arith.constant dense<0xFF800000> : vector<8xf32>
    %116 = vector.multi_reduction <maximumf>, %115, %cst_34 [1] : vector<8x8xf32> to vector<8xf32>
    %117 = vector.shape_cast %116 : vector<8xf32> to vector<8x1xf32>
    %118 = vector.broadcast %117 : vector<8x1xf32> to vector<8x8xf32>
    %119 = arith.subf %115, %118 : vector<8x8xf32>
    %120 = math.exp %119 : vector<8x8xf32>
    %cst_35 = arith.constant dense<0.000000e+00> : vector<8xf32>
    %121 = vector.multi_reduction <add>, %120, %cst_35 [1] : vector<8x8xf32> to vector<8xf32>
    %122 = vector.shape_cast %121 : vector<8xf32> to vector<8x1xf32>
    %123 = arith.truncf %120 : vector<8x8xf32> to vector<8x8xbf16>
    %cst_36 = arith.constant dense<0.000000e+00> : vector<8x8xf32>
    %124 = tpu.matmul %123, %112, %cst_36 {dimension_numbers = #tpu.dot_dimension_numbers<[1], [0], [0], [1], [0, 0, 1, 1], [], []>} : vector<8x8xbf16>, vector<8x8xbf16>, vector<8x8xf32> -> vector<8x8xf32>
    %125 = tpu.reciprocal %122 {approx = true} : vector<8x1xf32> -> vector<8x1xf32>
    %126 = vector.broadcast %125 : vector<8x1xf32> to vector<8x8xf32>
    %127 = arith.mulf %124, %126 : vector<8x8xf32>
    %128 = arith.truncf %127 : vector<8x8xf32> to vector<8x8xbf16>
    %129 = vector.extract_strided_slice %78 {offsets = [8, 0], sizes = [8, 32], strides = [1, 1]} : vector<32x32xbf16> to vector<8x32xbf16>
    %cst_37 = arith.constant dense<0.000000e+00> : vector<8x32xf32>
    %130 = tpu.matmul %128, %129, %cst_37 {dimension_numbers = #tpu.dot_dimension_numbers<[1], [0], [0], [1], [0, 0, 1, 1], [], []>} : vector<8x8xbf16>, vector<8x32xbf16>, vector<8x32xf32> -> vector<8x32xf32>
    %131 = arith.addf %104, %130 : vector<8x32xf32>
    %132 = vector.extract_strided_slice %74 {offsets = [0, 16], sizes = [8, 8], strides = [1, 1]} : vector<8x32xf32> to vector<8x8xf32>
    %cst_38 = arith.constant 0.353553385 : f32
    %133 = vector.broadcast %cst_38 : f32 to vector<8x8xf32>
    %134 = arith.mulf %132, %133 : vector<8x8xf32>
    %135 = arith.truncf %134 : vector<8x8xf32> to vector<8x8xbf16>
    %136 = vector.extract_strided_slice %75 {offsets = [0, 16], sizes = [8, 8], strides = [1, 1]} : vector<8x32xf32> to vector<8x8xf32>
    %137 = arith.truncf %136 : vector<8x8xf32> to vector<8x8xbf16>
    %138 = vector.extract_strided_slice %76 {offsets = [0, 16], sizes = [8, 8], strides = [1, 1]} : vector<8x32xf32> to vector<8x8xf32>
    %139 = arith.truncf %138 : vector<8x8xf32> to vector<8x8xbf16>
    "tpu.trace_start"() <{level = 10 : i32, message = "qd,kd->qk"}> : () -> ()
    %cst_39 = arith.constant dense<0.000000e+00> : vector<8x8xf32>
    %140 = tpu.matmul %135, %137, %cst_39 {dimension_numbers = #tpu.dot_dimension_numbers<[1], [1], [0], [0], [0, 0, 1, 0], [], []>} : vector<8x8xbf16>, vector<8x8xbf16>, vector<8x8xf32> -> vector<8x8xf32>
    "tpu.trace_stop"() : () -> ()
    %141 = vector.broadcast %22 : vector<1x8xf32> to vector<8x8xf32>
    %142 = arith.addf %140, %141 : vector<8x8xf32>
    %cst_40 = arith.constant dense<0xFF800000> : vector<8xf32>
    %143 = vector.multi_reduction <maximumf>, %142, %cst_40 [1] : vector<8x8xf32> to vector<8xf32>
    %144 = vector.shape_cast %143 : vector<8xf32> to vector<8x1xf32>
    %145 = vector.broadcast %144 : vector<8x1xf32> to vector<8x8xf32>
    %146 = arith.subf %142, %145 : vector<8x8xf32>
    %147 = math.exp %146 : vector<8x8xf32>
    %cst_41 = arith.constant dense<0.000000e+00> : vector<8xf32>
    %148 = vector.multi_reduction <add>, %147, %cst_41 [1] : vector<8x8xf32> to vector<8xf32>
    %149 = vector.shape_cast %148 : vector<8xf32> to vector<8x1xf32>
    %150 = arith.truncf %147 : vector<8x8xf32> to vector<8x8xbf16>
    %cst_42 = arith.constant dense<0.000000e+00> : vector<8x8xf32>
    %151 = tpu.matmul %150, %139, %cst_42 {dimension_numbers = #tpu.dot_dimension_numbers<[1], [0], [0], [1], [0, 0, 1, 1], [], []>} : vector<8x8xbf16>, vector<8x8xbf16>, vector<8x8xf32> -> vector<8x8xf32>
    %152 = tpu.reciprocal %149 {approx = true} : vector<8x1xf32> -> vector<8x1xf32>
    %153 = vector.broadcast %152 : vector<8x1xf32> to vector<8x8xf32>
    %154 = arith.mulf %151, %153 : vector<8x8xf32>
    %155 = arith.truncf %154 : vector<8x8xf32> to vector<8x8xbf16>
    %156 = vector.extract_strided_slice %78 {offsets = [16, 0], sizes = [8, 32], strides = [1, 1]} : vector<32x32xbf16> to vector<8x32xbf16>
    %cst_43 = arith.constant dense<0.000000e+00> : vector<8x32xf32>
    %157 = tpu.matmul %155, %156, %cst_43 {dimension_numbers = #tpu.dot_dimension_numbers<[1], [0], [0], [1], [0, 0, 1, 1], [], []>} : vector<8x8xbf16>, vector<8x32xbf16>, vector<8x32xf32> -> vector<8x32xf32>
    %158 = arith.addf %131, %157 : vector<8x32xf32>
    %159 = vector.extract_strided_slice %74 {offsets = [0, 24], sizes = [8, 8], strides = [1, 1]} : vector<8x32xf32> to vector<8x8xf32>
    %cst_44 = arith.constant 0.353553385 : f32
    %160 = vector.broadcast %cst_44 : f32 to vector<8x8xf32>
    %161 = arith.mulf %159, %160 : vector<8x8xf32>
    %162 = arith.truncf %161 : vector<8x8xf32> to vector<8x8xbf16>
    %163 = vector.extract_strided_slice %75 {offsets = [0, 24], sizes = [8, 8], strides = [1, 1]} : vector<8x32xf32> to vector<8x8xf32>
    %164 = arith.truncf %163 : vector<8x8xf32> to vector<8x8xbf16>
    %165 = vector.extract_strided_slice %76 {offsets = [0, 24], sizes = [8, 8], strides = [1, 1]} : vector<8x32xf32> to vector<8x8xf32>
    %166 = arith.truncf %165 : vector<8x8xf32> to vector<8x8xbf16>
    "tpu.trace_start"() <{level = 10 : i32, message = "qd,kd->qk"}> : () -> ()
    %cst_45 = arith.constant dense<0.000000e+00> : vector<8x8xf32>
    %167 = tpu.matmul %162, %164, %cst_45 {dimension_numbers = #tpu.dot_dimension_numbers<[1], [1], [0], [0], [0, 0, 1, 0], [], []>} : vector<8x8xbf16>, vector<8x8xbf16>, vector<8x8xf32> -> vector<8x8xf32>
    "tpu.trace_stop"() : () -> ()
    %168 = vector.broadcast %22 : vector<1x8xf32> to vector<8x8xf32>
    %169 = arith.addf %167, %168 : vector<8x8xf32>
    %cst_46 = arith.constant dense<0xFF800000> : vector<8xf32>
    %170 = vector.multi_reduction <maximumf>, %169, %cst_46 [1] : vector<8x8xf32> to vector<8xf32>
    %171 = vector.shape_cast %170 : vector<8xf32> to vector<8x1xf32>
    %172 = vector.broadcast %171 : vector<8x1xf32> to vector<8x8xf32>
    %173 = arith.subf %169, %172 : vector<8x8xf32>
    %174 = math.exp %173 : vector<8x8xf32>
    %cst_47 = arith.constant dense<0.000000e+00> : vector<8xf32>
    %175 = vector.multi_reduction <add>, %174, %cst_47 [1] : vector<8x8xf32> to vector<8xf32>
    %176 = vector.shape_cast %175 : vector<8xf32> to vector<8x1xf32>
    %177 = arith.truncf %174 : vector<8x8xf32> to vector<8x8xbf16>
    %cst_48 = arith.constant dense<0.000000e+00> : vector<8x8xf32>
    %178 = tpu.matmul %177, %166, %cst_48 {dimension_numbers = #tpu.dot_dimension_numbers<[1], [0], [0], [1], [0, 0, 1, 1], [], []>} : vector<8x8xbf16>, vector<8x8xbf16>, vector<8x8xf32> -> vector<8x8xf32>
    %179 = tpu.reciprocal %176 {approx = true} : vector<8x1xf32> -> vector<8x1xf32>
    %180 = vector.broadcast %179 : vector<8x1xf32> to vector<8x8xf32>
    %181 = arith.mulf %178, %180 : vector<8x8xf32>
    %182 = arith.truncf %181 : vector<8x8xf32> to vector<8x8xbf16>
    %183 = vector.extract_strided_slice %78 {offsets = [24, 0], sizes = [8, 32], strides = [1, 1]} : vector<32x32xbf16> to vector<8x32xbf16>
    %cst_49 = arith.constant dense<0.000000e+00> : vector<8x32xf32>
    %184 = tpu.matmul %182, %183, %cst_49 {dimension_numbers = #tpu.dot_dimension_numbers<[1], [0], [0], [1], [0, 0, 1, 1], [], []>} : vector<8x8xbf16>, vector<8x32xbf16>, vector<8x32xf32> -> vector<8x32xf32>
    %185 = arith.addf %158, %184 : vector<8x32xf32>
    %186 = arith.addf %44, %185 : vector<8x32xf32>
    %187 = vector.extract_strided_slice %43 {offsets = [5, 0], sizes = [1, 32], strides = [1, 1]} : vector<8x128xf32> to vector<1x32xf32>
    %188 = vector.broadcast %187 : vector<1x32xf32> to vector<8x32xf32>
    %189 = arith.addf %186, %188 : vector<8x32xf32>
    %190 = vector.extract_strided_slice %43 {offsets = [2, 0], sizes = [1, 32], strides = [1, 1]} : vector<8x128xf32> to vector<1x32xf32>
    %191 = vector.extract_strided_slice %43 {offsets = [3, 0], sizes = [1, 32], strides = [1, 1]} : vector<8x128xf32> to vector<1x32xf32>
    %cst_50 = arith.constant dense<0.000000e+00> : vector<8xf32>
    %192 = vector.multi_reduction <add>, %189, %cst_50 [1] : vector<8x32xf32> to vector<8xf32>
    %193 = vector.shape_cast %192 : vector<8xf32> to vector<8x1xf32>
    %cst_51 = arith.constant 3.200000e+01 : f32
    %194 = vector.broadcast %cst_51 : f32 to vector<8x1xf32>
    %195 = arith.divf %193, %194 : vector<8x1xf32>
    %196 = vector.broadcast %195 : vector<8x1xf32> to vector<8x32xf32>
    %197 = arith.subf %189, %196 : vector<8x32xf32>
    %198 = arith.mulf %197, %197 : vector<8x32xf32>
    %cst_52 = arith.constant dense<0.000000e+00> : vector<8xf32>
    %199 = vector.multi_reduction <add>, %198, %cst_52 [1] : vector<8x32xf32> to vector<8xf32>
    %200 = vector.shape_cast %199 : vector<8xf32> to vector<8x1xf32>
    %cst_53 = arith.constant 3.200000e+01 : f32
    %201 = vector.broadcast %cst_53 : f32 to vector<8x1xf32>
    %202 = arith.divf %200, %201 : vector<8x1xf32>
    %cst_54 = arith.constant 9.99999974E-6 : f32
    %203 = vector.broadcast %cst_54 : f32 to vector<8x1xf32>
    %204 = arith.addf %202, %203 : vector<8x1xf32>
    %205 = math.rsqrt %204 : vector<8x1xf32>
    %206 = vector.broadcast %205 : vector<8x1xf32> to vector<8x32xf32>
    %207 = arith.mulf %197, %206 : vector<8x32xf32>
    %208 = vector.broadcast %190 : vector<1x32xf32> to vector<8x32xf32>
    %209 = arith.mulf %207, %208 : vector<8x32xf32>
    %210 = vector.broadcast %191 : vector<1x32xf32> to vector<8x32xf32>
    %211 = arith.addf %209, %210 : vector<8x32xf32>
    %c0_55 = arith.constant 0 : index
    %c0_56 = arith.constant 0 : index
    %c0_57 = arith.constant 0 : index
    %212 = vector.load %arg9[%c0_55, %c0_56, %c0_57] : memref<1x32x128xbf16, #tpu.memory_space<vmem>>, vector<1x32x128xbf16>
    %213 = vector.shape_cast %212 : vector<1x32x128xbf16> to vector<32x128xbf16>
    %214 = arith.truncf %211 : vector<8x32xf32> to vector<8x32xbf16>
    %cst_58 = arith.constant dense<0.000000e+00> : vector<8x128xf32>
    %215 = tpu.matmul %214, %213, %cst_58 {dimension_numbers = #tpu.dot_dimension_numbers<[1], [0], [0], [1], [0, 0, 1, 1], [], []>} : vector<8x32xbf16>, vector<32x128xbf16>, vector<8x128xf32> -> vector<8x128xf32>
    %216 = vector.extract_strided_slice %43 {offsets = [6, 0], sizes = [1, 128], strides = [1, 1]} : vector<8x128xf32> to vector<1x128xf32>
    %217 = vector.broadcast %216 : vector<1x128xf32> to vector<8x128xf32>
    %218 = arith.addf %215, %217 : vector<8x128xf32>
    %219 = arith.mulf %218, %218 : vector<8x128xf32>
    %220 = arith.mulf %218, %219 : vector<8x128xf32>
    %cst_59 = arith.constant 4.471500e-02 : f32
    %221 = vector.broadcast %cst_59 : f32 to vector<8x128xf32>
    %222 = arith.mulf %221, %220 : vector<8x128xf32>
    %223 = arith.addf %218, %222 : vector<8x128xf32>
    %cst_60 = arith.constant 0.797884583 : f32
    %224 = vector.broadcast %cst_60 : f32 to vector<8x128xf32>
    %225 = arith.mulf %224, %223 : vector<8x128xf32>
    %226 = math.tanh %225 : vector<8x128xf32>
    %cst_61 = arith.constant 1.000000e+00 : f32
    %227 = vector.broadcast %cst_61 : f32 to vector<8x128xf32>
    %228 = arith.addf %227, %226 : vector<8x128xf32>
    %cst_62 = arith.constant 5.000000e-01 : f32
    %229 = vector.broadcast %cst_62 : f32 to vector<8x128xf32>
    %230 = arith.mulf %229, %228 : vector<8x128xf32>
    %231 = arith.mulf %218, %230 : vector<8x128xf32>
    %c0_63 = arith.constant 0 : index
    %c0_64 = arith.constant 0 : index
    %c0_65 = arith.constant 0 : index
    %232 = vector.load %arg10[%c0_63, %c0_64, %c0_65] : memref<1x128x32xbf16, #tpu.memory_space<vmem>>, vector<1x128x32xbf16>
    %233 = vector.shape_cast %232 : vector<1x128x32xbf16> to vector<128x32xbf16>
    %234 = arith.truncf %231 : vector<8x128xf32> to vector<8x128xbf16>
    %cst_66 = arith.constant dense<0.000000e+00> : vector<8x32xf32>
    %235 = tpu.matmul %234, %233, %cst_66 {dimension_numbers = #tpu.dot_dimension_numbers<[1], [0], [0], [1], [0, 0, 1, 1], [], []>} : vector<8x128xbf16>, vector<128x32xbf16>, vector<8x32xf32> -> vector<8x32xf32>
    %236 = arith.addf %189, %235 : vector<8x32xf32>
    %237 = vector.extract_strided_slice %43 {offsets = [7, 0], sizes = [1, 32], strides = [1, 1]} : vector<8x128xf32> to vector<1x32xf32>
    %238 = vector.broadcast %237 : vector<1x32xf32> to vector<8x32xf32>
    %239 = arith.addf %236, %238 : vector<8x32xf32>
    %c0_67 = arith.constant 0 : index
    %c0_68 = arith.constant 0 : index
    %240 = vector.load %arg26[%c0_67, %c0_68] : memref<8x32xf32, #tpu.memory_space<vmem>>, vector<8x32xf32>
    tpu.vector_store %arg26[%c0_67, %c0_68], %239 {strides = array<i32>} : memref<8x32xf32, #tpu.memory_space<vmem>>, vector<8x32xf32>,
    %c0_69 = arith.constant 0 : index
    %c0_70 = arith.constant 0 : index
    %c0_71 = arith.constant 0 : index
    %241 = vector.load %arg19[%c0_69, %c0_70, %c0_71] : memref<1x16x128xf32, #tpu.memory_space<vmem>>, vector<1x16x128xf32>
    %242 = vector.shape_cast %241 : vector<1x16x128xf32> to vector<16x128xf32>
    %c0_72 = arith.constant 0 : index
    %c0_73 = arith.constant 0 : index
    %243 = vector.load %arg27[%c0_72, %c0_73] : memref<8x32xf32, #tpu.memory_space<vmem>>, vector<8x32xf32>
    %244 = vector.extract_strided_slice %242 {offsets = [0, 0], sizes = [1, 32], strides = [1, 1]} : vector<16x128xf32> to vector<1x32xf32>
    %245 = vector.extract_strided_slice %242 {offsets = [1, 0], sizes = [1, 32], strides = [1, 1]} : vector<16x128xf32> to vector<1x32xf32>
    %cst_74 = arith.constant dense<0.000000e+00> : vector<8xf32>
    %246 = vector.multi_reduction <add>, %243, %cst_74 [1] : vector<8x32xf32> to vector<8xf32>
    %247 = vector.shape_cast %246 : vector<8xf32> to vector<8x1xf32>
    %cst_75 = arith.constant 3.200000e+01 : f32
    %248 = vector.broadcast %cst_75 : f32 to vector<8x1xf32>
    %249 = arith.divf %247, %248 : vector<8x1xf32>
    %250 = vector.broadcast %249 : vector<8x1xf32> to vector<8x32xf32>
    %251 = arith.subf %243, %250 : vector<8x32xf32>
    %252 = arith.mulf %251, %251 : vector<8x32xf32>
    %cst_76 = arith.constant dense<0.000000e+00> : vector<8xf32>
    %253 = vector.multi_reduction <add>, %252, %cst_76 [1] : vector<8x32xf32> to vector<8xf32>
    %254 = vector.shape_cast %253 : vector<8xf32> to vector<8x1xf32>
    %cst_77 = arith.constant 3.200000e+01 : f32
    %255 = vector.broadcast %cst_77 : f32 to vector<8x1xf32>
    %256 = arith.divf %254, %255 : vector<8x1xf32>
    %cst_78 = arith.constant 9.99999974E-6 : f32
    %257 = vector.broadcast %cst_78 : f32 to vector<8x1xf32>
    %258 = arith.addf %256, %257 : vector<8x1xf32>
    %259 = math.rsqrt %258 : vector<8x1xf32>
    %260 = vector.broadcast %259 : vector<8x1xf32> to vector<8x32xf32>
    %261 = arith.mulf %251, %260 : vector<8x32xf32>
    %262 = vector.broadcast %244 : vector<1x32xf32> to vector<8x32xf32>
    %263 = arith.mulf %261, %262 : vector<8x32xf32>
    %264 = vector.broadcast %245 : vector<1x32xf32> to vector<8x32xf32>
    %265 = arith.addf %263, %264 : vector<8x32xf32>
    %c0_79 = arith.constant 0 : index
    %c0_80 = arith.constant 0 : index
    %c0_81 = arith.constant 0 : index
    %266 = vector.load %arg12[%c0_79, %c0_80, %c0_81] : memref<1x32x96xbf16, #tpu.memory_space<vmem>>, vector<1x32x96xbf16>
    %267 = vector.shape_cast %266 : vector<1x32x96xbf16> to vector<32x96xbf16>
    %268 = arith.truncf %265 : vector<8x32xf32> to vector<8x32xbf16>
    %cst_82 = arith.constant dense<0.000000e+00> : vector<8x96xf32>
    %269 = tpu.matmul %268, %267, %cst_82 {dimension_numbers = #tpu.dot_dimension_numbers<[1], [0], [0], [1], [0, 0, 1, 1], [], []>} : vector<8x32xbf16>, vector<32x96xbf16>, vector<8x96xf32> -> vector<8x96xf32>
    %270 = vector.extract_strided_slice %242 {offsets = [6, 0], sizes = [1, 96], strides = [1, 1]} : vector<16x128xf32> to vector<1x96xf32>
    %271 = vector.broadcast %270 : vector<1x96xf32> to vector<8x96xf32>
    %272 = arith.addf %269, %271 : vector<8x96xf32>
    %273 = vector.extract_strided_slice %272 {offsets = [0, 0], sizes = [8, 32], strides = [1, 1]} : vector<8x96xf32> to vector<8x32xf32>
    %274 = vector.extract_strided_slice %272 {offsets = [0, 32], sizes = [8, 32], strides = [1, 1]} : vector<8x96xf32> to vector<8x32xf32>
    %275 = vector.extract_strided_slice %272 {offsets = [0, 64], sizes = [8, 32], strides = [1, 1]} : vector<8x96xf32> to vector<8x32xf32>
    %c0_83 = arith.constant 0 : index
    %c0_84 = arith.constant 0 : index
    %c0_85 = arith.constant 0 : index
    %276 = vector.load %arg13[%c0_83, %c0_84, %c0_85] : memref<1x32x32xbf16, #tpu.memory_space<vmem>>, vector<1x32x32xbf16>
    %277 = vector.shape_cast %276 : vector<1x32x32xbf16> to vector<32x32xbf16>
    %278 = vector.extract_strided_slice %273 {offsets = [0, 0], sizes = [8, 8], strides = [1, 1]} : vector<8x32xf32> to vector<8x8xf32>
    %cst_86 = arith.constant 0.353553385 : f32
    %279 = vector.broadcast %cst_86 : f32 to vector<8x8xf32>
    %280 = arith.mulf %278, %279 : vector<8x8xf32>
    %281 = arith.truncf %280 : vector<8x8xf32> to vector<8x8xbf16>
    %282 = vector.extract_strided_slice %274 {offsets = [0, 0], sizes = [8, 8], strides = [1, 1]} : vector<8x32xf32> to vector<8x8xf32>
    %283 = arith.truncf %282 : vector<8x8xf32> to vector<8x8xbf16>
    %284 = vector.extract_strided_slice %275 {offsets = [0, 0], sizes = [8, 8], strides = [1, 1]} : vector<8x32xf32> to vector<8x8xf32>
    %285 = arith.truncf %284 : vector<8x8xf32> to vector<8x8xbf16>
    "tpu.trace_start"() <{level = 10 : i32, message = "qd,kd->qk"}> : () -> ()
    %cst_87 = arith.constant dense<0.000000e+00> : vector<8x8xf32>
    %286 = tpu.matmul %281, %283, %cst_87 {dimension_numbers = #tpu.dot_dimension_numbers<[1], [1], [0], [0], [0, 0, 1, 0], [], []>} : vector<8x8xbf16>, vector<8x8xbf16>, vector<8x8xf32> -> vector<8x8xf32>
    "tpu.trace_stop"() : () -> ()
    %287 = arith.addf %286, %41 : vector<8x8xf32>
    %cst_88 = arith.constant dense<0xFF800000> : vector<8xf32>
    %288 = vector.multi_reduction <maximumf>, %287, %cst_88 [1] : vector<8x8xf32> to vector<8xf32>
    %289 = vector.shape_cast %288 : vector<8xf32> to vector<8x1xf32>
    %290 = vector.broadcast %289 : vector<8x1xf32> to vector<8x8xf32>
    %291 = arith.subf %287, %290 : vector<8x8xf32>
    %292 = math.exp %291 : vector<8x8xf32>
    %cst_89 = arith.constant dense<0.000000e+00> : vector<8xf32>
    %293 = vector.multi_reduction <add>, %292, %cst_89 [1] : vector<8x8xf32> to vector<8xf32>
    %294 = vector.shape_cast %293 : vector<8xf32> to vector<8x1xf32>
    %295 = arith.truncf %292 : vector<8x8xf32> to vector<8x8xbf16>
    %cst_90 = arith.constant dense<0.000000e+00> : vector<8x8xf32>
    %296 = tpu.matmul %295, %285, %cst_90 {dimension_numbers = #tpu.dot_dimension_numbers<[1], [0], [0], [1], [0, 0, 1, 1], [], []>} : vector<8x8xbf16>, vector<8x8xbf16>, vector<8x8xf32> -> vector<8x8xf32>
    %297 = tpu.reciprocal %294 {approx = true} : vector<8x1xf32> -> vector<8x1xf32>
    %298 = vector.broadcast %297 : vector<8x1xf32> to vector<8x8xf32>
    %299 = arith.mulf %296, %298 : vector<8x8xf32>
    %300 = arith.truncf %299 : vector<8x8xf32> to vector<8x8xbf16>
    %301 = vector.extract_strided_slice %277 {offsets = [0, 0], sizes = [8, 32], strides = [1, 1]} : vector<32x32xbf16> to vector<8x32xbf16>
    %cst_91 = arith.constant dense<0.000000e+00> : vector<8x32xf32>
    %302 = tpu.matmul %300, %301, %cst_91 {dimension_numbers = #tpu.dot_dimension_numbers<[1], [0], [0], [1], [0, 0, 1, 1], [], []>} : vector<8x8xbf16>, vector<8x32xbf16>, vector<8x32xf32> -> vector<8x32xf32>
    %303 = vector.extract_strided_slice %273 {offsets = [0, 8], sizes = [8, 8], strides = [1, 1]} : vector<8x32xf32> to vector<8x8xf32>
    %cst_92 = arith.constant 0.353553385 : f32
    %304 = vector.broadcast %cst_92 : f32 to vector<8x8xf32>
    %305 = arith.mulf %303, %304 : vector<8x8xf32>
    %306 = arith.truncf %305 : vector<8x8xf32> to vector<8x8xbf16>
    %307 = vector.extract_strided_slice %274 {offsets = [0, 8], sizes = [8, 8], strides = [1, 1]} : vector<8x32xf32> to vector<8x8xf32>
    %308 = arith.truncf %307 : vector<8x8xf32> to vector<8x8xbf16>
    %309 = vector.extract_strided_slice %275 {offsets = [0, 8], sizes = [8, 8], strides = [1, 1]} : vector<8x32xf32> to vector<8x8xf32>
    %310 = arith.truncf %309 : vector<8x8xf32> to vector<8x8xbf16>
    "tpu.trace_start"() <{level = 10 : i32, message = "qd,kd->qk"}> : () -> ()
    %cst_93 = arith.constant dense<0.000000e+00> : vector<8x8xf32>
    %311 = tpu.matmul %306, %308, %cst_93 {dimension_numbers = #tpu.dot_dimension_numbers<[1], [1], [0], [0], [0, 0, 1, 0], [], []>} : vector<8x8xbf16>, vector<8x8xbf16>, vector<8x8xf32> -> vector<8x8xf32>
    "tpu.trace_stop"() : () -> ()
    %312 = arith.addf %311, %41 : vector<8x8xf32>
    %cst_94 = arith.constant dense<0xFF800000> : vector<8xf32>
    %313 = vector.multi_reduction <maximumf>, %312, %cst_94 [1] : vector<8x8xf32> to vector<8xf32>
    %314 = vector.shape_cast %313 : vector<8xf32> to vector<8x1xf32>
    %315 = vector.broadcast %314 : vector<8x1xf32> to vector<8x8xf32>
    %316 = arith.subf %312, %315 : vector<8x8xf32>
    %317 = math.exp %316 : vector<8x8xf32>
    %cst_95 = arith.constant dense<0.000000e+00> : vector<8xf32>
    %318 = vector.multi_reduction <add>, %317, %cst_95 [1] : vector<8x8xf32> to vector<8xf32>
    %319 = vector.shape_cast %318 : vector<8xf32> to vector<8x1xf32>
    %320 = arith.truncf %317 : vector<8x8xf32> to vector<8x8xbf16>
    %cst_96 = arith.constant dense<0.000000e+00> : vector<8x8xf32>
    %321 = tpu.matmul %320, %310, %cst_96 {dimension_numbers = #tpu.dot_dimension_numbers<[1], [0], [0], [1], [0, 0, 1, 1], [], []>} : vector<8x8xbf16>, vector<8x8xbf16>, vector<8x8xf32> -> vector<8x8xf32>
    %322 = tpu.reciprocal %319 {approx = true} : vector<8x1xf32> -> vector<8x1xf32>
    %323 = vector.broadcast %322 : vector<8x1xf32> to vector<8x8xf32>
    %324 = arith.mulf %321, %323 : vector<8x8xf32>
    %325 = arith.truncf %324 : vector<8x8xf32> to vector<8x8xbf16>
    %326 = vector.extract_strided_slice %277 {offsets = [8, 0], sizes = [8, 32], strides = [1, 1]} : vector<32x32xbf16> to vector<8x32xbf16>
    %cst_97 = arith.constant dense<0.000000e+00> : vector<8x32xf32>
    %327 = tpu.matmul %325, %326, %cst_97 {dimension_numbers = #tpu.dot_dimension_numbers<[1], [0], [0], [1], [0, 0, 1, 1], [], []>} : vector<8x8xbf16>, vector<8x32xbf16>, vector<8x32xf32> -> vector<8x32xf32>
    %328 = arith.addf %302, %327 : vector<8x32xf32>
    %329 = vector.extract_strided_slice %273 {offsets = [0, 16], sizes = [8, 8], strides = [1, 1]} : vector<8x32xf32> to vector<8x8xf32>
    %cst_98 = arith.constant 0.353553385 : f32
    %330 = vector.broadcast %cst_98 : f32 to vector<8x8xf32>
    %331 = arith.mulf %329, %330 : vector<8x8xf32>
    %332 = arith.truncf %331 : vector<8x8xf32> to vector<8x8xbf16>
    %333 = vector.extract_strided_slice %274 {offsets = [0, 16], sizes = [8, 8], strides = [1, 1]} : vector<8x32xf32> to vector<8x8xf32>
    %334 = arith.truncf %333 : vector<8x8xf32> to vector<8x8xbf16>
    %335 = vector.extract_strided_slice %275 {offsets = [0, 16], sizes = [8, 8], strides = [1, 1]} : vector<8x32xf32> to vector<8x8xf32>
    %336 = arith.truncf %335 : vector<8x8xf32> to vector<8x8xbf16>
    "tpu.trace_start"() <{level = 10 : i32, message = "qd,kd->qk"}> : () -> ()
    %cst_99 = arith.constant dense<0.000000e+00> : vector<8x8xf32>
    %337 = tpu.matmul %332, %334, %cst_99 {dimension_numbers = #tpu.dot_dimension_numbers<[1], [1], [0], [0], [0, 0, 1, 0], [], []>} : vector<8x8xbf16>, vector<8x8xbf16>, vector<8x8xf32> -> vector<8x8xf32>
    "tpu.trace_stop"() : () -> ()
    %338 = arith.addf %337, %41 : vector<8x8xf32>
    %cst_100 = arith.constant dense<0xFF800000> : vector<8xf32>
    %339 = vector.multi_reduction <maximumf>, %338, %cst_100 [1] : vector<8x8xf32> to vector<8xf32>
    %340 = vector.shape_cast %339 : vector<8xf32> to vector<8x1xf32>
    %341 = vector.broadcast %340 : vector<8x1xf32> to vector<8x8xf32>
    %342 = arith.subf %338, %341 : vector<8x8xf32>
    %343 = math.exp %342 : vector<8x8xf32>
    %cst_101 = arith.constant dense<0.000000e+00> : vector<8xf32>
    %344 = vector.multi_reduction <add>, %343, %cst_101 [1] : vector<8x8xf32> to vector<8xf32>
    %345 = vector.shape_cast %344 : vector<8xf32> to vector<8x1xf32>
    %346 = arith.truncf %343 : vector<8x8xf32> to vector<8x8xbf16>
    %cst_102 = arith.constant dense<0.000000e+00> : vector<8x8xf32>
    %347 = tpu.matmul %346, %336, %cst_102 {dimension_numbers = #tpu.dot_dimension_numbers<[1], [0], [0], [1], [0, 0, 1, 1], [], []>} : vector<8x8xbf16>, vector<8x8xbf16>, vector<8x8xf32> -> vector<8x8xf32>
    %348 = tpu.reciprocal %345 {approx = true} : vector<8x1xf32> -> vector<8x1xf32>
    %349 = vector.broadcast %348 : vector<8x1xf32> to vector<8x8xf32>
    %350 = arith.mulf %347, %349 : vector<8x8xf32>
    %351 = arith.truncf %350 : vector<8x8xf32> to vector<8x8xbf16>
    %352 = vector.extract_strided_slice %277 {offsets = [16, 0], sizes = [8, 32], strides = [1, 1]} : vector<32x32xbf16> to vector<8x32xbf16>
    %cst_103 = arith.constant dense<0.000000e+00> : vector<8x32xf32>
    %353 = tpu.matmul %351, %352, %cst_103 {dimension_numbers = #tpu.dot_dimension_numbers<[1], [0], [0], [1], [0, 0, 1, 1], [], []>} : vector<8x8xbf16>, vector<8x32xbf16>, vector<8x32xf32> -> vector<8x32xf32>
    %354 = arith.addf %328, %353 : vector<8x32xf32>
    %355 = vector.extract_strided_slice %273 {offsets = [0, 24], sizes = [8, 8], strides = [1, 1]} : vector<8x32xf32> to vector<8x8xf32>
    %cst_104 = arith.constant 0.353553385 : f32
    %356 = vector.broadcast %cst_104 : f32 to vector<8x8xf32>
    %357 = arith.mulf %355, %356 : vector<8x8xf32>
    %358 = arith.truncf %357 : vector<8x8xf32> to vector<8x8xbf16>
    %359 = vector.extract_strided_slice %274 {offsets = [0, 24], sizes = [8, 8], strides = [1, 1]} : vector<8x32xf32> to vector<8x8xf32>
    %360 = arith.truncf %359 : vector<8x8xf32> to vector<8x8xbf16>
    %361 = vector.extract_strided_slice %275 {offsets = [0, 24], sizes = [8, 8], strides = [1, 1]} : vector<8x32xf32> to vector<8x8xf32>
    %362 = arith.truncf %361 : vector<8x8xf32> to vector<8x8xbf16>
    "tpu.trace_start"() <{level = 10 : i32, message = "qd,kd->qk"}> : () -> ()
    %cst_105 = arith.constant dense<0.000000e+00> : vector<8x8xf32>
    %363 = tpu.matmul %358, %360, %cst_105 {dimension_numbers = #tpu.dot_dimension_numbers<[1], [1], [0], [0], [0, 0, 1, 0], [], []>} : vector<8x8xbf16>, vector<8x8xbf16>, vector<8x8xf32> -> vector<8x8xf32>
    "tpu.trace_stop"() : () -> ()
    %364 = arith.addf %363, %41 : vector<8x8xf32>
    %cst_106 = arith.constant dense<0xFF800000> : vector<8xf32>
    %365 = vector.multi_reduction <maximumf>, %364, %cst_106 [1] : vector<8x8xf32> to vector<8xf32>
    %366 = vector.shape_cast %365 : vector<8xf32> to vector<8x1xf32>
    %367 = vector.broadcast %366 : vector<8x1xf32> to vector<8x8xf32>
    %368 = arith.subf %364, %367 : vector<8x8xf32>
    %369 = math.exp %368 : vector<8x8xf32>
    %cst_107 = arith.constant dense<0.000000e+00> : vector<8xf32>
    %370 = vector.multi_reduction <add>, %369, %cst_107 [1] : vector<8x8xf32> to vector<8xf32>
    %371 = vector.shape_cast %370 : vector<8xf32> to vector<8x1xf32>
    %372 = arith.truncf %369 : vector<8x8xf32> to vector<8x8xbf16>
    %cst_108 = arith.constant dense<0.000000e+00> : vector<8x8xf32>
    %373 = tpu.matmul %372, %362, %cst_108 {dimension_numbers = #tpu.dot_dimension_numbers<[1], [0], [0], [1], [0, 0, 1, 1], [], []>} : vector<8x8xbf16>, vector<8x8xbf16>, vector<8x8xf32> -> vector<8x8xf32>
    %374 = tpu.reciprocal %371 {approx = true} : vector<8x1xf32> -> vector<8x1xf32>
    %375 = vector.broadcast %374 : vector<8x1xf32> to vector<8x8xf32>
    %376 = arith.mulf %373, %375 : vector<8x8xf32>
    %377 = arith.truncf %376 : vector<8x8xf32> to vector<8x8xbf16>
    %378 = vector.extract_strided_slice %277 {offsets = [24, 0], sizes = [8, 32], strides = [1, 1]} : vector<32x32xbf16> to vector<8x32xbf16>
    %cst_109 = arith.constant dense<0.000000e+00> : vector<8x32xf32>
    %379 = tpu.matmul %377, %378, %cst_109 {dimension_numbers = #tpu.dot_dimension_numbers<[1], [0], [0], [1], [0, 0, 1, 1], [], []>} : vector<8x8xbf16>, vector<8x32xbf16>, vector<8x32xf32> -> vector<8x32xf32>
    %380 = arith.addf %354, %379 : vector<8x32xf32>
    %381 = arith.addf %243, %380 : vector<8x32xf32>
    %382 = vector.extract_strided_slice %242 {offsets = [7, 0], sizes = [1, 32], strides = [1, 1]} : vector<16x128xf32> to vector<1x32xf32>
    %383 = vector.broadcast %382 : vector<1x32xf32> to vector<8x32xf32>
    %384 = arith.addf %381, %383 : vector<8x32xf32>
    %385 = vector.extract_strided_slice %242 {offsets = [2, 0], sizes = [1, 32], strides = [1, 1]} : vector<16x128xf32> to vector<1x32xf32>
    %386 = vector.extract_strided_slice %242 {offsets = [3, 0], sizes = [1, 32], strides = [1, 1]} : vector<16x128xf32> to vector<1x32xf32>
    %cst_110 = arith.constant dense<0.000000e+00> : vector<8xf32>
    %387 = vector.multi_reduction <add>, %384, %cst_110 [1] : vector<8x32xf32> to vector<8xf32>
    %388 = vector.shape_cast %387 : vector<8xf32> to vector<8x1xf32>
    %cst_111 = arith.constant 3.200000e+01 : f32
    %389 = vector.broadcast %cst_111 : f32 to vector<8x1xf32>
    %390 = arith.divf %388, %389 : vector<8x1xf32>
    %391 = vector.broadcast %390 : vector<8x1xf32> to vector<8x32xf32>
    %392 = arith.subf %384, %391 : vector<8x32xf32>
    %393 = arith.mulf %392, %392 : vector<8x32xf32>
    %cst_112 = arith.constant dense<0.000000e+00> : vector<8xf32>
    %394 = vector.multi_reduction <add>, %393, %cst_112 [1] : vector<8x32xf32> to vector<8xf32>
    %395 = vector.shape_cast %394 : vector<8xf32> to vector<8x1xf32>
    %cst_113 = arith.constant 3.200000e+01 : f32
    %396 = vector.broadcast %cst_113 : f32 to vector<8x1xf32>
    %397 = arith.divf %395, %396 : vector<8x1xf32>
    %cst_114 = arith.constant 9.99999974E-6 : f32
    %398 = vector.broadcast %cst_114 : f32 to vector<8x1xf32>
    %399 = arith.addf %397, %398 : vector<8x1xf32>
    %400 = math.rsqrt %399 : vector<8x1xf32>
    %401 = vector.broadcast %400 : vector<8x1xf32> to vector<8x32xf32>
    %402 = arith.mulf %392, %401 : vector<8x32xf32>
    %403 = vector.broadcast %385 : vector<1x32xf32> to vector<8x32xf32>
    %404 = arith.mulf %402, %403 : vector<8x32xf32>
    %405 = vector.broadcast %386 : vector<1x32xf32> to vector<8x32xf32>
    %406 = arith.addf %404, %405 : vector<8x32xf32>
    %c0_115 = arith.constant 0 : index
    %c0_116 = arith.constant 0 : index
    %c0_117 = arith.constant 0 : index
    %407 = vector.load %arg14[%c0_115, %c0_116, %c0_117] : memref<1x32x32xbf16, #tpu.memory_space<vmem>>, vector<1x32x32xbf16>
    %408 = vector.shape_cast %407 : vector<1x32x32xbf16> to vector<32x32xbf16>
    %409 = arith.truncf %406 : vector<8x32xf32> to vector<8x32xbf16>
    %cst_118 = arith.constant dense<0.000000e+00> : vector<8x32xf32>
    %410 = tpu.matmul %409, %408, %cst_118 {dimension_numbers = #tpu.dot_dimension_numbers<[1], [0], [0], [1], [0, 0, 1, 1], [], []>} : vector<8x32xbf16>, vector<32x32xbf16>, vector<8x32xf32> -> vector<8x32xf32>
    %411 = vector.extract_strided_slice %242 {offsets = [8, 0], sizes = [1, 32], strides = [1, 1]} : vector<16x128xf32> to vector<1x32xf32>
    %412 = vector.broadcast %411 : vector<1x32xf32> to vector<8x32xf32>
    %413 = arith.addf %410, %412 : vector<8x32xf32>
    %c0_119 = arith.constant 0 : index
    %c0_120 = arith.constant 0 : index
    %c0_121 = arith.constant 0 : index
    %414 = vector.load %arg15[%c0_119, %c0_120, %c0_121] : memref<1x32x64xbf16, #tpu.memory_space<vmem>>, vector<1x32x64xbf16>
    %415 = vector.shape_cast %414 : vector<1x32x64xbf16> to vector<32x64xbf16>
    %416 = arith.truncf %239 : vector<8x32xf32> to vector<8x32xbf16>
    %cst_122 = arith.constant dense<0.000000e+00> : vector<8x64xf32>
    %417 = tpu.matmul %416, %415, %cst_122 {dimension_numbers = #tpu.dot_dimension_numbers<[1], [0], [0], [1], [0, 0, 1, 1], [], []>} : vector<8x32xbf16>, vector<32x64xbf16>, vector<8x64xf32> -> vector<8x64xf32>
    %418 = vector.extract_strided_slice %242 {offsets = [9, 0], sizes = [1, 64], strides = [1, 1]} : vector<16x128xf32> to vector<1x64xf32>
    %419 = vector.broadcast %418 : vector<1x64xf32> to vector<8x64xf32>
    %420 = arith.addf %417, %419 : vector<8x64xf32>
    %421 = vector.extract_strided_slice %420 {offsets = [0, 0], sizes = [8, 32], strides = [1, 1]} : vector<8x64xf32> to vector<8x32xf32>
    %422 = vector.extract_strided_slice %420 {offsets = [0, 32], sizes = [8, 32], strides = [1, 1]} : vector<8x64xf32> to vector<8x32xf32>
    %c0_123 = arith.constant 0 : index
    %c0_124 = arith.constant 0 : index
    %c0_125 = arith.constant 0 : index
    %423 = vector.load %arg16[%c0_123, %c0_124, %c0_125] : memref<1x32x32xbf16, #tpu.memory_space<vmem>>, vector<1x32x32xbf16>
    %424 = vector.shape_cast %423 : vector<1x32x32xbf16> to vector<32x32xbf16>
    %425 = vector.extract_strided_slice %413 {offsets = [0, 0], sizes = [8, 8], strides = [1, 1]} : vector<8x32xf32> to vector<8x8xf32>
    %cst_126 = arith.constant 0.353553385 : f32
    %426 = vector.broadcast %cst_126 : f32 to vector<8x8xf32>
    %427 = arith.mulf %425, %426 : vector<8x8xf32>
    %428 = arith.truncf %427 : vector<8x8xf32> to vector<8x8xbf16>
    %429 = vector.extract_strided_slice %421 {offsets = [0, 0], sizes = [8, 8], strides = [1, 1]} : vector<8x32xf32> to vector<8x8xf32>
    %430 = arith.truncf %429 : vector<8x8xf32> to vector<8x8xbf16>
    %431 = vector.extract_strided_slice %422 {offsets = [0, 0], sizes = [8, 8], strides = [1, 1]} : vector<8x32xf32> to vector<8x8xf32>
    %432 = arith.truncf %431 : vector<8x8xf32> to vector<8x8xbf16>
    "tpu.trace_start"() <{level = 10 : i32, message = "qd,kd->qk"}> : () -> ()
    %cst_127 = arith.constant dense<0.000000e+00> : vector<8x8xf32>
    %433 = tpu.matmul %428, %430, %cst_127 {dimension_numbers = #tpu.dot_dimension_numbers<[1], [1], [0], [0], [0, 0, 1, 0], [], []>} : vector<8x8xbf16>, vector<8x8xbf16>, vector<8x8xf32> -> vector<8x8xf32>
    "tpu.trace_stop"() : () -> ()
    %434 = vector.broadcast %22 : vector<1x8xf32> to vector<8x8xf32>
    %435 = arith.addf %433, %434 : vector<8x8xf32>
    %cst_128 = arith.constant dense<0xFF800000> : vector<8xf32>
    %436 = vector.multi_reduction <maximumf>, %435, %cst_128 [1] : vector<8x8xf32> to vector<8xf32>
    %437 = vector.shape_cast %436 : vector<8xf32> to vector<8x1xf32>
    %438 = vector.broadcast %437 : vector<8x1xf32> to vector<8x8xf32>
    %439 = arith.subf %435, %438 : vector<8x8xf32>
    %440 = math.exp %439 : vector<8x8xf32>
    %cst_129 = arith.constant dense<0.000000e+00> : vector<8xf32>
    %441 = vector.multi_reduction <add>, %440, %cst_129 [1] : vector<8x8xf32> to vector<8xf32>
    %442 = vector.shape_cast %441 : vector<8xf32> to vector<8x1xf32>
    %443 = arith.truncf %440 : vector<8x8xf32> to vector<8x8xbf16>
    %cst_130 = arith.constant dense<0.000000e+00> : vector<8x8xf32>
    %444 = tpu.matmul %443, %432, %cst_130 {dimension_numbers = #tpu.dot_dimension_numbers<[1], [0], [0], [1], [0, 0, 1, 1], [], []>} : vector<8x8xbf16>, vector<8x8xbf16>, vector<8x8xf32> -> vector<8x8xf32>
    %445 = tpu.reciprocal %442 {approx = true} : vector<8x1xf32> -> vector<8x1xf32>
    %446 = vector.broadcast %445 : vector<8x1xf32> to vector<8x8xf32>
    %447 = arith.mulf %444, %446 : vector<8x8xf32>
    %448 = arith.truncf %447 : vector<8x8xf32> to vector<8x8xbf16>
    %449 = vector.extract_strided_slice %424 {offsets = [0, 0], sizes = [8, 32], strides = [1, 1]} : vector<32x32xbf16> to vector<8x32xbf16>
    %cst_131 = arith.constant dense<0.000000e+00> : vector<8x32xf32>
    %450 = tpu.matmul %448, %449, %cst_131 {dimension_numbers = #tpu.dot_dimension_numbers<[1], [0], [0], [1], [0, 0, 1, 1], [], []>} : vector<8x8xbf16>, vector<8x32xbf16>, vector<8x32xf32> -> vector<8x32xf32>
    %451 = vector.extract_strided_slice %413 {offsets = [0, 8], sizes = [8, 8], strides = [1, 1]} : vector<8x32xf32> to vector<8x8xf32>
    %cst_132 = arith.constant 0.353553385 : f32
    %452 = vector.broadcast %cst_132 : f32 to vector<8x8xf32>
    %453 = arith.mulf %451, %452 : vector<8x8xf32>
    %454 = arith.truncf %453 : vector<8x8xf32> to vector<8x8xbf16>
    %455 = vector.extract_strided_slice %421 {offsets = [0, 8], sizes = [8, 8], strides = [1, 1]} : vector<8x32xf32> to vector<8x8xf32>
    %456 = arith.truncf %455 : vector<8x8xf32> to vector<8x8xbf16>
    %457 = vector.extract_strided_slice %422 {offsets = [0, 8], sizes = [8, 8], strides = [1, 1]} : vector<8x32xf32> to vector<8x8xf32>
    %458 = arith.truncf %457 : vector<8x8xf32> to vector<8x8xbf16>
    "tpu.trace_start"() <{level = 10 : i32, message = "qd,kd->qk"}> : () -> ()
    %cst_133 = arith.constant dense<0.000000e+00> : vector<8x8xf32>
    %459 = tpu.matmul %454, %456, %cst_133 {dimension_numbers = #tpu.dot_dimension_numbers<[1], [1], [0], [0], [0, 0, 1, 0], [], []>} : vector<8x8xbf16>, vector<8x8xbf16>, vector<8x8xf32> -> vector<8x8xf32>
    "tpu.trace_stop"() : () -> ()
    %460 = vector.broadcast %22 : vector<1x8xf32> to vector<8x8xf32>
    %461 = arith.addf %459, %460 : vector<8x8xf32>
    %cst_134 = arith.constant dense<0xFF800000> : vector<8xf32>
    %462 = vector.multi_reduction <maximumf>, %461, %cst_134 [1] : vector<8x8xf32> to vector<8xf32>
    %463 = vector.shape_cast %462 : vector<8xf32> to vector<8x1xf32>
    %464 = vector.broadcast %463 : vector<8x1xf32> to vector<8x8xf32>
    %465 = arith.subf %461, %464 : vector<8x8xf32>
    %466 = math.exp %465 : vector<8x8xf32>
    %cst_135 = arith.constant dense<0.000000e+00> : vector<8xf32>
    %467 = vector.multi_reduction <add>, %466, %cst_135 [1] : vector<8x8xf32> to vector<8xf32>
    %468 = vector.shape_cast %467 : vector<8xf32> to vector<8x1xf32>
    %469 = arith.truncf %466 : vector<8x8xf32> to vector<8x8xbf16>
    %cst_136 = arith.constant dense<0.000000e+00> : vector<8x8xf32>
    %470 = tpu.matmul %469, %458, %cst_136 {dimension_numbers = #tpu.dot_dimension_numbers<[1], [0], [0], [1], [0, 0, 1, 1], [], []>} : vector<8x8xbf16>, vector<8x8xbf16>, vector<8x8xf32> -> vector<8x8xf32>
    %471 = tpu.reciprocal %468 {approx = true} : vector<8x1xf32> -> vector<8x1xf32>
    %472 = vector.broadcast %471 : vector<8x1xf32> to vector<8x8xf32>
    %473 = arith.mulf %470, %472 : vector<8x8xf32>
    %474 = arith.truncf %473 : vector<8x8xf32> to vector<8x8xbf16>
    %475 = vector.extract_strided_slice %424 {offsets = [8, 0], sizes = [8, 32], strides = [1, 1]} : vector<32x32xbf16> to vector<8x32xbf16>
    %cst_137 = arith.constant dense<0.000000e+00> : vector<8x32xf32>
    %476 = tpu.matmul %474, %475, %cst_137 {dimension_numbers = #tpu.dot_dimension_numbers<[1], [0], [0], [1], [0, 0, 1, 1], [], []>} : vector<8x8xbf16>, vector<8x32xbf16>, vector<8x32xf32> -> vector<8x32xf32>
    %477 = arith.addf %450, %476 : vector<8x32xf32>
    %478 = vector.extract_strided_slice %413 {offsets = [0, 16], sizes = [8, 8], strides = [1, 1]} : vector<8x32xf32> to vector<8x8xf32>
    %cst_138 = arith.constant 0.353553385 : f32
    %479 = vector.broadcast %cst_138 : f32 to vector<8x8xf32>
    %480 = arith.mulf %478, %479 : vector<8x8xf32>
    %481 = arith.truncf %480 : vector<8x8xf32> to vector<8x8xbf16>
    %482 = vector.extract_strided_slice %421 {offsets = [0, 16], sizes = [8, 8], strides = [1, 1]} : vector<8x32xf32> to vector<8x8xf32>
    %483 = arith.truncf %482 : vector<8x8xf32> to vector<8x8xbf16>
    %484 = vector.extract_strided_slice %422 {offsets = [0, 16], sizes = [8, 8], strides = [1, 1]} : vector<8x32xf32> to vector<8x8xf32>
    %485 = arith.truncf %484 : vector<8x8xf32> to vector<8x8xbf16>
    "tpu.trace_start"() <{level = 10 : i32, message = "qd,kd->qk"}> : () -> ()
    %cst_139 = arith.constant dense<0.000000e+00> : vector<8x8xf32>
    %486 = tpu.matmul %481, %483, %cst_139 {dimension_numbers = #tpu.dot_dimension_numbers<[1], [1], [0], [0], [0, 0, 1, 0], [], []>} : vector<8x8xbf16>, vector<8x8xbf16>, vector<8x8xf32> -> vector<8x8xf32>
    "tpu.trace_stop"() : () -> ()
    %487 = vector.broadcast %22 : vector<1x8xf32> to vector<8x8xf32>
    %488 = arith.addf %486, %487 : vector<8x8xf32>
    %cst_140 = arith.constant dense<0xFF800000> : vector<8xf32>
    %489 = vector.multi_reduction <maximumf>, %488, %cst_140 [1] : vector<8x8xf32> to vector<8xf32>
    %490 = vector.shape_cast %489 : vector<8xf32> to vector<8x1xf32>
    %491 = vector.broadcast %490 : vector<8x1xf32> to vector<8x8xf32>
    %492 = arith.subf %488, %491 : vector<8x8xf32>
    %493 = math.exp %492 : vector<8x8xf32>
    %cst_141 = arith.constant dense<0.000000e+00> : vector<8xf32>
    %494 = vector.multi_reduction <add>, %493, %cst_141 [1] : vector<8x8xf32> to vector<8xf32>
    %495 = vector.shape_cast %494 : vector<8xf32> to vector<8x1xf32>
    %496 = arith.truncf %493 : vector<8x8xf32> to vector<8x8xbf16>
    %cst_142 = arith.constant dense<0.000000e+00> : vector<8x8xf32>
    %497 = tpu.matmul %496, %485, %cst_142 {dimension_numbers = #tpu.dot_dimension_numbers<[1], [0], [0], [1], [0, 0, 1, 1], [], []>} : vector<8x8xbf16>, vector<8x8xbf16>, vector<8x8xf32> -> vector<8x8xf32>
    %498 = tpu.reciprocal %495 {approx = true} : vector<8x1xf32> -> vector<8x1xf32>
    %499 = vector.broadcast %498 : vector<8x1xf32> to vector<8x8xf32>
    %500 = arith.mulf %497, %499 : vector<8x8xf32>
    %501 = arith.truncf %500 : vector<8x8xf32> to vector<8x8xbf16>
    %502 = vector.extract_strided_slice %424 {offsets = [16, 0], sizes = [8, 32], strides = [1, 1]} : vector<32x32xbf16> to vector<8x32xbf16>
    %cst_143 = arith.constant dense<0.000000e+00> : vector<8x32xf32>
    %503 = tpu.matmul %501, %502, %cst_143 {dimension_numbers = #tpu.dot_dimension_numbers<[1], [0], [0], [1], [0, 0, 1, 1], [], []>} : vector<8x8xbf16>, vector<8x32xbf16>, vector<8x32xf32> -> vector<8x32xf32>
    %504 = arith.addf %477, %503 : vector<8x32xf32>
    %505 = vector.extract_strided_slice %413 {offsets = [0, 24], sizes = [8, 8], strides = [1, 1]} : vector<8x32xf32> to vector<8x8xf32>
    %cst_144 = arith.constant 0.353553385 : f32
    %506 = vector.broadcast %cst_144 : f32 to vector<8x8xf32>
    %507 = arith.mulf %505, %506 : vector<8x8xf32>
    %508 = arith.truncf %507 : vector<8x8xf32> to vector<8x8xbf16>
    %509 = vector.extract_strided_slice %421 {offsets = [0, 24], sizes = [8, 8], strides = [1, 1]} : vector<8x32xf32> to vector<8x8xf32>
    %510 = arith.truncf %509 : vector<8x8xf32> to vector<8x8xbf16>
    %511 = vector.extract_strided_slice %422 {offsets = [0, 24], sizes = [8, 8], strides = [1, 1]} : vector<8x32xf32> to vector<8x8xf32>
    %512 = arith.truncf %511 : vector<8x8xf32> to vector<8x8xbf16>
    "tpu.trace_start"() <{level = 10 : i32, message = "qd,kd->qk"}> : () -> ()
    %cst_145 = arith.constant dense<0.000000e+00> : vector<8x8xf32>
    %513 = tpu.matmul %508, %510, %cst_145 {dimension_numbers = #tpu.dot_dimension_numbers<[1], [1], [0], [0], [0, 0, 1, 0], [], []>} : vector<8x8xbf16>, vector<8x8xbf16>, vector<8x8xf32> -> vector<8x8xf32>
    "tpu.trace_stop"() : () -> ()
    %514 = vector.broadcast %22 : vector<1x8xf32> to vector<8x8xf32>
    %515 = arith.addf %513, %514 : vector<8x8xf32>
    %cst_146 = arith.constant dense<0xFF800000> : vector<8xf32>
    %516 = vector.multi_reduction <maximumf>, %515, %cst_146 [1] : vector<8x8xf32> to vector<8xf32>
    %517 = vector.shape_cast %516 : vector<8xf32> to vector<8x1xf32>
    %518 = vector.broadcast %517 : vector<8x1xf32> to vector<8x8xf32>
    %519 = arith.subf %515, %518 : vector<8x8xf32>
    %520 = math.exp %519 : vector<8x8xf32>
    %cst_147 = arith.constant dense<0.000000e+00> : vector<8xf32>
    %521 = vector.multi_reduction <add>, %520, %cst_147 [1] : vector<8x8xf32> to vector<8xf32>
    %522 = vector.shape_cast %521 : vector<8xf32> to vector<8x1xf32>
    %523 = arith.truncf %520 : vector<8x8xf32> to vector<8x8xbf16>
    %cst_148 = arith.constant dense<0.000000e+00> : vector<8x8xf32>
    %524 = tpu.matmul %523, %512, %cst_148 {dimension_numbers = #tpu.dot_dimension_numbers<[1], [0], [0], [1], [0, 0, 1, 1], [], []>} : vector<8x8xbf16>, vector<8x8xbf16>, vector<8x8xf32> -> vector<8x8xf32>
    %525 = tpu.reciprocal %522 {approx = true} : vector<8x1xf32> -> vector<8x1xf32>
    %526 = vector.broadcast %525 : vector<8x1xf32> to vector<8x8xf32>
    %527 = arith.mulf %524, %526 : vector<8x8xf32>
    %528 = arith.truncf %527 : vector<8x8xf32> to vector<8x8xbf16>
    %529 = vector.extract_strided_slice %424 {offsets = [24, 0], sizes = [8, 32], strides = [1, 1]} : vector<32x32xbf16> to vector<8x32xbf16>
    %cst_149 = arith.constant dense<0.000000e+00> : vector<8x32xf32>
    %530 = tpu.matmul %528, %529, %cst_149 {dimension_numbers = #tpu.dot_dimension_numbers<[1], [0], [0], [1], [0, 0, 1, 1], [], []>} : vector<8x8xbf16>, vector<8x32xbf16>, vector<8x32xf32> -> vector<8x32xf32>
    %531 = arith.addf %504, %530 : vector<8x32xf32>
    %532 = arith.addf %384, %531 : vector<8x32xf32>
    %533 = vector.extract_strided_slice %242 {offsets = [10, 0], sizes = [1, 32], strides = [1, 1]} : vector<16x128xf32> to vector<1x32xf32>
    %534 = vector.broadcast %533 : vector<1x32xf32> to vector<8x32xf32>
    %535 = arith.addf %532, %534 : vector<8x32xf32>
    %536 = vector.extract_strided_slice %242 {offsets = [4, 0], sizes = [1, 32], strides = [1, 1]} : vector<16x128xf32> to vector<1x32xf32>
    %537 = vector.extract_strided_slice %242 {offsets = [5, 0], sizes = [1, 32], strides = [1, 1]} : vector<16x128xf32> to vector<1x32xf32>
    %cst_150 = arith.constant dense<0.000000e+00> : vector<8xf32>
    %538 = vector.multi_reduction <add>, %535, %cst_150 [1] : vector<8x32xf32> to vector<8xf32>
    %539 = vector.shape_cast %538 : vector<8xf32> to vector<8x1xf32>
    %cst_151 = arith.constant 3.200000e+01 : f32
    %540 = vector.broadcast %cst_151 : f32 to vector<8x1xf32>
    %541 = arith.divf %539, %540 : vector<8x1xf32>
    %542 = vector.broadcast %541 : vector<8x1xf32> to vector<8x32xf32>
    %543 = arith.subf %535, %542 : vector<8x32xf32>
    %544 = arith.mulf %543, %543 : vector<8x32xf32>
    %cst_152 = arith.constant dense<0.000000e+00> : vector<8xf32>
    %545 = vector.multi_reduction <add>, %544, %cst_152 [1] : vector<8x32xf32> to vector<8xf32>
    %546 = vector.shape_cast %545 : vector<8xf32> to vector<8x1xf32>
    %cst_153 = arith.constant 3.200000e+01 : f32
    %547 = vector.broadcast %cst_153 : f32 to vector<8x1xf32>
    %548 = arith.divf %546, %547 : vector<8x1xf32>
    %cst_154 = arith.constant 9.99999974E-6 : f32
    %549 = vector.broadcast %cst_154 : f32 to vector<8x1xf32>
    %550 = arith.addf %548, %549 : vector<8x1xf32>
    %551 = math.rsqrt %550 : vector<8x1xf32>
    %552 = vector.broadcast %551 : vector<8x1xf32> to vector<8x32xf32>
    %553 = arith.mulf %543, %552 : vector<8x32xf32>
    %554 = vector.broadcast %536 : vector<1x32xf32> to vector<8x32xf32>
    %555 = arith.mulf %553, %554 : vector<8x32xf32>
    %556 = vector.broadcast %537 : vector<1x32xf32> to vector<8x32xf32>
    %557 = arith.addf %555, %556 : vector<8x32xf32>
    %c0_155 = arith.constant 0 : index
    %c0_156 = arith.constant 0 : index
    %c0_157 = arith.constant 0 : index
    %558 = vector.load %arg17[%c0_155, %c0_156, %c0_157] : memref<1x32x128xbf16, #tpu.memory_space<vmem>>, vector<1x32x128xbf16>
    %559 = vector.shape_cast %558 : vector<1x32x128xbf16> to vector<32x128xbf16>
    %560 = arith.truncf %557 : vector<8x32xf32> to vector<8x32xbf16>
    %cst_158 = arith.constant dense<0.000000e+00> : vector<8x128xf32>
    %561 = tpu.matmul %560, %559, %cst_158 {dimension_numbers = #tpu.dot_dimension_numbers<[1], [0], [0], [1], [0, 0, 1, 1], [], []>} : vector<8x32xbf16>, vector<32x128xbf16>, vector<8x128xf32> -> vector<8x128xf32>
    %562 = vector.extract_strided_slice %242 {offsets = [11, 0], sizes = [1, 128], strides = [1, 1]} : vector<16x128xf32> to vector<1x128xf32>
    %563 = vector.broadcast %562 : vector<1x128xf32> to vector<8x128xf32>
    %564 = arith.addf %561, %563 : vector<8x128xf32>
    %565 = arith.mulf %564, %564 : vector<8x128xf32>
    %566 = arith.mulf %564, %565 : vector<8x128xf32>
    %cst_159 = arith.constant 4.471500e-02 : f32
    %567 = vector.broadcast %cst_159 : f32 to vector<8x128xf32>
    %568 = arith.mulf %567, %566 : vector<8x128xf32>
    %569 = arith.addf %564, %568 : vector<8x128xf32>
    %cst_160 = arith.constant 0.797884583 : f32
    %570 = vector.broadcast %cst_160 : f32 to vector<8x128xf32>
    %571 = arith.mulf %570, %569 : vector<8x128xf32>
    %572 = math.tanh %571 : vector<8x128xf32>
    %cst_161 = arith.constant 1.000000e+00 : f32
    %573 = vector.broadcast %cst_161 : f32 to vector<8x128xf32>
    %574 = arith.addf %573, %572 : vector<8x128xf32>
    %cst_162 = arith.constant 5.000000e-01 : f32
    %575 = vector.broadcast %cst_162 : f32 to vector<8x128xf32>
    %576 = arith.mulf %575, %574 : vector<8x128xf32>
    %577 = arith.mulf %564, %576 : vector<8x128xf32>
    %c0_163 = arith.constant 0 : index
    %c0_164 = arith.constant 0 : index
    %c0_165 = arith.constant 0 : index
    %578 = vector.load %arg18[%c0_163, %c0_164, %c0_165] : memref<1x128x32xbf16, #tpu.memory_space<vmem>>, vector<1x128x32xbf16>
    %579 = vector.shape_cast %578 : vector<1x128x32xbf16> to vector<128x32xbf16>
    %580 = arith.truncf %577 : vector<8x128xf32> to vector<8x128xbf16>
    %cst_166 = arith.constant dense<0.000000e+00> : vector<8x32xf32>
    %581 = tpu.matmul %580, %579, %cst_166 {dimension_numbers = #tpu.dot_dimension_numbers<[1], [0], [0], [1], [0, 0, 1, 1], [], []>} : vector<8x128xbf16>, vector<128x32xbf16>, vector<8x32xf32> -> vector<8x32xf32>
    %582 = arith.addf %535, %581 : vector<8x32xf32>
    %583 = vector.extract_strided_slice %242 {offsets = [12, 0], sizes = [1, 32], strides = [1, 1]} : vector<16x128xf32> to vector<1x32xf32>
    %584 = vector.broadcast %583 : vector<1x32xf32> to vector<8x32xf32>
    %585 = arith.addf %582, %584 : vector<8x32xf32>
    %c0_167 = arith.constant 0 : index
    %c0_168 = arith.constant 0 : index
    %586 = vector.load %arg27[%c0_167, %c0_168] : memref<8x32xf32, #tpu.memory_space<vmem>>, vector<8x32xf32>
    tpu.vector_store %arg27[%c0_167, %c0_168], %585 {strides = array<i32>} : memref<8x32xf32, #tpu.memory_space<vmem>>, vector<8x32xf32>,
    %c1_i32 = arith.constant 1 : i32
    %587 = arith.cmpi eq, %arg1, %c1_i32 : i32
    %588 = arith.extui %587 : i1 to i32
    %c0_i32_169 = arith.constant 0 : i32
    %589 = arith.cmpi ne, %588, %c0_i32_169 : i32
    scf.if %589 {
      %c0_170 = arith.constant 0 : index
      %c0_171 = arith.constant 0 : index
      %590 = vector.load %arg22[%c0_170, %c0_171] : memref<8x128xf32, #tpu.memory_space<vmem>>, vector<8x128xf32>
      %c0_172 = arith.constant 0 : index
      %c0_173 = arith.constant 0 : index
      %591 = vector.load %arg26[%c0_172, %c0_173] : memref<8x32xf32, #tpu.memory_space<vmem>>, vector<8x32xf32>
      %c0_174 = arith.constant 0 : index
      %c0_175 = arith.constant 0 : index
      %592 = vector.load %arg20[%c0_174, %c0_175] : memref<32x32xbf16, #tpu.memory_space<vmem>>, vector<32x32xbf16>
      %593 = arith.truncf %591 : vector<8x32xf32> to vector<8x32xbf16>
      %cst_176 = arith.constant dense<0.000000e+00> : vector<8x32xf32>
      %594 = tpu.matmul %593, %592, %cst_176 {dimension_numbers = #tpu.dot_dimension_numbers<[1], [0], [0], [1], [0, 0, 1, 1], [], []>} : vector<8x32xbf16>, vector<32x32xbf16>, vector<8x32xf32> -> vector<8x32xf32>
      %595 = vector.extract_strided_slice %590 {offsets = [0, 0], sizes = [1, 32], strides = [1, 1]} : vector<8x128xf32> to vector<1x32xf32>
      %596 = vector.broadcast %595 : vector<1x32xf32> to vector<8x32xf32>
      %597 = arith.addf %594, %596 : vector<8x32xf32>
      %598 = arith.mulf %597, %597 : vector<8x32xf32>
      %599 = arith.mulf %597, %598 : vector<8x32xf32>
      %cst_177 = arith.constant 4.471500e-02 : f32
      %600 = vector.broadcast %cst_177 : f32 to vector<8x32xf32>
      %601 = arith.mulf %600, %599 : vector<8x32xf32>
      %602 = arith.addf %597, %601 : vector<8x32xf32>
      %cst_178 = arith.constant 0.797884583 : f32
      %603 = vector.broadcast %cst_178 : f32 to vector<8x32xf32>
      %604 = arith.mulf %603, %602 : vector<8x32xf32>
      %605 = math.tanh %604 : vector<8x32xf32>
      %cst_179 = arith.constant 1.000000e+00 : f32
      %606 = vector.broadcast %cst_179 : f32 to vector<8x32xf32>
      %607 = arith.addf %606, %605 : vector<8x32xf32>
      %cst_180 = arith.constant 5.000000e-01 : f32
      %608 = vector.broadcast %cst_180 : f32 to vector<8x32xf32>
      %609 = arith.mulf %608, %607 : vector<8x32xf32>
      %610 = arith.mulf %597, %609 : vector<8x32xf32>
      %611 = vector.extract_strided_slice %590 {offsets = [1, 0], sizes = [1, 32], strides = [1, 1]} : vector<8x128xf32> to vector<1x32xf32>
      %612 = vector.extract_strided_slice %590 {offsets = [2, 0], sizes = [1, 32], strides = [1, 1]} : vector<8x128xf32> to vector<1x32xf32>
      %cst_181 = arith.constant dense<0.000000e+00> : vector<8xf32>
      %613 = vector.multi_reduction <add>, %610, %cst_181 [1] : vector<8x32xf32> to vector<8xf32>
      %614 = vector.shape_cast %613 : vector<8xf32> to vector<8x1xf32>
      %cst_182 = arith.constant 3.200000e+01 : f32
      %615 = vector.broadcast %cst_182 : f32 to vector<8x1xf32>
      %616 = arith.divf %614, %615 : vector<8x1xf32>
      %617 = vector.broadcast %616 : vector<8x1xf32> to vector<8x32xf32>
      %618 = arith.subf %610, %617 : vector<8x32xf32>
      %619 = arith.mulf %618, %618 : vector<8x32xf32>
      %cst_183 = arith.constant dense<0.000000e+00> : vector<8xf32>
      %620 = vector.multi_reduction <add>, %619, %cst_183 [1] : vector<8x32xf32> to vector<8xf32>
      %621 = vector.shape_cast %620 : vector<8xf32> to vector<8x1xf32>
      %cst_184 = arith.constant 3.200000e+01 : f32
      %622 = vector.broadcast %cst_184 : f32 to vector<8x1xf32>
      %623 = arith.divf %621, %622 : vector<8x1xf32>
      %cst_185 = arith.constant 9.99999974E-6 : f32
      %624 = vector.broadcast %cst_185 : f32 to vector<8x1xf32>
      %625 = arith.addf %623, %624 : vector<8x1xf32>
      %626 = math.rsqrt %625 : vector<8x1xf32>
      %627 = vector.broadcast %626 : vector<8x1xf32> to vector<8x32xf32>
      %628 = arith.mulf %618, %627 : vector<8x32xf32>
      %629 = vector.broadcast %611 : vector<1x32xf32> to vector<8x32xf32>
      %630 = arith.mulf %628, %629 : vector<8x32xf32>
      %631 = vector.broadcast %612 : vector<1x32xf32> to vector<8x32xf32>
      %632 = arith.addf %630, %631 : vector<8x32xf32>
      %c0_186 = arith.constant 0 : index
      %c0_187 = arith.constant 0 : index
      %633 = vector.load %arg21[%c0_186, %c0_187] : memref<32x128xbf16, #tpu.memory_space<vmem>>, vector<32x128xbf16>
      %634 = arith.truncf %632 : vector<8x32xf32> to vector<8x32xbf16>
      %cst_188 = arith.constant dense<0.000000e+00> : vector<8x128xf32>
      %635 = tpu.matmul %634, %633, %cst_188 {dimension_numbers = #tpu.dot_dimension_numbers<[1], [0], [0], [1], [0, 0, 1, 1], [], []>} : vector<8x32xbf16>, vector<32x128xbf16>, vector<8x128xf32> -> vector<8x128xf32>
      %c0_189 = arith.constant 0 : index
      %c0_190 = arith.constant 0 : index
      %636 = vector.load %arg23[%c0_189, %c0_190] : memref<1x128xf32, #tpu.memory_space<vmem>>, vector<1x128xf32>
      %637 = vector.broadcast %636 : vector<1x128xf32> to vector<8x128xf32>
      %638 = arith.addf %635, %637 : vector<8x128xf32>
      %c0_191 = arith.constant 0 : index
      %c0_192 = arith.constant 0 : index
      %c0_193 = arith.constant 0 : index
      %639 = vector.load %arg24[%c0_191, %c0_192, %c0_193] : memref<1x8x128xf32, #tpu.memory_space<vmem>>, vector<1x8x128xf32>
      %640 = vector.shape_cast %639 : vector<1x8x128xf32> to vector<8x128xf32>
      %641 = vector.shape_cast %638 : vector<8x128xf32> to vector<1x8x128xf32>
      tpu.vector_store %arg24[%c0_191, %c0_192, %c0_193], %641 {strides = array<i32>} : memref<1x8x128xf32, #tpu.memory_space<vmem>>, vector<1x8x128xf32>,
      %c0_194 = arith.constant 0 : index
      %c0_195 = arith.constant 0 : index
      %642 = vector.load %arg27[%c0_194, %c0_195] : memref<8x32xf32, #tpu.memory_space<vmem>>, vector<8x32xf32>
      %c0_196 = arith.constant 0 : index
      %c0_197 = arith.constant 0 : index
      %643 = vector.load %arg20[%c0_196, %c0_197] : memref<32x32xbf16, #tpu.memory_space<vmem>>, vector<32x32xbf16>
      %644 = arith.truncf %642 : vector<8x32xf32> to vector<8x32xbf16>
      %cst_198 = arith.constant dense<0.000000e+00> : vector<8x32xf32>
      %645 = tpu.matmul %644, %643, %cst_198 {dimension_numbers = #tpu.dot_dimension_numbers<[1], [0], [0], [1], [0, 0, 1, 1], [], []>} : vector<8x32xbf16>, vector<32x32xbf16>, vector<8x32xf32> -> vector<8x32xf32>
      %646 = vector.extract_strided_slice %590 {offsets = [0, 0], sizes = [1, 32], strides = [1, 1]} : vector<8x128xf32> to vector<1x32xf32>
      %647 = vector.broadcast %646 : vector<1x32xf32> to vector<8x32xf32>
      %648 = arith.addf %645, %647 : vector<8x32xf32>
      %649 = arith.mulf %648, %648 : vector<8x32xf32>
      %650 = arith.mulf %648, %649 : vector<8x32xf32>
      %cst_199 = arith.constant 4.471500e-02 : f32
      %651 = vector.broadcast %cst_199 : f32 to vector<8x32xf32>
      %652 = arith.mulf %651, %650 : vector<8x32xf32>
      %653 = arith.addf %648, %652 : vector<8x32xf32>
      %cst_200 = arith.constant 0.797884583 : f32
      %654 = vector.broadcast %cst_200 : f32 to vector<8x32xf32>
      %655 = arith.mulf %654, %653 : vector<8x32xf32>
      %656 = math.tanh %655 : vector<8x32xf32>
      %cst_201 = arith.constant 1.000000e+00 : f32
      %657 = vector.broadcast %cst_201 : f32 to vector<8x32xf32>
      %658 = arith.addf %657, %656 : vector<8x32xf32>
      %cst_202 = arith.constant 5.000000e-01 : f32
      %659 = vector.broadcast %cst_202 : f32 to vector<8x32xf32>
      %660 = arith.mulf %659, %658 : vector<8x32xf32>
      %661 = arith.mulf %648, %660 : vector<8x32xf32>
      %662 = vector.extract_strided_slice %590 {offsets = [1, 0], sizes = [1, 32], strides = [1, 1]} : vector<8x128xf32> to vector<1x32xf32>
      %663 = vector.extract_strided_slice %590 {offsets = [2, 0], sizes = [1, 32], strides = [1, 1]} : vector<8x128xf32> to vector<1x32xf32>
      %cst_203 = arith.constant dense<0.000000e+00> : vector<8xf32>
      %664 = vector.multi_reduction <add>, %661, %cst_203 [1] : vector<8x32xf32> to vector<8xf32>
      %665 = vector.shape_cast %664 : vector<8xf32> to vector<8x1xf32>
      %cst_204 = arith.constant 3.200000e+01 : f32
      %666 = vector.broadcast %cst_204 : f32 to vector<8x1xf32>
      %667 = arith.divf %665, %666 : vector<8x1xf32>
      %668 = vector.broadcast %667 : vector<8x1xf32> to vector<8x32xf32>
      %669 = arith.subf %661, %668 : vector<8x32xf32>
      %670 = arith.mulf %669, %669 : vector<8x32xf32>
      %cst_205 = arith.constant dense<0.000000e+00> : vector<8xf32>
      %671 = vector.multi_reduction <add>, %670, %cst_205 [1] : vector<8x32xf32> to vector<8xf32>
      %672 = vector.shape_cast %671 : vector<8xf32> to vector<8x1xf32>
      %cst_206 = arith.constant 3.200000e+01 : f32
      %673 = vector.broadcast %cst_206 : f32 to vector<8x1xf32>
      %674 = arith.divf %672, %673 : vector<8x1xf32>
      %cst_207 = arith.constant 9.99999974E-6 : f32
      %675 = vector.broadcast %cst_207 : f32 to vector<8x1xf32>
      %676 = arith.addf %674, %675 : vector<8x1xf32>
      %677 = math.rsqrt %676 : vector<8x1xf32>
      %678 = vector.broadcast %677 : vector<8x1xf32> to vector<8x32xf32>
      %679 = arith.mulf %669, %678 : vector<8x32xf32>
      %680 = vector.broadcast %662 : vector<1x32xf32> to vector<8x32xf32>
      %681 = arith.mulf %679, %680 : vector<8x32xf32>
      %682 = vector.broadcast %663 : vector<1x32xf32> to vector<8x32xf32>
      %683 = arith.addf %681, %682 : vector<8x32xf32>
      %c0_208 = arith.constant 0 : index
      %c0_209 = arith.constant 0 : index
      %684 = vector.load %arg21[%c0_208, %c0_209] : memref<32x128xbf16, #tpu.memory_space<vmem>>, vector<32x128xbf16>
      %685 = arith.truncf %683 : vector<8x32xf32> to vector<8x32xbf16>
      %cst_210 = arith.constant dense<0.000000e+00> : vector<8x128xf32>
      %686 = tpu.matmul %685, %684, %cst_210 {dimension_numbers = #tpu.dot_dimension_numbers<[1], [0], [0], [1], [0, 0, 1, 1], [], []>} : vector<8x32xbf16>, vector<32x128xbf16>, vector<8x128xf32> -> vector<8x128xf32>
      %c0_211 = arith.constant 0 : index
      %c0_212 = arith.constant 0 : index
      %687 = vector.load %arg23[%c0_211, %c0_212] : memref<1x128xf32, #tpu.memory_space<vmem>>, vector<1x128xf32>
      %688 = vector.broadcast %687 : vector<1x128xf32> to vector<8x128xf32>
      %689 = arith.addf %686, %688 : vector<8x128xf32>
      %c0_213 = arith.constant 0 : index
      %c0_214 = arith.constant 0 : index
      %c0_215 = arith.constant 0 : index
      %690 = vector.load %arg25[%c0_213, %c0_214, %c0_215] : memref<1x8x128xf32, #tpu.memory_space<vmem>>, vector<1x8x128xf32>
      %691 = vector.shape_cast %690 : vector<1x8x128xf32> to vector<8x128xf32>
      %692 = vector.shape_cast %689 : vector<8x128xf32> to vector<1x8x128xf32>
      tpu.vector_store %arg25[%c0_213, %c0_214, %c0_215], %692 {strides = array<i32>} : memref<1x8x128xf32, #tpu.memory_space<vmem>>, vector<1x8x128xf32>,
    } else {
    }
    return
  }
  func.func @transform_0(%arg0: i32, %arg1: i32) -> (i32, i32, i32) {
    %c0_i32 = arith.constant 0 : i32
    %c0_i32_0 = arith.constant 0 : i32
    %c0_i32_1 = arith.constant 0 : i32
    return %arg0, %c0_i32, %c0_i32_0 : i32, i32, i32
  }
  func.func @transform_1(%arg0: i32, %arg1: i32) -> (i32, i32, i32) {
    %c0_i32 = arith.constant 0 : i32
    %c0_i32_0 = arith.constant 0 : i32
    %c0_i32_1 = arith.constant 0 : i32
    return %arg0, %c0_i32, %c0_i32_0 : i32, i32, i32
  }
  func.func @transform_2(%arg0: i32, %arg1: i32) -> (i32, i32) {
    %c0_i32 = arith.constant 0 : i32
    %c0_i32_0 = arith.constant 0 : i32
    %c0_i32_1 = arith.constant 0 : i32
    return %c0_i32, %c0_i32_0 : i32, i32
  }
  func.func @transform_3(%arg0: i32, %arg1: i32) -> (i32, i32) {
    %c0_i32 = arith.constant 0 : i32
    %c0_i32_0 = arith.constant 0 : i32
    %c0_i32_1 = arith.constant 0 : i32
    return %c0_i32, %c0_i32_0 : i32, i32
  }
  func.func @transform_4(%arg0: i32, %arg1: i32) -> (i32, i32) {
    %c0_i32 = arith.constant 0 : i32
    %c0_i32_0 = arith.constant 0 : i32
    %c0_i32_1 = arith.constant 0 : i32
    return %c0_i32, %c0_i32_0 : i32, i32
  }
  func.func @transform_5(%arg0: i32, %arg1: i32) -> (i32, i32, i32) {
    %c0_i32 = arith.constant 0 : i32
    %0 = arith.addi %arg1, %c0_i32 : i32
    %c0_i32_0 = arith.constant 0 : i32
    %c0_i32_1 = arith.constant 0 : i32
    %c0_i32_2 = arith.constant 0 : i32
    return %0, %c0_i32_0, %c0_i32_1 : i32, i32, i32
  }
  func.func @transform_6(%arg0: i32, %arg1: i32) -> (i32, i32, i32) {
    %c0_i32 = arith.constant 0 : i32
    %0 = arith.addi %arg1, %c0_i32 : i32
    %c0_i32_0 = arith.constant 0 : i32
    %c0_i32_1 = arith.constant 0 : i32
    %c0_i32_2 = arith.constant 0 : i32
    return %0, %c0_i32_0, %c0_i32_1 : i32, i32, i32
  }
  func.func @transform_7(%arg0: i32, %arg1: i32) -> (i32, i32, i32) {
    %c0_i32 = arith.constant 0 : i32
    %0 = arith.addi %arg1, %c0_i32 : i32
    %c0_i32_0 = arith.constant 0 : i32
    %c0_i32_1 = arith.constant 0 : i32
    %c0_i32_2 = arith.constant 0 : i32
    return %0, %c0_i32_0, %c0_i32_1 : i32, i32, i32
  }
  func.func @transform_8(%arg0: i32, %arg1: i32) -> (i32, i32, i32) {
    %c0_i32 = arith.constant 0 : i32
    %0 = arith.addi %arg1, %c0_i32 : i32
    %c0_i32_0 = arith.constant 0 : i32
    %c0_i32_1 = arith.constant 0 : i32
    %c0_i32_2 = arith.constant 0 : i32
    return %0, %c0_i32_0, %c0_i32_1 : i32, i32, i32
  }
  func.func @transform_9(%arg0: i32, %arg1: i32) -> (i32, i32, i32) {
    %c0_i32 = arith.constant 0 : i32
    %0 = arith.addi %arg1, %c0_i32 : i32
    %c0_i32_0 = arith.constant 0 : i32
    %c0_i32_1 = arith.constant 0 : i32
    %c0_i32_2 = arith.constant 0 : i32
    return %0, %c0_i32_0, %c0_i32_1 : i32, i32, i32
  }
  func.func @transform_10(%arg0: i32, %arg1: i32) -> (i32, i32, i32) {
    %c0_i32 = arith.constant 0 : i32
    %0 = arith.addi %arg1, %c0_i32 : i32
    %c0_i32_0 = arith.constant 0 : i32
    %c0_i32_1 = arith.constant 0 : i32
    %c0_i32_2 = arith.constant 0 : i32
    return %0, %c0_i32_0, %c0_i32_1 : i32, i32, i32
  }
  func.func @transform_11(%arg0: i32, %arg1: i32) -> (i32, i32, i32) {
    %c0_i32 = arith.constant 0 : i32
    %0 = arith.addi %arg1, %c0_i32 : i32
    %c0_i32_0 = arith.constant 0 : i32
    %c0_i32_1 = arith.constant 0 : i32
    %c0_i32_2 = arith.constant 0 : i32
    return %0, %c0_i32_0, %c0_i32_1 : i32, i32, i32
  }
  func.func @transform_12(%arg0: i32, %arg1: i32) -> (i32, i32, i32) {
    %c0_i32 = arith.constant 0 : i32
    %0 = arith.addi %arg1, %c0_i32 : i32
    %c0_i32_0 = arith.constant 0 : i32
    %c0_i32_1 = arith.constant 0 : i32
    %c0_i32_2 = arith.constant 0 : i32
    return %0, %c0_i32_0, %c0_i32_1 : i32, i32, i32
  }
  func.func @transform_13(%arg0: i32, %arg1: i32) -> (i32, i32, i32) {
    %c0_i32 = arith.constant 0 : i32
    %0 = arith.addi %arg1, %c0_i32 : i32
    %c0_i32_0 = arith.constant 0 : i32
    %c0_i32_1 = arith.constant 0 : i32
    %c0_i32_2 = arith.constant 0 : i32
    return %0, %c0_i32_0, %c0_i32_1 : i32, i32, i32
  }
  func.func @transform_14(%arg0: i32, %arg1: i32) -> (i32, i32, i32) {
    %c0_i32 = arith.constant 0 : i32
    %0 = arith.addi %arg1, %c0_i32 : i32
    %c0_i32_0 = arith.constant 0 : i32
    %c0_i32_1 = arith.constant 0 : i32
    %c0_i32_2 = arith.constant 0 : i32
    return %0, %c0_i32_0, %c0_i32_1 : i32, i32, i32
  }
  func.func @transform_15(%arg0: i32, %arg1: i32) -> (i32, i32, i32) {
    %c0_i32 = arith.constant 0 : i32
    %0 = arith.addi %arg1, %c0_i32 : i32
    %c0_i32_0 = arith.constant 0 : i32
    %c0_i32_1 = arith.constant 0 : i32
    %c0_i32_2 = arith.constant 0 : i32
    return %0, %c0_i32_0, %c0_i32_1 : i32, i32, i32
  }
  func.func @transform_16(%arg0: i32, %arg1: i32) -> (i32, i32, i32) {
    %c0_i32 = arith.constant 0 : i32
    %0 = arith.addi %arg1, %c0_i32 : i32
    %c0_i32_0 = arith.constant 0 : i32
    %c0_i32_1 = arith.constant 0 : i32
    %c0_i32_2 = arith.constant 0 : i32
    return %0, %c0_i32_0, %c0_i32_1 : i32, i32, i32
  }
  func.func @transform_17(%arg0: i32, %arg1: i32) -> (i32, i32, i32) {
    %c0_i32 = arith.constant 0 : i32
    %0 = arith.addi %arg1, %c0_i32 : i32
    %c0_i32_0 = arith.constant 0 : i32
    %c0_i32_1 = arith.constant 0 : i32
    %c0_i32_2 = arith.constant 0 : i32
    return %0, %c0_i32_0, %c0_i32_1 : i32, i32, i32
  }
  func.func @transform_18(%arg0: i32, %arg1: i32) -> (i32, i32) {
    %c0_i32 = arith.constant 0 : i32
    %c0_i32_0 = arith.constant 0 : i32
    %c0_i32_1 = arith.constant 0 : i32
    return %c0_i32, %c0_i32_0 : i32, i32
  }
  func.func @transform_19(%arg0: i32, %arg1: i32) -> (i32, i32) {
    %c0_i32 = arith.constant 0 : i32
    %c0_i32_0 = arith.constant 0 : i32
    %c0_i32_1 = arith.constant 0 : i32
    return %c0_i32, %c0_i32_0 : i32, i32
  }
  func.func @transform_20(%arg0: i32, %arg1: i32) -> (i32, i32) {
    %c0_i32 = arith.constant 0 : i32
    %c0_i32_0 = arith.constant 0 : i32
    %c0_i32_1 = arith.constant 0 : i32
    return %c0_i32, %c0_i32_0 : i32, i32
  }
  func.func @transform_21(%arg0: i32, %arg1: i32) -> (i32, i32) {
    %c0_i32 = arith.constant 0 : i32
    %c0_i32_0 = arith.constant 0 : i32
    %c0_i32_1 = arith.constant 0 : i32
    return %c0_i32, %c0_i32_0 : i32, i32
  }
  func.func @transform_22(%arg0: i32, %arg1: i32) -> (i32, i32, i32) {
    %c0_i32 = arith.constant 0 : i32
    %c0_i32_0 = arith.constant 0 : i32
    %c0_i32_1 = arith.constant 0 : i32
    return %arg0, %c0_i32, %c0_i32_0 : i32, i32, i32
  }
  func.func @transform_23(%arg0: i32, %arg1: i32) -> (i32, i32, i32) {
    %c0_i32 = arith.constant 0 : i32
    %c0_i32_0 = arith.constant 0 : i32
    %c0_i32_1 = arith.constant 0 : i32
    return %arg0, %c0_i32, %c0_i32_0 : i32, i32, i32
  }
}

</mosaic_0001>

<bundles_post_ra>
// kernel: pipet_forward.1
= control target key start
LH: loop header
LB: loop body
LE: loop exit
PB: predicated region body
PF: predicated region fallthrough
CT: control target
= control target key end

     0   :  { %s6455_s0 = inlined_call_operand.vmem [shape: f32[2,8,32], index: 0, kind: input, shape index: {}]   ;;  %s6456_s1 = inlined_call_operand.vmem [shape: f32[2,8,32], index: 1, kind: input, shape index: {}]   ;;  %s6457_s2 = inlined_call_operand.vmem [shape: s32[2,2], index: 2, kind: input, shape index: {}]   ;;  %s6458_s3 = inlined_call_operand.vmem [shape: s32[2,2], index: 3, kind: input, shape index: {}]   ;;  %s6459_s4 = inlined_call_operand.vmem [shape: f32[2,2], index: 4, kind: input, shape index: {}]   ;;  %s6460_s5 = inlined_call_operand.vmem [shape: bf16[2,32,96], index: 5, kind: input, shape index: {}]   ;;  %s6461_s6 = inlined_call_operand.vmem [shape: bf16[2,32,32], index: 6, kind: input, shape index: {}]   ;;  %s6462_s7 = inlined_call_operand.vmem [shape: bf16[2,32,128], index: 7, kind: input, shape index: {}]   ;;  %s6463_s8 = inlined_call_operand.vmem [shape: bf16[2,128,32], index: 8, kind: input, shape index: {}]   ;;  %s6464_s9 = inlined_call_operand.vmem [shape: f32[2,8,128], index: 9, kind: input, shape index: {}]   ;;  %s6465_s10 = inlined_call_operand.vmem [shape: bf16[2,32,96], index: 10, kind: input, shape index: {}]   ;;  %s6466_s11 = inlined_call_operand.vmem [shape: bf16[2,32,32], index: 11, kind: input, shape index: {}]   ;;  %s6467_s12 = inlined_call_operand.vmem [shape: bf16[2,32,32], index: 12, kind: input, shape index: {}]   ;;  %s6468_s13 = inlined_call_operand.vmem [shape: bf16[2,32,64], index: 13, kind: input, shape index: {}]   ;;  %s6469_s14 = inlined_call_operand.vmem [shape: bf16[2,32,32], index: 14, kind: input, shape index: {}]   ;;  %s6470_s15 = inlined_call_operand.vmem [shape: bf16[2,32,128], index: 15, kind: input, shape index: {}]   ;;  %s6471_s16 = inlined_call_operand.vmem [shape: bf16[2,128,32], index: 16, kind: input, shape index: {}]   ;;  %s6472_s17 = inlined_call_operand.vmem [shape: f32[2,16,128], index: 17, kind: input, shape index: {}]   ;;  %s6473_s18 = inlined_call_operand.vmem [shape: bf16[32,32], index: 18, kind: input, shape index: {}]   ;;  %s6474_s19 = inlined_call_operand.vmem [shape: bf16[32,128], index: 19, kind: input, shape index: {}]   ;;  %s6475_s20 = inlined_call_operand.vmem [shape: f32[8,128], index: 20, kind: input, shape index: {}]   ;;  %s6476_s21 = inlined_call_operand.vmem [shape: f32[1,128], index: 21, kind: input, shape index: {}]   ;;  %s6477_s22 = inlined_call_operand.hbm [shape: f32[2,8,128], index: 22, kind: output, shape index: {0}]   ;;  %s6478_s23 = inlined_call_operand.hbm [shape: f32[2,8,128], index: 23, kind: output, shape index: {1}]  }
   0x1   :  { %6502 = sst [smem:[#allocation31_spill]] %s6455_s0 }
   0x2   :  { %6503 = sst [smem:[#allocation32_spill]] %s6456_s1 }
   0x3   :  { %6504 = sst [smem:[#allocation33_spill]] %s6457_s2 }
   0x4   :  { %6505 = sst [smem:[#allocation34_spill]] %s6458_s3 }
   0x5   :  { %6506 = sst [smem:[#allocation35_spill]] %s6459_s4 }
   0x6   :  { %6507 = sst [smem:[#allocation36_spill]] %s6460_s5 }
   0x7   :  { %6508 = sst [smem:[#allocation37_spill]] %s6461_s6 }
   0x8   :  { %6509 = sst [smem:[#allocation38_spill]] %s6462_s7 }
   0x9   :  { %6510 = sst [smem:[#allocation39_spill]] %s6463_s8 }
   0xa   :  { %6511 = sst [smem:[#allocation40_spill]] %s6464_s9 }
   0xb   :  { %6512 = sst [smem:[#allocation41_spill]] %s6465_s10 }
   0xc   :  { %6513 = sst [smem:[#allocation42_spill]] %s6466_s11 }
   0xd   :  { %6514 = sst [smem:[#allocation43_spill]] %s6467_s12 }
   0xe   :  { %6515 = sst [smem:[#allocation44_spill]] %s6468_s13 }
   0xf   :  { %6516 = sst [smem:[#allocation45_spill]] %s6471_s16 }
  0x10   :  { %6517 = sst [smem:[#allocation46_spill]] %s6472_s17 }
  0x11   :  { %6518 = sst [smem:[#allocation47_spill]] %s6473_s18 }
  0x12   :  { %6519 = sst [smem:[#allocation48_spill]] %s6474_s19 }
  0x13   :  { %6520 = sst [smem:[#allocation49_spill]] %s6475_s20 }
  0x14   :  { %6521 = sst [smem:[#allocation50_spill]] %s6476_s21 }
  0x15   :  { %6522 = sst [smem:[#allocation51_spill]] %s6477_s22 }
  0x16   :  { %6523 = sst [smem:[#allocation52_spill]] %s6478_s23 }
  0x17   :  { %29 = vsyncpa [#allocation6], 0 }
  0x18   :  { %30 = vsyncpa [#allocation8], 0 }
  0x19   :  { %31 = vsyncpa [#allocation5], 0 }
  0x1a   :  { %33 = vsyncpa [#allocation5 + $0x1], 0 }
  0x1b   :  { %34 = vsyncpa [#allocation12], 0 }
  0x1c   :  { %36 = vsyncpa [#allocation12 + $0x1], 0  ;;  %s5567_s4 = smov 0   ;;  %s5569_s30 = smov 0  }
  0x1d   :  { %s5571_s24 = smov 0   ;;  %s5573_s25 = smov 0  }
  0x1e   :  { %s5575_s5 = smov 0   ;;  %s5577_s1 = smov 0  }
  0x1f   :  { %s5579_s26 = smov 0   ;;  %s5581_s2 = smov 0  }
  0x20 LB: > { %6524 = sst [smem:[#allocation17_spill]] %s5396_s4  ;;  %s4414_s6 = sadd.s32 4294967295, %s5424_s2   ;;  %s5424_s2 = sphi %s5581_s2, %s42_s2   ;;  %s5420_s26 = sphi %s5579_s26, %s6585_s26   ;;  %s5416_s1 = sphi %s5577_s1, %s6584_s1   ;;  %s5412_s5 = sphi %s5575_s5, %s6583_s5   ;;  %s5408_s25 = sphi %s5573_s25, %s6582_s25   ;;  %s5404_s24 = sphi %s5571_s24, %s6581_s24   ;;  %s5400_s30 = sphi %s5569_s30, %s6580_s30   ;;  %s5396_s4 = sphi %s5567_s4, %s6579_s4  }
  0x21   : > { %6525 = sst [smem:[#allocation18_spill]] %s5400_s30  ;;  %s4415_s27 = sadd.s32 4294967294, %s5424_s2  }
  0x22   : > { %6526 = sst [smem:[#allocation19_spill]] %s5404_s24  ;;  %s51_s7 = sadd.s32 1, %s5416_s1 }
  0x23   : > { %6527 = sst [smem:[#allocation20_spill]] %s5408_s25  ;;  %s54_s28 = sadd.s32 1, %s5420_s26 }
  0x24   : > { %6528 = sst [smem:[#allocation21_spill]] %s5412_s5  ;;  %p52_p0 = scmp.ge.s32.totalorder %s51_s7, 2 }
  0x25   : > { %6529 = sst [smem:[#allocation22_spill]] %s5416_s1  ;;  %s598_s29 = sadd.s32 1, %s5404_s24 }
  0x26   : > { %6530 = sst [smem:[#allocation23_spill]] %s5420_s26  ;;  %p608_p1 = scmp.ne.s32.totalorder %s5404_s24, %s5400_s30 }
  0x27   : > { %6531 = sst [smem:[#allocation24_spill]] %s5424_s2  ;;  %p609_p2 = scmp.eq.s32.totalorder %s4414_s6, 3 }
  0x28   : > { %s6587_s7 = smov (%p52_p0, %s51_s7), 0  ;;  %s6589_s28 = smov (!%p52_p0, %s54_s28), %s5420_s26 }
  0x29   : > { %6532 = sst [smem:[#allocation25_spill]] %s6587_s7  ;;  %p5617_p3 = por %p609_p2, %p608_p1 }
  0x2a   : > { %p614_p4 = scmp.ne.s32.totalorder %s5400_s30, %s5396_s4  ;;  %p56_p5 = scmp.ge.s32.totalorder %s6589_s28, 2 }
  0x2b   : > { %s6533_s3 = scalar_select %p5617_p3, 1, 0 }
  0x2c   : > { %p615_p6 = scmp.eq.s32.totalorder %s4415_s27, 3  ;;  %p4416_p7 = scmp.ge.s32.totalorder %s5424_s2, 1 }
  0x2d   : > { %6534 = sst [smem:[#allocation26_spill]] %s6533_s3  ;;  %p648_p8 = scmp.lt.s32.totalorder %s5424_s2, 5 }
  0x2e   : > { %s6591_s28 = smov (%p56_p5, %s6589_s28), 0  ;;  %p5627_p9 = por %p615_p6, %p614_p4 }
  0x2f   : > { %6535 = sst [smem:[#allocation27_spill]] %s6591_s28  ;;  %p5631_p10 = pnand %p4416_p7, %p648_p8 }
  0x30   : > { %s6536_s0 = scalar_select %p5627_p9, 1, 0 }
  0x31   : > { %s6538_s7 = scalar_select %p5631_p10, 1, 0 }
  0x32   : > { %6537 = sst [smem:[#allocation28_spill]] %s6536_s0  ;;  %s595_s1 = ssub.s32 %s5420_s26, %s6591_s28 }
  0x33   : > { %p596_p11 = scmp.eq.s32.totalorder %s595_s1, 0  ;;  %p5031_p12 = pneg %p5631_p10 }
  0x34   : > { %p5639_p13 = scmp.eq.s32.totalorder %s4414_s6, 0  ;;  %s6540_s23 = sld [smem:[#allocation34_spill]] }
  0x35   : > { %s5647_s22 = scalar_select %p596_p11, %s5404_s24, %s598_s29  }
  0x36   : > { %s6539_s27 = scalar_select %p5639_p13, 1, 0 }
  0x37   : > { %6541 = sst [smem:[#allocation29_spill]] %s5647_s22  ;;  %p5651_p0 = pnand %p5639_p13, %p5031_p12 }
  0x39   : > { %p5247_p2 = pneg %p5651_p0 }
  0x3a   : > { %s672_s3 = sshll.u32 %s6540_s23, 4  ;;  %s673_s3 = int_to_ptr.vmem [resolvable:$true] %s672_s3 }
  0x3b   : > { %s5245_s1 = scalar_lea.vmem %s673_s3, 32  ;;  %p5253_p6 = scmp.lt.s32.totalorder %s673_s3, %s673_s3 }
  0x3c   : > { %p5246_p1 = scmp.ne.s32.totalorder %s673_s3, %s5245_s1  ;;  %p5254_p7 = scmp.lt.s32.totalorder %s5245_s1, %s5245_s1 }
  0x3e   : > { %p5248_p4 = pnand %p5247_p2, %p5246_p1  ;;  %p5255_p8 = por %p5254_p7, %p5253_p6 }
  0x40   : > { %p5249_p5 = pneg %p5248_p4 }
  0x42   : > { %p5256_p11 = pnand %p5255_p8, %p5249_p5 }
  0x44   : > { %5259 = shalt.err (!%p5256_p11)
}
  0x45   : > { %s5426_s23 = smov [#allocation7]   ;;  %s6543_s6 = sld [smem:[#allocation33_spill]] }
  0x46   : > { %5037 = dma.vmem_to_smem (!%p5651_p0), %s673_s3, 32, %s5426_s23, [#allocation8]  }
  0x47   : > { %s6544_s22 = sld [smem:[#allocation35_spill]] }
  0x4b   : > { %s661_s29 = sshll.u32 %s6543_s6, 4  ;;  %s662_s29 = int_to_ptr.vmem [resolvable:$true] %s661_s29 }
  0x4c   : > { %s5260_s21 = scalar_lea.vmem %s662_s29, 32  ;;  %p5268_p5 = scmp.lt.s32.totalorder %s662_s29, %s662_s29 }
  0x4d   : > { %s683_s24 = sshll.u32 %s6544_s22, 4  ;;  %p5261_p12 = scmp.ne.s32.totalorder %s662_s29, %s5260_s21  ;;  %s684_s24 = int_to_ptr.vmem [resolvable:$true] %s683_s24 }
  0x4e   : > { %p5269_p6 = scmp.lt.s32.totalorder %s5260_s21, %s5260_s21 }
  0x4f   : > { %p5263_p1 = pnand %p5261_p12, %p5247_p2 }
  0x50   : > { %p5270_p7 = por %p5269_p6, %p5268_p5 }
  0x51   : > { %p5264_p4 = pneg %p5263_p1 }
  0x53   : > { %p5271_p8 = pnand %p5270_p7, %p5264_p4 }
  0x55   : > { %5274 = shalt.err (!%p5271_p8)
}
  0x56   : > { %s5427_s3 = smov [#allocation4]   ;;  %s5275_s1 = scalar_lea.vmem %s684_s24, 32 }
  0x57   : > { %5034 = dma.vmem_to_smem (!%p5651_p0), %s662_s29, 32, %s5427_s3, [#allocation6]  }
  0x58   : > { %p5276_p11 = scmp.ne.s32.totalorder %s684_s24, %s5275_s1  ;;  %p5283_p13 = scmp.lt.s32.totalorder %s684_s24, %s684_s24 }
  0x59   : > { %p5284_p12 = scmp.lt.s32.totalorder %s5275_s1, %s5275_s1 }
  0x5a   : > { %p5278_p9 = pnand %p5276_p11, %p5247_p2 }
  0x5b   : > { %p5285_p1 = por %p5284_p12, %p5283_p13 }
  0x5c   : > { %p5279_p3 = pneg %p5278_p9 }
  0x5e   : > { %p5286_p10 = pnand %p5285_p1, %p5279_p3 }
  0x60   : > { %5289 = shalt.err (!%p5286_p10)
}
  0x61   : > { %s5428_s21 = smov [#allocation9]   ;;  %p6545_p4 = scmp.ne.s32.totalorder %s6538_s7, 0 }
  0x62   : > { %5040 = dma.vmem_to_smem (!%p5651_p0), %s684_s24, 32, %s5428_s21, [#allocation8]  }
  0x63   : > { %825 = sbr.rel (%p6545_p4) target bundleno = 9847 (0x2677), region = 108 }
  0x6a   : > { %p6546_p5 = scmp.ne.s32.totalorder %s6539_s27, 0 }
  0x6c   : > { %5379 = dma.done.wait (%p6546_p5), [#allocation6], 32  }
  0x6d   : > { %5381 = vsyncadd (%p6546_p5), [#allocation6], 4294967264 }
  0x6e   : > { %5383 = dma.done.wait (%p6546_p5), [#allocation8], 64  }
  0x6f   : > { %5385 = vsyncadd (%p6546_p5), [#allocation8], 4294967232 }
  0x70   : > { %839 = sfence }
  0x71   : > { %s5689_s22 = sand.u32 1, %s5400_s30   ;;  %p970_p3 = scmp.lt.s32.totalorder %s5412_s5, 1 }
  0x72   : > { %6547 = sst [smem:[#allocation30_spill]] %s5689_s22  ;;  %s4425_s24 = sshll.u32 %s5689_s22, 3 }
  0x73   : > { %p978_p9 = scmp.lt.s32.totalorder %s5408_s25, 1  ;;  %s6548_s4 = sld [smem:[#allocation31_spill]] }
  0x74   : > { %s971_s26 = scalar_select %p970_p3, %s5412_s5, 1 }
  0x75   : > { %s979_s7 = scalar_select %p978_p9, %s5408_s25, 1 }
  0x76   : > { %s4427_s28 = sshll.u32 %s971_s26, 3  ;;  %s6549_s29 = sld [smem:[#allocation32_spill]] }
  0x77   : > { %s4547_s1 = sshll.u32 %s979_s7, 4  ;;  %s4550_s21 = sshll.u32 %s979_s7, 6 }
  0x78   : > { %s6550_s20 = sld [smem:[#allocation36_spill]]  ;;  %s6551_s5 = sld [smem:[#allocation37_spill]] }
  0x79   : > { %s973_s27 = scalar_lea.vmem %s6548_s4, %s4427_s28  ;;  %s6552_s0 = sld [smem:[#allocation38_spill]] }
  0x7a   : > { %s6553_s8 = sld [smem:[#allocation39_spill]]  ;;  %s4437_s6 = sshll.u32 %s979_s7, 3 }
  0x7b   : > { %s6554_s10 = sld [smem:[#allocation41_spill]]  ;;  %s6555_s9 = sld [smem:[#allocation40_spill]] }
  0x7c   : > { %s977_s3 = scalar_lea.vmem %s6549_s29, %s4427_s28  ;;  %s6556_s11 = sld [smem:[#allocation42_spill]] }
  0x7d   : > { %s6557_s12 = sld [smem:[#allocation43_spill]]  ;;  %s6558_s13 = sld [smem:[#allocation44_spill]] }
  0x7e   : > { %s5705_s18 = scalar_lea.vmem %s6550_s20, %s4547_s1  ;;  %s5710_s25 = scalar_lea.vmem %s6551_s5, %s4547_s1 }
  0x7f   : > { %s5715_s23 = scalar_lea.vmem %s6552_s0, %s4547_s1  ;;  %s5755_s22 = scalar_lea.vmem %s6470_s15, %s4547_s1 }
  0x80   : > { %s5720_s28 = scalar_lea.vmem %s6553_s8, %s4550_s21  ;;  %s6559_s0 = sld [smem:[#allocation45_spill]] }
  0x81   : > { %s5725_s20 = scalar_lea.vmem %s6554_s10, %s4547_s1  ;;  %s5730_s5 = scalar_lea.vmem %s6555_s9, %s4437_s6 }
  0x82   : > { %s5735_s26 = scalar_lea.vmem %s6556_s11, %s4547_s1  ;;  %s5750_s6 = scalar_lea.vmem %s6469_s14, %s4547_s1 }
  0x83   : > { %s5740_s2 = scalar_lea.vmem %s6557_s12, %s4547_s1  ;;  %s5745_s29 = scalar_lea.vmem %s6558_s13, %s4547_s1 }
  0x84   : > { %s6560_s8 = sld [smem:[#allocation46_spill]]  ;;  %s5767_s13 = scalar_lea.vmem [#allocation10], %s4425_s24 }
  0x85   : > { %s5769_s10 = scalar_lea.vmem [#allocation11], %s4425_s24  ;;  %s6561_s19 = sld [smem:[#allocation20_spill]] }
  0x86   : > { %s5760_s4 = scalar_lea.vmem %s6559_s0, %s4550_s21 }
  0x8a   : > { %s5765_s7 = scalar_lea.vmem %s6560_s8, %s4547_s1 }
  0x8b   : > { %p4454_p10 = scmp.ne.s32.totalorder %s6561_s19, 0 }
  0x8c   : > { %v1047_v0 = vld [vmem:[%s973_s27] sm:$0xff] (!%p4454_p10)  ;;  %vm1048_vm0 = vcmask (!%p4454_p10), 261120  }
  0x8d   : > { %1046 = sbr.rel (%p4454_p10) target bundleno = 148 (0x94), region = 124  ;;  %v1050_v1 = vld [vmem:[%s977_s3] sm:$0xff] (!%p4454_p10)  ;;  %1049 = vst.msk [vmem:[#allocation2] sm:$0xff] (!%p4454_p10), %vm1048_vm0, %v1047_v0 }
  0x8e   : > { %1051 = vst.msk [vmem:[#allocation3] sm:$0xff] (!%p4454_p10), %vm1048_vm0, %v1050_v1 }
  0x94 PF: > { %v5772_v2 = vld [vmem:[#allocation2] sm:$0xff]  ;;  %vm1083_vm1 = vcmask 261120   ;;  %v5429_v10 = vmov 0.0   ;;  %vm5430_vm2 = vmmov 0   ;;  %v5139_v11 = vld [vmem:[%s5705_s18 + $0x8] sm:$0xff]   ;;  %v1062_v14 = vlaneseq  ;;  %s5431_s9 = smov 64  }
  0x95   : > { %v1084_v3 = vsel %vm1083_vm1, %v5772_v2, 0.0  ;;  %v5138_v9 = vld [vmem:[%s5705_s18] sm:$0xff]   ;;  %4679 = vmatprep.subr.bf16.mxu1 %v5429_v10  ;;  %4683 = vmatprep.mubr.msk.bf16.mxu1 %vm5430_vm2, %v5429_v10  ;;  %s5432_s11 = smov 96   ;;  %s5433_s12 = smov 88   ;;  %vm1182_vm3 = vcmask 64512   ;;  %vm1244_vm4 = vcmask 1043456  }
  0x96   : > { %1085 = vadd.xlane.f32.xlu0 %v1084_v3  ;;  %4680 = vmatpush3.bf16.msra.mxu1 %v5138_v9  ;;  %v5788_v16 = vshrl.u32 %v1062_v14, 7  ;;  %v5794_v18 = vld [vmem:[%s5730_s5] sm:$0xff]  ;;  %s6562_s18 = sld [smem:[#allocation21_spill]]  ;;  %s5434_s24 = smov 120   ;;  %v5839_v41 = vand.u32 127, %v1062_v14 }
  0x97   : > { %4705 = vmatprep.subr.bf16.mxu0 %v5429_v10  ;;  %4681 = vmatprep.subr.bf16.mxu1 %v5429_v10  ;;  %v5435_v43 = vmov -1e+09   ;;  %s5436_s30 = smov 56   ;;  %s5437_s17 = smov 80  }
  0x98   : > { %4707 = vmatprep.mubr.msk.bf16.mxu0 %vm5430_vm2, %v5429_v10  ;;  %v5791_v17 = vsub.s32 0, %v5788_v16  ;;  %v5797_v19 = vsub.s32 1, %v5788_v16  ;;  %v5807_v27 = vsub.s32 4, %v5788_v16  ;;  %s5438_s16 = smov 112   ;;  %s5439_s0 = smov 48   ;;  %vm1077_vm7 = vcmp.le.s32.totalorder %v5839_v41, %v5788_v16 }
  0x99   : > { %s5440_s8 = smov 72   ;;  %s5441_s19 = smov 104  }
  0x9a   : > { %4682 = vmatpush3.bf16.msra.mxu1 %v5139_v11  ;;  %v1101_v20 = vrot.slane %v5794_v18, %v5791_v17  ;;  %v1106_v23 = vrot.slane %v5794_v18, %v5797_v19  ;;  %v1116_v28 = vrot.slane %v5794_v18, %v5807_v27 }
  0x9b   : > { %4687 = vmatprep.subr.bf16.mxu1 %v5429_v10 }
  0x9c   : > { %s5832_s27 = sshll.u32 %s6562_s18, 7  ;;  %s5442_s18 = smov 40  }
  0x9d   : > { %s5835_s3 = sadd.s32 1, %s5832_s27  ;;  %s1053_s1 = sld [smem:[#allocation4 + %s5832_s27]] }
  0x9e   : > { %s1055_s21 = sld [smem:[#allocation4 + %s5835_s3]] }
  0xa4   : > { %s1056_s5 = sadd.s32 %s1055_s21, %s1053_s1  ;;  %s1060_s1 = sld [smem:[#allocation9 + %s5832_s27]] }
  0xa5   : > { %v1064_v42 = vstv %s1056_s5 }
  0xa6   : > { %vm1065_vm5 = vcmp.lt.s32.totalorder %v5839_v41, %v1064_v42 }
  0xa7   : > { %v5843_v44 = vsel %vm1065_vm5, 0.0, %v5435_v43 }
 0x123   : > { %v1086_v4 = vpop.xlane.xlu0 %1085 }
 0x124   : > { %v1088_v5 = vmul.f32 0.03125, %v1086_v4 }
 0x126   : > { %v1089_v6 = vsub.f32 %v5772_v2, %v1088_v5 }
 0x128   : > { %v1090_v7 = vmul.f32 %v1089_v6, %v1089_v6 }
 0x12a   : > { %v1091_v8 = vsel %vm1083_vm1, %v1090_v7, 0.0 }
 0x12b   : > { %1092 = vadd.xlane.f32.xlu0 %v1091_v8 }
 0x1b8   : > { %v1093_v12 = vpop.xlane.xlu0 %1092 }
 0x1b9   : > { %v1094_v13 = vmul.f32 0.03125, %v1093_v12 }
 0x1bb   : > { %v1095_v15 = vadd.f32 1e-05, %v1094_v13 }
 0x1bd   : > { %5166 = vrsqrt.f32 %v1095_v15 }
 0x1c7   : > { %v5167_v21 = vpop.eup %5166 }
 0x1c8   : > { %v1097_v22 = vmul.f32 %v5167_v21, %v1089_v6 }
 0x1ca   : > { %v1102_v24 = vmul.f32 %v1101_v20, %v1097_v22  ;;  %v1172_v20 = vld [vmem:[%s5710_s25] sm:$0xf]  ;;  %v1173_v22 = vld [vmem:[%s5710_s25 + $0x4] sm:$0xf] }
 0x1cb   : > { %v1453_v21 = vsel %vm1244_vm4, %v1172_v20, 0 }
 0x1cc   : > { %v1107_v25 = vadd.f32 %v1106_v23, %v1102_v24  ;;  %v1407_v23 = vsel %vm1244_vm4, %v1173_v22, 0 }
 0x1ce   : > { %v1112_v26 = vpack.c.bf16 %v1107_v25, %v1107_v25 }
 0x1d0   : > { %4684 = vmatmul.mubr.msk.bf16.vlgmr.msra.gmra.mrb[0].mxu1 %vm1083_vm1, %v1112_v26 }
 0x1d1   : > { %4689 = vmatprep.mubr.msk.bf16.mxu1 %vm5430_vm2, %v5429_v10 }
 0x2a3   : > { %v1166_v29 = vpop.f32.mrb[0].mxu1 }
 0x2a4   : > { %v1167_v30 = vadd.f32 %v1166_v29, %v1116_v28  ;;  %v4685_v31 = vpop.f32.mrb[1].mxu1 }
 0x2a5   : > { %v1169_v32 = vpop.f32.mrb[2].mxu1 }
 0x2a6   : > { %v5811_v33 = vpack.c.bf16 %v1167_v30, %v1167_v30  ;;  %v4686_v34 = vpop.f32.mrb[3].mxu1  ;;  %v1176_v35 = vmul.f32 0.35355338, %v1167_v30 }
 0x2a8   : > { %1239 = vrot.lane.b32.xlu0 %v5811_v33, %s5431_s9  ;;  %1180 = vrot.lane.b32.xlu1 %v5811_v33, %s5432_s11  ;;  %v5819_v36 = vpack.c.bf16 %v1176_v35, %v1176_v35 }
 0x2ac   : > { %1294 = vrot.lane.b32.xlu0 %v5811_v33, %s5433_s12 }
 0x2b0   : > { %1292 = vrot.lane.b32.xlu0 %v5819_v36, %s5434_s24 }
 0x31a   : > { %v1181_v37 = vpop.permute.xlu1 %1180  ;;  %v1240_v39 = vpop.permute.xlu0 %1239 }
 0x31b   : > { %v1187_v38 = vsel %vm1182_vm3, %v1181_v37, 0  ;;  %v1246_v40 = vsel %vm1244_vm4, %v1240_v39, 0 }
 0x31c   : > { %4688 = vmatpush3.bf16.xpose.msra.mxu1 %v1187_v38 }
 0x31d   : > { %4693 = vmatprep.subr.bf16.mxu1 %v5429_v10 }
 0x31e   : > { %v1295_v57 = vpop.permute.xlu0 %1294 }
 0x31f   : > { %v1300_v59 = vsel %vm1182_vm3, %v1295_v57, 0 }
 0x322   : > { %v1293_v60 = vpop.permute.xlu0 %1292 }
 0x323   : > { %4690 = vmatmul.mubr.msk.bf16.vlgmr.msra.gmra.mrb[4].mxu1 %vm1182_vm3, %v5819_v36 }
 0x324   : > { %4694 = vmatpush3.bf16.msra.mxu1 %v1246_v40  ;;  %4695 = vmatprep.mubr.msk.bf16.mxu1 %vm5430_vm2, %v5429_v10 }
 0x325   : > { %4699 = vmatprep.subr.bf16.mxu1 %v5429_v10 }
 0x3f6   : > { %v1223_v45 = vpop.f32.mrb[4].mxu1 }
 0x3f7   : > { %v1224_v46 = vadd.f32 %v1223_v45, %v5843_v44  ;;  %v4691_v47 = vpop.f32.mrb[5].mxu1 }
 0x3f8   : > { %v1226_v48 = vpop.f32.mrb[6].mxu1 }
 0x3f9   : > { %v4692_v49 = vpop.f32.mrb[7].mxu1  ;;  %v1229_v50 = vsel %vm1182_vm3, %v1224_v46, -inf }
 0x3fa   : > { %1230 = vmax.xlane.f32.xlu1 %v1229_v50 }
 0x40b   : > { %1352 = vrot.lane.b32.xlu1 %v5811_v33, %s5436_s30 }
 0x487   : > { %v1231_v51 = vpop.xlane.xlu1 %1230 }
 0x488   : > { %v1232_v52 = vsub.f32 %v1224_v46, %v1231_v51 }
 0x48a   : > { %v1233_v53 = vmul.f32 1.442695, %v1232_v52 }
 0x48b   : > { %v1353_v54 = vpop.permute.xlu1 %1352 }
 0x48c   : > { %5168 = vpow2.f32 %v1233_v53  ;;  %v1358_v55 = vsel %vm1244_vm4, %v1353_v54, 0 }
 0x48d   : > { %4706 = vmatpush3.bf16.msra.mxu0 %v1358_v55 }
 0x48e   : > { %4717 = vmatprep.subr.bf16.mxu0 %v5429_v10 }
 0x496   : > { %v5169_v56 = vpop.eup %5168 }
 0x497   : > { %v1238_v58 = vpack.c.bf16 %v5169_v56, %v5169_v56  ;;  %v1235_v15 = vsel %vm1182_vm3, %v5169_v56, 0.0 }
 0x499   : > { %4696 = vmatmul.mubr.msk.bf16.vlgmr.msra.gmra.mrb[8].mxu1 %vm1182_vm3, %v1238_v58 }
 0x49a   : > { %4700 = vmatpush3.bf16.xpose.msra.mxu1 %v1300_v59  ;;  %4701 = vmatprep.mubr.msk.bf16.mxu1 %vm5430_vm2, %v5429_v10 }
 0x49b   : > { %4711 = vmatprep.subr.bf16.mxu1 %v5429_v10 }
 0x4a1   : > { %4702 = vmatmul.mubr.msk.bf16.vlgmr.msra.gmra.mrb[12].mxu1 %vm1182_vm3, %v1293_v60 }
 0x4a2   : > { %4713 = vmatprep.mubr.msk.bf16.mxu1 %vm5430_vm2, %v5429_v10  ;;  %4712 = vmatpush3.bf16.msra.mxu1 %v1407_v23 }
 0x4a3   : > { %4723 = vmatprep.subr.bf16.mxu1 %v5429_v10 }
 0x56c   : > { %v1282_v61 = vpop.f32.mrb[8].mxu1 }
 0x56d   : > { %v4697_v62 = vpop.f32.mrb[9].mxu1 }
 0x56e   : > { %v1285_v63 = vpop.f32.mrb[10].mxu1 }
 0x56f   : > { %v4698_v0 = vpop.f32.mrb[11].mxu1 }
 0x574   : > { %v1336_v1 = vpop.f32.mrb[12].mxu1 }
 0x575   : > { %v1337_v3 = vadd.f32 %v1336_v1, %v5843_v44  ;;  %v4703_v4 = vpop.f32.mrb[13].mxu1 }
 0x576   : > { %v1339_v5 = vpop.f32.mrb[14].mxu1 }
 0x577   : > { %v4704_v6 = vpop.f32.mrb[15].mxu1  ;;  %v1342_v7 = vsel %vm1182_vm3, %v1337_v3, -inf }
 0x578   : > { %1343 = vmax.xlane.f32.xlu0 %v1342_v7  ;;  %v1174_v7 = vld [vmem:[%s5710_s25 + $0x8] sm:$0xf] }
 0x58e   : > { %1497 = vrot.lane.b32.xlu0 %v5811_v33, %s5437_s17 }
 0x592   : > { %1495 = vrot.lane.b32.xlu0 %v5819_v36, %s5438_s16 }
 0x605   : > { %v1344_v8 = vpop.xlane.xlu0 %1343 }
 0x606   : > { %v1345_v9 = vsub.f32 %v1337_v3, %v1344_v8  ;;  %v1610_v8 = vsel %vm1244_vm4, %v1174_v7, 0 }
 0x608   : > { %v1346_v11 = vmul.f32 1.442695, %v1345_v9 }
 0x609   : > { %v1498_v37 = vpop.permute.xlu0 %1497 }
 0x60a   : > { %5170 = vpow2.f32 %v1346_v11  ;;  %v1503_v42 = vsel %vm1182_vm3, %v1498_v37, 0 }
 0x60d   : > { %v1496_v45 = vpop.permute.xlu0 %1495 }
 0x614   : > { %v5171_v12 = vpop.eup %5170 }
 0x615   : > { %v1348_v13 = vsel %vm1182_vm3, %v5171_v12, 0.0  ;;  %v1351_v14 = vpack.c.bf16 %v5171_v12, %v5171_v12 }
 0x616   : > { %1349 = vadd.xlane.f32.xlu1 %v1348_v13 }
 0x617   : > { %4708 = vmatmul.mubr.msk.bf16.vlgmr.msra.gmra.mrb[0].mxu0 %vm1182_vm3, %v1351_v14 }
 0x618   : > { %4719 = vmatprep.mubr.msk.bf16.mxu0 %vm5430_vm2, %v5429_v10  ;;  %4718 = vmatpush3.bf16.msra.mxu0 %v1453_v21 }
 0x619   : > { %4729 = vmatprep.subr.bf16.mxu0 %v5429_v10 }
 0x61a   : > { %1236 = vadd.xlane.f32.xlu1 %v1235_v15 }
 0x62b   : > { %1555 = vrot.lane.b32.xlu1 %v5811_v33, %s5439_s0 }
 0x62f   : > { %1655 = vrot.lane.b32.xlu1 %v5811_v33, %s5440_s8 }
 0x633   : > { %1653 = vrot.lane.b32.xlu1 %v5819_v36, %s5441_s19 }
 0x6a3   : > { %v1350_v24 = vpop.xlane.xlu1 %1349 }
 0x6a7   : > { %v1237_v25 = vpop.xlane.xlu1 %1236 }
 0x6a8   : > { %5172 = vrcp.f32 %v1237_v25 }
 0x6a9   : > { %5174 = vrcp.f32 %v1350_v24 }
 0x6ab   : > { %v1556_v29 = vpop.permute.xlu1 %1555 }
 0x6ac   : > { %v1561_v31 = vsel %vm1244_vm4, %v1556_v29, 0 }
 0x6af   : > { %v1656_v1 = vpop.permute.xlu1 %1655 }
 0x6b0   : > { %v1661_v5 = vsel %vm1182_vm3, %v1656_v1, 0 }
 0x6b2   : > { %v5173_v26 = vpop.eup %5172 }
 0x6b3   : > { %v1289_v28 = vmul.f32 %v5173_v26, %v1282_v61  ;;  %v5175_v32 = vpop.eup %5174  ;;  %v1654_v6 = vpop.permute.xlu1 %1653 }
 0x6b5   : > { %v1290_v30 = vpack.c.bf16 %v1289_v28, %v1289_v28 }
 0x6b7   : > { %4720 = vmatmul.mubr.msk.bf16.vlgmr.msra.gmra.mrb[4].mxu0 %vm1182_vm3, %v1290_v30 }
 0x6b8   : > { %4730 = vmatpush3.bf16.msra.mxu0 %v1561_v31  ;;  %4731 = vmatprep.mubr.msk.bf16.mxu0 %vm5430_vm2, %v5429_v10 }
 0x6b9   : > { %4741 = vmatprep.subr.bf16.mxu0 %v5429_v10 }
 0x6ea   : > { %v1394_v34 = vpop.f32.mrb[0].mxu0 }
 0x6eb   : > { %v1401_v35 = vmul.f32 %v5175_v32, %v1394_v34  ;;  %v4709_v36 = vpop.f32.mrb[1].mxu0 }
 0x6ec   : > { %v1397_v38 = vpop.f32.mrb[2].mxu0 }
 0x6ed   : > { %v1402_v39 = vpack.c.bf16 %v1401_v35, %v1401_v35  ;;  %v4710_v40 = vpop.f32.mrb[3].mxu0 }
 0x6ef   : > { %4714 = vmatmul.mubr.msk.bf16.vlgmr.msra.gmra.mrb[16].mxu1 %vm1182_vm3, %v1402_v39 }
 0x6f0   : > { %4724 = vmatpush3.bf16.xpose.msra.mxu1 %v1503_v42  ;;  %4725 = vmatprep.mubr.msk.bf16.mxu1 %vm5430_vm2, %v5429_v10 }
 0x6f1   : > { %4735 = vmatprep.subr.bf16.mxu1 %v5429_v10 }
 0x6f7   : > { %4726 = vmatmul.mubr.msk.bf16.vlgmr.msra.gmra.mrb[20].mxu1 %vm1182_vm3, %v1496_v45 }
 0x6f8   : > { %4737 = vmatprep.mubr.msk.bf16.mxu1 %vm5430_vm2, %v5429_v10  ;;  %4736 = vmatpush3.bf16.msra.mxu1 %v1610_v8 }
 0x6f9   : > { %4747 = vmatprep.subr.bf16.mxu1 %v5429_v10 }
 0x78a   : > { %v1489_v46 = vpop.f32.mrb[4].mxu0 }
 0x78b   : > { %v4721_v47 = vpop.f32.mrb[5].mxu0 }
 0x78c   : > { %v1492_v48 = vpop.f32.mrb[6].mxu0 }
 0x78d   : > { %v4722_v49 = vpop.f32.mrb[7].mxu0 }
 0x7c2   : > { %v1443_v50 = vpop.f32.mrb[16].mxu1 }
 0x7c3   : > { %v5895_v51 = vadd.f32 %v1489_v46, %v1443_v50  ;;  %v4715_v52 = vpop.f32.mrb[17].mxu1 }
 0x7c4   : > { %v1446_v53 = vpop.f32.mrb[18].mxu1 }
 0x7c5   : > { %v4716_v54 = vpop.f32.mrb[19].mxu1 }
 0x7ca   : > { %v1539_v55 = vpop.f32.mrb[20].mxu1 }
 0x7cb   : > { %v1540_v56 = vadd.f32 %v1539_v55, %v5843_v44  ;;  %v4727_v57 = vpop.f32.mrb[21].mxu1 }
 0x7cc   : > { %v1542_v58 = vpop.f32.mrb[22].mxu1 }
 0x7cd   : > { %v4728_v59 = vpop.f32.mrb[23].mxu1  ;;  %v1545_v60 = vsel %vm1182_vm3, %v1540_v56, -inf }
 0x7ce   : > { %1546 = vmax.xlane.f32.xlu0 %v1545_v60 }
 0x85b   : > { %v1547_v61 = vpop.xlane.xlu0 %1546 }
 0x85c   : > { %v1548_v62 = vsub.f32 %v1540_v56, %v1547_v61  ;;  %v1814_v56 = vsub.s32 5, %v5788_v16 }
 0x85e   : > { %v1549_v63 = vmul.f32 1.442695, %v1548_v62  ;;  %v1815_v58 = vrot.slane %v5794_v18, %v1814_v56 }
 0x860   : > { %5176 = vpow2.f32 %v1549_v63 }
 0x86a   : > { %v5177_v0 = vpop.eup %5176 }
 0x86b   : > { %v1551_v3 = vsel %vm1182_vm3, %v5177_v0, 0.0  ;;  %v1554_v4 = vpack.c.bf16 %v5177_v0, %v5177_v0  ;;  %v5938_v0 = vld [vmem:[#allocation3] sm:$0xff] }
 0x86c   : > { %1552 = vadd.xlane.f32.xlu1 %v1551_v3  ;;  %v2028_v3 = vsel %vm1083_vm1, %v5938_v0, 0.0 }
 0x86d   : > { %4732 = vmatmul.mubr.msk.bf16.vlgmr.msra.gmra.mrb[8].mxu0 %vm1182_vm3, %v1554_v4 }
 0x86e   : > { %4742 = vmatpush3.bf16.xpose.msra.mxu0 %v1661_v5  ;;  %4743 = vmatprep.mubr.msk.bf16.mxu0 %vm5430_vm2, %v5429_v10 }
 0x86f   : > { %4753 = vmatprep.subr.bf16.mxu0 %v5429_v10 }
 0x875   : > { %4744 = vmatmul.mubr.msk.bf16.vlgmr.msra.gmra.mrb[12].mxu0 %vm1182_vm3, %v1654_v6 }
 0x876   : > { %4755 = vmatprep.mubr.msk.bf16.mxu0 %vm5430_vm2, %v5429_v10 }
 0x8f9   : > { %v1553_v9 = vpop.xlane.xlu1 %1552 }
 0x8fa   : > { %5178 = vrcp.f32 %v1553_v9 }
 0x904   : > { %v5179_v11 = vpop.eup %5178 }
 0x940   : > { %v1597_v12 = vpop.f32.mrb[8].mxu0 }
 0x941   : > { %v1604_v13 = vmul.f32 %v5179_v11, %v1597_v12  ;;  %v4733_v14 = vpop.f32.mrb[9].mxu0 }
 0x942   : > { %v1600_v15 = vpop.f32.mrb[10].mxu0  ;;  %v5140_v14 = vld [vmem:[%s5715_s23] sm:$0xff]  }
 0x943   : > { %v1605_v20 = vpack.c.bf16 %v1604_v13, %v1604_v13  ;;  %v4734_v21 = vpop.f32.mrb[11].mxu0  ;;  %v5141_v15 = vld [vmem:[%s5715_s23 + $0x8] sm:$0xff]   ;;  %s1058_s23 = sld [smem:[#allocation7 + %s5835_s3]] }
 0x945   : > { %4738 = vmatmul.mubr.msk.bf16.vlgmr.msra.gmra.mrb[24].mxu1 %vm1182_vm3, %v1605_v20 }
 0x946   : > { %4749 = vmatprep.mubr.msk.bf16.mxu1 %vm5430_vm2, %v5429_v10 }
 0x948   : > { %v1697_v22 = vpop.f32.mrb[12].mxu0 }
 0x949   : > { %v1698_v23 = vadd.f32 %v1697_v22, %v5843_v44  ;;  %v4745_v24 = vpop.f32.mrb[13].mxu0 }
 0x94a   : > { %v1700_v25 = vpop.f32.mrb[14].mxu0 }
 0x94b   : > { %v4746_v26 = vpop.f32.mrb[15].mxu0  ;;  %v1703_v28 = vsel %vm1182_vm3, %v1698_v23, -inf }
 0x94c   : > { %1704 = vmax.xlane.f32.xlu0 %v1703_v28  ;;  %v5953_v26 = vsub.s32 2, %v5788_v16  ;;  %v5956_v28 = vsub.s32 3, %v5788_v16 }
 0x962   : > { %1713 = vrot.lane.b32.xlu0 %v5811_v33, %s5442_s18  ;;  %v1175_v33 = vld [vmem:[%s5710_s25 + $0xc] sm:$0xf]  ;;  %s1057_s25 = sld [smem:[#allocation7 + %s5832_s27]] }
 0x963   : > { %v1768_v38 = vsel %vm1244_vm4, %v1175_v33, 0 }
 0x964   : > { %4754 = vmatpush3.bf16.msra.mxu0 %v1768_v38 }
 0x965   : > { %4767 = vmatprep.subr.bf16.mxu0 %v5429_v10 }
 0x9d9   : > { %v1705_v29 = vpop.xlane.xlu0 %1704 }
 0x9da   : > { %v1706_v30 = vsub.f32 %v1698_v23, %v1705_v29  ;;  %v1833_v29 = vrot.slane %v5794_v18, %v5953_v26 }
 0x9dc   : > { %v1707_v31 = vmul.f32 1.442695, %v1706_v30 }
 0x9dd   : > { %v1714_v32 = vpop.permute.xlu0 %1713 }
 0x9de   : > { %5180 = vpow2.f32 %v1707_v31  ;;  %v1719_v34 = vsel %vm1244_vm4, %v1714_v32, 0  ;;  %v5961_v31 = vld [vmem:[%s5765_s7] sm:$0xff] }
 0x9df   : > { %4748 = vmatpush3.bf16.msra.mxu1 %v1719_v34  ;;  %v1838_v34 = vrot.slane %v5794_v18, %v5956_v28 }
 0x9e0   : > { %4759 = vmatprep.subr.bf16.mxu1 %v5429_v10 }
 0x9e8   : > { %v5181_v35 = vpop.eup %5180 }
 0x9e9   : > { %v1709_v36 = vsel %vm1182_vm3, %v5181_v35, 0.0  ;;  %v1712_v37 = vpack.c.bf16 %v5181_v35, %v5181_v35 }
 0x9ea   : > { %1710 = vadd.xlane.f32.xlu0 %v1709_v36  ;;  %v2044_v36 = vrot.slane %v5961_v31, %v5791_v17 }
 0x9eb   : > { %4750 = vmatmul.mubr.msk.bf16.vlgmr.msra.gmra.mrb[28].mxu1 %vm1182_vm3, %v1712_v37 }
 0x9ec   : > { %4763 = vmatprep.mubr.msk.bf16.mxu1 %vm5430_vm2, %v5429_v10  ;;  %4760 = vmatpush3.bf16.msra.mxu1 %v5140_v14 }
 0x9ed   : > { %4761 = vmatprep.subr.bf16.mxu1 %v5429_v10 }
 0x9f0   : > { %4762 = vmatpush3.bf16.msra.mxu1 %v5141_v15 }
 0x9f1   : > { %4787 = vmatprep.subr.bf16.mxu1 %v5429_v10 }
 0xa18   : > { %v1646_v39 = vpop.f32.mrb[24].mxu1 }
 0xa19   : > { %v1652_v40 = vadd.f32 %v1646_v39, %v5895_v51  ;;  %v4739_v42 = vpop.f32.mrb[25].mxu1  ;;  %v5142_v39 = vld [vmem:[%s5725_s20] sm:$0xff]  }
 0xa1a   : > { %v1649_v45 = vpop.f32.mrb[26].mxu1 }
 0xa1b   : > { %v4740_v46 = vpop.f32.mrb[27].mxu1  ;;  %v2049_v45 = vrot.slane %v5961_v31, %v5797_v19 }
 0xa1c   : > { %v5143_v46 = vld [vmem:[%s5725_s20 + $0x8] sm:$0xff]   ;;  %s1059_s20 = sadd.s32 %s1058_s23, %s1057_s25 }
 0xa77   : > { %v1711_v47 = vpop.xlane.xlu0 %1710 }
 0xa78   : > { %5182 = vrcp.f32 %v1711_v47 }
 0xa82   : > { %v5183_v48 = vpop.eup %5182 }
 0xabe   : > { %v1755_v49 = vpop.f32.mrb[28].mxu1 }
 0xabf   : > { %v1762_v50 = vmul.f32 %v5183_v48, %v1755_v49  ;;  %v4751_v52 = vpop.f32.mrb[29].mxu1  ;;  %v5144_v49 = vld [vmem:[%s5720_s28] sm:$0xff]  }
 0xac0   : > { %v1758_v53 = vpop.f32.mrb[30].mxu1  ;;  %v5146_v52 = vld [vmem:[%s5720_s28 + $0x10] sm:$0xff]  }
 0xac1   : > { %v1763_v54 = vpack.c.bf16 %v1762_v50, %v1762_v50  ;;  %v4752_v55 = vpop.f32.mrb[31].mxu1  ;;  %v5145_v50 = vld [vmem:[%s5720_s28 + $0x8] sm:$0xff]   ;;  %v5147_v53 = vld [vmem:[%s5720_s28 + $0x18] sm:$0xff]  }
 0xac2   : > { %v5149_v55 = vld [vmem:[%s5720_s28 + $0x28] sm:$0xff]  }
 0xac3   : > { %4756 = vmatmul.mubr.msk.bf16.vlgmr.msra.gmra.mrb[16].mxu0 %vm1182_vm3, %v1763_v54  ;;  %v5148_v54 = vld [vmem:[%s5720_s28 + $0x20] sm:$0xff]  }
 0xac4   : > { %4783 = vmatprep.mubr.msk.bf16.mxu0 %vm5430_vm2, %v5429_v10  ;;  %4768 = vmatpush3.bf16.msra.mxu0 %v5144_v49 }
 0xac5   : > { %4769 = vmatprep.subr.bf16.mxu0 %v5429_v10 }
 0xac8   : > { %4770 = vmatpush3.bf16.msra.mxu0 %v5145_v50 }
 0xac9   : > { %4771 = vmatprep.subr.bf16.mxu0 %v5429_v10 }
 0xacc   : > { %4772 = vmatpush3.bf16.msra.mxu0 %v5146_v52 }
 0xacd   : > { %4773 = vmatprep.subr.bf16.mxu0 %v5429_v10 }
 0xad0   : > { %4774 = vmatpush3.bf16.msra.mxu0 %v5147_v53 }
 0xad1   : > { %4775 = vmatprep.subr.bf16.mxu0 %v5429_v10 }
 0xad4   : > { %4776 = vmatpush3.bf16.msra.mxu0 %v5148_v54 }
 0xad5   : > { %4777 = vmatprep.subr.bf16.mxu0 %v5429_v10 }
 0xad8   : > { %4778 = vmatpush3.bf16.msra.mxu0 %v5149_v55 }
 0xad9   : > { %4779 = vmatprep.subr.bf16.mxu0 %v5429_v10 }
 0xb96   : > { %v1804_v51 = vpop.f32.mrb[16].mxu0 }
 0xb97   : > { %v1810_v57 = vadd.f32 %v1804_v51, %v1652_v40  ;;  %v4757_v59 = vpop.f32.mrb[17].mxu0  ;;  %v5150_v51 = vld [vmem:[%s5720_s28 + $0x30] sm:$0xff]  }
 0xb98   : > { %v1807_v60 = vpop.f32.mrb[18].mxu0  ;;  %4780 = vmatpush3.bf16.msra.mxu0 %v5150_v51 }
 0xb99   : > { %v1811_v61 = vadd.f32 %v1810_v57, %v5772_v2  ;;  %v4758_v62 = vpop.f32.mrb[19].mxu0  ;;  %v5151_v57 = vld [vmem:[%s5720_s28 + $0x38] sm:$0xff]   ;;  %4781 = vmatprep.subr.bf16.mxu0 %v5429_v10  ;;  %s1061_s28 = sld [smem:[#allocation9 + %s5835_s3]] }
 0xb9b   : > { %v5936_v63 = vadd.f32 %v1815_v58, %v1811_v61  ;;  %v1847_v58 = vsub.s32 6, %v5788_v16 }
 0xb9c   : > { %4782 = vmatpush3.bf16.msra.mxu0 %v5151_v57 }
 0xb9d   : > { %v1817_v1 = vsel %vm1083_vm1, %v5936_v63, 0.0  ;;  %4813 = vmatprep.subr.bf16.mxu0 %v5429_v10  ;;  %v1848_v59 = vrot.slane %v5794_v18, %v1847_v58 }
 0xb9e   : > { %1818 = vadd.xlane.f32.xlu1 %v1817_v1 }
 0xba2   : > { %2029 = vadd.xlane.f32.xlu1 %v2028_v3 }
 0xc2b   : > { %v1819_v4 = vpop.xlane.xlu1 %1818 }
 0xc2c   : > { %v1820_v5 = vmul.f32 0.03125, %v1819_v4 }
 0xc2e   : > { %v1821_v6 = vsub.f32 %v5936_v63, %v1820_v5 }
 0xc2f   : > { %v2030_v2 = vpop.xlane.xlu1 %2029 }
 0xc30   : > { %v2031_v7 = vmul.f32 0.03125, %v2030_v2  ;;  %v1822_v8 = vmul.f32 %v1821_v6, %v1821_v6 }
 0xc32   : > { %v2032_v9 = vsub.f32 %v5938_v0, %v2031_v7  ;;  %v1823_v11 = vsel %vm1083_vm1, %v1822_v8, 0.0 }
 0xc33   : > { %1824 = vadd.xlane.f32.xlu1 %v1823_v11 }
 0xc34   : > { %v2033_v12 = vmul.f32 %v2032_v9, %v2032_v9 }
 0xc36   : > { %v2034_v13 = vsel %vm1083_vm1, %v2033_v12, 0.0 }
 0xc37   : > { %2035 = vadd.xlane.f32.xlu1 %v2034_v13 }
 0xcc0   : > { %v1825_v20 = vpop.xlane.xlu1 %1824 }
 0xcc1   : > { %v1826_v21 = vmul.f32 0.03125, %v1825_v20 }
 0xcc3   : > { %v1827_v22 = vadd.f32 1e-05, %v1826_v21 }
 0xcc4   : > { %v2036_v23 = vpop.xlane.xlu1 %2035 }
 0xcc5   : > { %5184 = vrsqrt.f32 %v1827_v22  ;;  %v2037_v24 = vmul.f32 0.03125, %v2036_v23 }
 0xcc7   : > { %v2038_v25 = vadd.f32 1e-05, %v2037_v24 }
 0xcc9   : > { %5186 = vrsqrt.f32 %v2038_v25 }
 0xccf   : > { %v5185_v30 = vpop.eup %5184 }
 0xcd0   : > { %v1829_v32 = vmul.f32 %v5185_v30, %v1821_v6  ;;  %v2059_v6 = vrot.slane %v5961_v31, %v1847_v58 }
 0xcd2   : > { %v1834_v35 = vmul.f32 %v1833_v29, %v1829_v32 }
 0xcd3   : > { %v5187_v37 = vpop.eup %5186 }
 0xcd4   : > { %v2040_v33 = vmul.f32 %v5187_v37, %v2032_v9  ;;  %v1839_v38 = vadd.f32 %v1838_v34, %v1834_v35  ;;  %v2021_v34 = vsub.s32 7, %v5788_v16  ;;  %v5160_v16 = vld [vmem:[%s5760_s4 + $0x10] sm:$0xff]  }
 0xcd6   : > { %v1844_v40 = vpack.c.bf16 %v1839_v38, %v1839_v38  ;;  %v2045_v42 = vmul.f32 %v2044_v36, %v2040_v33  ;;  %v2022_v35 = vrot.slane %v5794_v18, %v2021_v34  ;;  %v1073_v18 = vstv %s1061_s28 }
 0xcd8   : > { %4764 = vmatmul.mubr.msk.bf16.vlgmr.msra.gmra.mrb[32].mxu1 %vm1083_vm1, %v1844_v40  ;;  %v2050_v47 = vadd.f32 %v2049_v45, %v2045_v42  ;;  %v1071_v42 = vstv %s1059_s20  ;;  %v1069_v45 = vstv %s1057_s25 }
 0xcd9   : > { %4788 = vmatpush3.bf16.msra.mxu1 %v5142_v39  ;;  %4791 = vmatprep.mubr.msk.bf16.mxu1 %vm5430_vm2, %v5429_v10  ;;  %vm1072_vm6 = vcmp.lt.s32.totalorder %v5839_v41, %v1071_v42  ;;  %vm1070_vm8 = vcmp.lt.s32.totalorder %v5839_v41, %v1069_v45 }
 0xcda   : > { %4789 = vmatprep.subr.bf16.mxu1 %v5429_v10  ;;  %v2055_v48 = vpack.c.bf16 %v2050_v47, %v2050_v47  ;;  %vm1078_vm9 = vmand %vm1077_vm7, %vm1072_vm6 }
 0xcdd   : > { %4790 = vmatpush3.bf16.msra.mxu1 %v5143_v46  ;;  %v1075_v46 = vstv %s1060_s1 }
 0xcde   : > { %4795 = vmatprep.subr.bf16.mxu1 %v5429_v10 }
 0xce0   : > { %4792 = vmatmul.mubr.msk.bf16.vlgmr.msra.gmra.mrb[36].mxu1 %vm1083_vm1, %v2055_v48  ;;  %v1079_v48 = vsel %vm1078_vm9, 0.0, %v5435_v43 }
 0xce1   : > { %4797 = vmatprep.mubr.msk.bf16.mxu1 %vm5430_vm2, %v5429_v10 }
 0xdab   : > { %v1898_v60 = vpop.f32.mrb[32].mxu1 }
 0xdac   : > { %v1899_v61 = vadd.f32 %v1898_v60, %v1848_v59  ;;  %v4765_v62 = vpop.f32.mrb[33].mxu1 }
 0xdad   : > { %v1901_v1 = vpop.f32.mrb[34].mxu1 }
 0xdae   : > { %v1904_v3 = vmul.f32 %v1899_v61, %v1899_v61  ;;  %v4766_v4 = vpop.f32.mrb[35].mxu1 }
 0xdb0   : > { %v1905_v5 = vmul.f32 %v1904_v3, %v1899_v61 }
 0xdb2   : > { %v1906_v2 = vmul.f32 0.044715, %v1905_v5 }
 0xdb3   : > { %v2109_v7 = vpop.f32.mrb[36].mxu1 }
 0xdb4   : > { %v1907_v8 = vadd.f32 %v1906_v2, %v1899_v61  ;;  %v2110_v9 = vadd.f32 %v2109_v7, %v2059_v6  ;;  %v4793_v11 = vpop.f32.mrb[37].mxu1 }
 0xdb5   : > { %v2112_v12 = vpop.f32.mrb[38].mxu1 }
 0xdb6   : > { %v1908_v13 = vmul.f32 0.7978846, %v1907_v8  ;;  %v5998_v14 = vpack.c.bf16 %v2110_v9, %v2110_v9  ;;  %v4794_v15 = vpop.f32.mrb[39].mxu1  ;;  %v2119_v20 = vmul.f32 0.35355338, %v2110_v9 }
 0xdb8   : > { %5188 = vtanh.f32 %v1908_v13  ;;  %2123 = vrot.lane.b32.xlu1 %v5998_v14, %s5432_s11  ;;  %v6004_v21 = vpack.c.bf16 %v2119_v20, %v2119_v20 }
 0xdbc   : > { %2235 = vrot.lane.b32.xlu1 %v5998_v14, %s5433_s12 }
 0xdc0   : > { %2233 = vrot.lane.b32.xlu1 %v6004_v21, %s5434_s24 }
 0xdc2   : > { %v5189_v22 = vpop.eup %5188 }
 0xdc3   : > { %v1910_v23 = vadd.f32 1.0, %v5189_v22 }
 0xdc5   : > { %v1911_v24 = vmul.f32 0.5, %v1910_v23 }
 0xdc7   : > { %v1912_v25 = vmul.f32 %v1911_v24, %v1899_v61 }
 0xdc9   : > { %v1929_v29 = vpack.c.bf16 %v1912_v25, %v1912_v25 }
 0xdcb   : > { %4784 = vmatmul.mubr.bf16.vlgmr.msra.gmra.mrb[20].mxu0 %v1929_v29  ;;  %v2115_v29 = vld [vmem:[%s5735_s26] sm:$0xf] }
 0xdcc   : > { %4815 = vmatprep.mubr.msk.bf16.mxu0 %vm5430_vm2, %v5429_v10 }
 0xe2a   : > { %v2124_v30 = vpop.permute.xlu1 %2123 }
 0xe2b   : > { %v2129_v32 = vsel %vm1182_vm3, %v2124_v30, 0 }
 0xe2c   : > { %4796 = vmatpush3.bf16.xpose.msra.mxu1 %v2129_v32 }
 0xe2d   : > { %4801 = vmatprep.subr.bf16.mxu1 %v5429_v10 }
 0xe2e   : > { %v2236_v1 = vpop.permute.xlu1 %2235 }
 0xe2f   : > { %v2241_v4 = vsel %vm1182_vm3, %v2236_v1, 0 }
 0xe32   : > { %v2234_v5 = vpop.permute.xlu1 %2233 }
 0xe33   : > { %4798 = vmatmul.mubr.msk.bf16.vlgmr.msra.gmra.mrb[40].mxu1 %vm1182_vm3, %v6004_v21 }
 0xe34   : > { %4803 = vmatprep.mubr.msk.bf16.mxu1 %vm5430_vm2, %v5429_v10 }
 0xe9e   : > { %v2012_v36 = vpop.f32.mrb[20].mxu0 }
 0xe9f   : > { %v2018_v37 = vadd.f32 %v2012_v36, %v5936_v63  ;;  %v4785_v33 = vpop.f32.mrb[21].mxu0  ;;  %v1074_v63 = vsel %vm1072_vm6, %v1073_v18, 0.0  ;;  %v2394_v36 = vsel %vm1244_vm4, %v2115_v29, 0 }
 0xea0   : > { %v2015_v38 = vpop.f32.mrb[22].mxu0  ;;  %v1076_v47 = vsel %vm1070_vm8, %v1075_v46, %v1074_v63 }
 0xea1   : > { %v6021_v39 = vadd.f32 %v2022_v35, %v2018_v37  ;;  %v4786_v40 = vpop.f32.mrb[23].mxu0  ;;  %v6034_v49 = vadd.f32 %v1079_v48, %v1076_v47  ;;  %v2116_v37 = vld [vmem:[%s5735_s26 + $0x4] sm:$0xf] }
 0xea2   : > { %v2348_v33 = vsel %vm1244_vm4, %v2116_v37, 0 }
 0xea3   : > { %2024 = vst.msk [vmem:[#allocation2] sm:$0xff] %vm1083_vm1, %v6021_v39 }
 0xf06   : > { %v2165_v50 = vpop.f32.mrb[40].mxu1 }
 0xf07   : > { %v2166_v52 = vadd.f32 %v2165_v50, %v6034_v49  ;;  %v4799_v53 = vpop.f32.mrb[41].mxu1 }
 0xf08   : > { %v2168_v54 = vpop.f32.mrb[42].mxu1 }
 0xf09   : > { %v4800_v55 = vpop.f32.mrb[43].mxu1  ;;  %v2171_v51 = vsel %vm1182_vm3, %v2166_v52, -inf }
 0xf0a   : > { %2172 = vmax.xlane.f32.xlu0 %v2171_v51 }
 0xf20   : > { %2181 = vrot.lane.b32.xlu0 %v5998_v14, %s5431_s9 }
 0xf24   : > { %2293 = vrot.lane.b32.xlu0 %v5998_v14, %s5436_s30 }
 0xf97   : > { %v2173_v41 = vpop.xlane.xlu0 %2172 }
 0xf98   : > { %v2174_v57 = vsub.f32 %v2166_v52, %v2173_v41 }
 0xf9a   : > { %v2175_v43 = vmul.f32 1.442695, %v2174_v57 }
 0xf9b   : > { %v2182_v58 = vpop.permute.xlu0 %2181 }
 0xf9c   : > { %5190 = vpow2.f32 %v2175_v43  ;;  %v2187_v59 = vsel %vm1244_vm4, %v2182_v58, 0 }
 0xf9d   : > { %4802 = vmatpush3.bf16.msra.mxu1 %v2187_v59 }
 0xf9e   : > { %4807 = vmatprep.subr.bf16.mxu1 %v5429_v10 }
 0xf9f   : > { %v2294_v60 = vpop.permute.xlu0 %2293 }
 0xfa0   : > { %v2299_v61 = vsel %vm1244_vm4, %v2294_v60, 0 }
 0xfa1   : > { %4814 = vmatpush3.bf16.msra.mxu0 %v2299_v61 }
 0xfa2   : > { %4825 = vmatprep.subr.bf16.mxu0 %v5429_v10 }
 0xfa6   : > { %v5191_v62 = vpop.eup %5190 }
 0xfa7   : > { %v2180_v3 = vpack.c.bf16 %v5191_v62, %v5191_v62  ;;  %v2177_v22 = vsel %vm1182_vm3, %v5191_v62, 0.0 }
 0xfa9   : > { %4804 = vmatmul.mubr.msk.bf16.vlgmr.msra.gmra.mrb[44].mxu1 %vm1182_vm3, %v2180_v3 }
 0xfaa   : > { %4808 = vmatpush3.bf16.xpose.msra.mxu1 %v2241_v4  ;;  %4809 = vmatprep.mubr.msk.bf16.mxu1 %vm5430_vm2, %v5429_v10 }
 0xfab   : > { %4819 = vmatprep.subr.bf16.mxu1 %v5429_v10 }
 0xfb1   : > { %4810 = vmatmul.mubr.msk.bf16.vlgmr.msra.gmra.mrb[48].mxu1 %vm1182_vm3, %v2234_v5 }
 0xfb2   : > { %4821 = vmatprep.mubr.msk.bf16.mxu1 %vm5430_vm2, %v5429_v10  ;;  %4820 = vmatpush3.bf16.msra.mxu1 %v2348_v33 }
 0xfb3   : > { %4831 = vmatprep.subr.bf16.mxu1 %v5429_v10 }
0x107c   : > { %v2223_v6 = vpop.f32.mrb[44].mxu1 }
0x107d   : > { %v4805_v2 = vpop.f32.mrb[45].mxu1 }
0x107e   : > { %v2226_v7 = vpop.f32.mrb[46].mxu1 }
0x107f   : > { %v4806_v8 = vpop.f32.mrb[47].mxu1 }
0x1084   : > { %v2277_v9 = vpop.f32.mrb[48].mxu1 }
0x1085   : > { %v2278_v11 = vadd.f32 %v2277_v9, %v6034_v49  ;;  %v4811_v12 = vpop.f32.mrb[49].mxu1 }
0x1086   : > { %v2280_v13 = vpop.f32.mrb[50].mxu1 }
0x1087   : > { %v4812_v15 = vpop.f32.mrb[51].mxu1  ;;  %v2283_v20 = vsel %vm1182_vm3, %v2278_v11, -inf }
0x1088   : > { %2284 = vmax.xlane.f32.xlu1 %v2283_v20 }
0x1099   : > { %2438 = vrot.lane.b32.xlu1 %v5998_v14, %s5437_s17 }
0x10bd   : > { %2178 = vadd.xlane.f32.xlu1 %v2177_v22 }
0x10ce   : > { %2496 = vrot.lane.b32.xlu1 %v5998_v14, %s5439_s0 }
0x10d2   : > { %2594 = vrot.lane.b32.xlu1 %v6004_v21, %s5441_s19 }
0x1115   : > { %v2285_v23 = vpop.xlane.xlu1 %2284 }
0x1116   : > { %v2286_v24 = vsub.f32 %v2278_v11, %v2285_v23 }
0x1118   : > { %v2287_v25 = vmul.f32 1.442695, %v2286_v24 }
0x1119   : > { %v2439_v38 = vpop.permute.xlu1 %2438 }
0x111a   : > { %5192 = vpow2.f32 %v2287_v25  ;;  %v2444_v51 = vsel %vm1182_vm3, %v2439_v38, 0  ;;  %v2117_v25 = vld [vmem:[%s5735_s26 + $0x8] sm:$0xf] }
0x111b   : > { %v2551_v29 = vsel %vm1244_vm4, %v2117_v25, 0 }
0x1124   : > { %v5193_v30 = vpop.eup %5192 }
0x1125   : > { %v2289_v32 = vsel %vm1182_vm3, %v5193_v30, 0.0  ;;  %v2292_v35 = vpack.c.bf16 %v5193_v30, %v5193_v30 }
0x1126   : > { %2290 = vadd.xlane.f32.xlu0 %v2289_v32 }
0x1127   : > { %4816 = vmatmul.mubr.msk.bf16.vlgmr.msra.gmra.mrb[24].mxu0 %vm1182_vm3, %v2292_v35 }
0x1128   : > { %4826 = vmatpush3.bf16.msra.mxu0 %v2394_v36  ;;  %4827 = vmatprep.mubr.msk.bf16.mxu0 %vm5430_vm2, %v5429_v10 }
0x1129   : > { %4837 = vmatprep.subr.bf16.mxu0 %v5429_v10 }
0x113c   : > { %2436 = vrot.lane.b32.xlu0 %v6004_v21, %s5438_s16 }
0x114a   : > { %v2179_v40 = vpop.xlane.xlu1 %2178 }
0x114b   : > { %5194 = vrcp.f32 %v2179_v40 }
0x114e   : > { %v2497_v18 = vpop.permute.xlu1 %2496 }
0x114f   : > { %v2502_v46 = vsel %vm1244_vm4, %v2497_v18, 0 }
0x1152   : > { %v2595_v24 = vpop.permute.xlu1 %2594 }
0x1155   : > { %v5195_v42 = vpop.eup %5194 }
0x1156   : > { %v2230_v45 = vmul.f32 %v5195_v42, %v2223_v6 }
0x1158   : > { %v2231_v63 = vpack.c.bf16 %v2230_v45, %v2230_v45 }
0x115a   : > { %4828 = vmatmul.mubr.msk.bf16.vlgmr.msra.gmra.mrb[28].mxu0 %vm1182_vm3, %v2231_v63 }
0x115b   : > { %4838 = vmatpush3.bf16.msra.mxu0 %v2502_v46  ;;  %4839 = vmatprep.mubr.msk.bf16.mxu0 %vm5430_vm2, %v5429_v10 }
0x115c   : > { %4849 = vmatprep.subr.bf16.mxu0 %v5429_v10 }
0x11b3   : > { %v2291_v47 = vpop.xlane.xlu0 %2290 }
0x11b4   : > { %5196 = vrcp.f32 %v2291_v47 }
0x11b7   : > { %v2437_v41 = vpop.permute.xlu0 %2436 }
0x11be   : > { %v5197_v21 = vpop.eup %5196 }
0x11fa   : > { %v2335_v48 = vpop.f32.mrb[24].mxu0 }
0x11fb   : > { %v2342_v50 = vmul.f32 %v5197_v21, %v2335_v48  ;;  %v4817_v52 = vpop.f32.mrb[25].mxu0 }
0x11fc   : > { %v2338_v53 = vpop.f32.mrb[26].mxu0 }
0x11fd   : > { %v2343_v54 = vpack.c.bf16 %v2342_v50, %v2342_v50  ;;  %v4818_v55 = vpop.f32.mrb[27].mxu0 }
0x11ff   : > { %4822 = vmatmul.mubr.msk.bf16.vlgmr.msra.gmra.mrb[52].mxu1 %vm1182_vm3, %v2343_v54 }
0x1200   : > { %4832 = vmatpush3.bf16.xpose.msra.mxu1 %v2444_v51  ;;  %4833 = vmatprep.mubr.msk.bf16.mxu1 %vm5430_vm2, %v5429_v10 }
0x1201   : > { %4843 = vmatprep.subr.bf16.mxu1 %v5429_v10 }
0x1207   : > { %4834 = vmatmul.mubr.msk.bf16.vlgmr.msra.gmra.mrb[56].mxu1 %vm1182_vm3, %v2437_v41 }
0x1208   : > { %4845 = vmatprep.mubr.msk.bf16.mxu1 %vm5430_vm2, %v5429_v10  ;;  %4844 = vmatpush3.bf16.msra.mxu1 %v2551_v29 }
0x1209   : > { %4855 = vmatprep.subr.bf16.mxu1 %v5429_v10 }
0x122d   : > { %v2430_v57 = vpop.f32.mrb[28].mxu0 }
0x122e   : > { %v4829_v43 = vpop.f32.mrb[29].mxu0 }
0x122f   : > { %v2433_v58 = vpop.f32.mrb[30].mxu0 }
0x1230   : > { %v4830_v59 = vpop.f32.mrb[31].mxu0 }
0x12d2   : > { %v2384_v60 = vpop.f32.mrb[52].mxu1 }
0x12d3   : > { %v6088_v61 = vadd.f32 %v2430_v57, %v2384_v60  ;;  %v4823_v62 = vpop.f32.mrb[53].mxu1 }
0x12d4   : > { %v2387_v1 = vpop.f32.mrb[54].mxu1 }
0x12d5   : > { %v4824_v3 = vpop.f32.mrb[55].mxu1 }
0x12da   : > { %v2480_v4 = vpop.f32.mrb[56].mxu1 }
0x12db   : > { %v2481_v5 = vadd.f32 %v2480_v4, %v6034_v49  ;;  %v4835_v6 = vpop.f32.mrb[57].mxu1 }
0x12dc   : > { %v2483_v2 = vpop.f32.mrb[58].mxu1  ;;  %v5152_v6 = vld [vmem:[%s5745_s29] sm:$0xff]  }
0x12dd   : > { %v4836_v7 = vpop.f32.mrb[59].mxu1  ;;  %v2486_v8 = vsel %vm1182_vm3, %v2481_v5, -inf }
0x12de   : > { %2487 = vmax.xlane.f32.xlu0 %v2486_v8  ;;  %v5153_v8 = vld [vmem:[%s5745_s29 + $0x8] sm:$0xff]  }
0x12f4   : > { %2596 = vrot.lane.b32.xlu0 %v5998_v14, %s5440_s8 }
0x136b   : > { %v2488_v9 = vpop.xlane.xlu0 %2487 }
0x136c   : > { %v2489_v11 = vsub.f32 %v2481_v5, %v2488_v9 }
0x136e   : > { %v2490_v12 = vmul.f32 1.442695, %v2489_v11 }
0x136f   : > { %v2597_v15 = vpop.permute.xlu0 %2596 }
0x1370   : > { %5198 = vpow2.f32 %v2490_v12  ;;  %v2602_v23 = vsel %vm1182_vm3, %v2597_v15, 0  ;;  %v2756_v12 = vrot.slane %v5961_v31, %v2021_v34 }
0x137a   : > { %v5199_v13 = vpop.eup %5198 }
0x137b   : > { %v2492_v20 = vsel %vm1182_vm3, %v5199_v13, 0.0  ;;  %v2495_v22 = vpack.c.bf16 %v5199_v13, %v5199_v13 }
0x137c   : > { %2493 = vadd.xlane.f32.xlu1 %v2492_v20 }
0x137d   : > { %4840 = vmatmul.mubr.msk.bf16.vlgmr.msra.gmra.mrb[32].mxu0 %vm1182_vm3, %v2495_v22 }
0x137e   : > { %4850 = vmatpush3.bf16.xpose.msra.mxu0 %v2602_v23  ;;  %4851 = vmatprep.mubr.msk.bf16.mxu0 %vm5430_vm2, %v5429_v10 }
0x137f   : > { %4861 = vmatprep.subr.bf16.mxu0 %v5429_v10 }
0x1385   : > { %4852 = vmatmul.mubr.msk.bf16.vlgmr.msra.gmra.mrb[36].mxu0 %vm1182_vm3, %v2595_v24 }
0x1386   : > { %4863 = vmatprep.mubr.msk.bf16.mxu0 %vm5430_vm2, %v5429_v10 }
0x138d   : > { %2654 = vrot.lane.b32.xlu1 %v5998_v14, %s5442_s18 }
0x1409   : > { %v2494_v30 = vpop.xlane.xlu1 %2493 }
0x140a   : > { %5200 = vrcp.f32 %v2494_v30 }
0x140d   : > { %v2655_v33 = vpop.permute.xlu1 %2654 }
0x140e   : > { %v2660_v45 = vsel %vm1244_vm4, %v2655_v33, 0 }
0x1414   : > { %v5201_v32 = vpop.eup %5200 }
0x1450   : > { %v2538_v35 = vpop.f32.mrb[32].mxu0 }
0x1451   : > { %v2545_v36 = vmul.f32 %v5201_v32, %v2538_v35  ;;  %v4841_v37 = vpop.f32.mrb[33].mxu0 }
0x1452   : > { %v2541_v38 = vpop.f32.mrb[34].mxu0  ;;  %v6146_v37 = vld [vmem:[%s5765_s7 + $0x8] sm:$0xff] }
0x1453   : > { %v2546_v40 = vpack.c.bf16 %v2545_v36, %v2545_v36  ;;  %v4842_v42 = vpop.f32.mrb[35].mxu0  ;;  %v2853_v33 = vrot.slane %v6146_v37, %v5797_v19 }
0x1454   : > { %v5154_v42 = vld [vmem:[%s5740_s2] sm:$0xff]  }
0x1455   : > { %4846 = vmatmul.mubr.msk.bf16.vlgmr.msra.gmra.mrb[60].mxu1 %vm1182_vm3, %v2546_v40 }
0x1456   : > { %4856 = vmatpush3.bf16.msra.mxu1 %v2660_v45  ;;  %4857 = vmatprep.mubr.msk.bf16.mxu1 %vm5430_vm2, %v5429_v10  ;;  %v5155_v45 = vld [vmem:[%s5740_s2 + $0x8] sm:$0xff]  }
0x1457   : > { %4867 = vmatprep.subr.bf16.mxu1 %v5429_v10 }
0x1458   : > { %v2638_v14 = vpop.f32.mrb[36].mxu0 }
0x1459   : > { %v2639_v18 = vadd.f32 %v2638_v14, %v6034_v49  ;;  %v4853_v63 = vpop.f32.mrb[37].mxu0  ;;  %v2118_v49 = vld [vmem:[%s5735_s26 + $0xc] sm:$0xf]  ;;  %s6563_s26 = sld [smem:[#allocation20_spill]] }
0x145a   : > { %v2641_v46 = vpop.f32.mrb[38].mxu0  ;;  %v2709_v51 = vsel %vm1244_vm4, %v2118_v49, 0 }
0x145b   : > { %v4854_v47 = vpop.f32.mrb[39].mxu0  ;;  %v2644_v21 = vsel %vm1182_vm3, %v2639_v18, -inf  ;;  %4862 = vmatpush3.bf16.msra.mxu0 %v2709_v51  ;;  %v2774_v46 = vrot.slane %v5961_v31, %v5953_v26 }
0x145c   : > { %2645 = vmax.xlane.f32.xlu0 %v2644_v21  ;;  %4875 = vmatprep.subr.bf16.mxu0 %v5429_v10 }
0x145f   : > { %p4526_p13 = scmp.ne.s32.totalorder %s6563_s26, 1 }
0x1460   : > { %vm5444_vm10 = vmmov (!%p4526_p13), 0   ;;  %s6565_s21 = sld [smem:[#allocation49_spill]] (!%p4526_p13)  ;;  %s6567_s20 = sld [smem:[#allocation50_spill]] (!%p4526_p13) }
0x14e9   : > { %v2646_v48 = vpop.xlane.xlu0 %2645 }
0x14ea   : > { %v2647_v50 = vsub.f32 %v2639_v18, %v2646_v48  ;;  %v2779_v48 = vrot.slane %v5961_v31, %v5956_v28 }
0x14ec   : > { %v2648_v52 = vmul.f32 1.442695, %v2647_v50 }
0x14ee   : > { %5202 = vpow2.f32 %v2648_v52 }
0x14f8   : > { %v5203_v53 = vpop.eup %5202 }
0x14f9   : > { %v2650_v54 = vsel %vm1182_vm3, %v5203_v53, 0.0  ;;  %v2653_v55 = vpack.c.bf16 %v5203_v53, %v5203_v53 }
0x14fa   : > { %2651 = vadd.xlane.f32.xlu0 %v2650_v54 }
0x14fb   : > { %4858 = vmatmul.mubr.msk.bf16.vlgmr.msra.gmra.mrb[64].mxu1 %vm1182_vm3, %v2653_v55  ;;  %v2789_v55 = vrot.slane %v6146_v37, %v5791_v17 }
0x14fc   : > { %4871 = vmatprep.mubr.msk.bf16.mxu1 %vm5430_vm2, %v5429_v10  ;;  %4868 = vmatpush3.bf16.msra.mxu1 %v5154_v42 }
0x14fd   : > { %4869 = vmatprep.subr.bf16.mxu1 %v5429_v10 }
0x1500   : > { %4870 = vmatpush3.bf16.msra.mxu1 %v5155_v45 }
0x1501   : > { %4883 = vmatprep.subr.bf16.mxu1 %v5429_v10 }
0x1528   : > { %v2587_v41 = vpop.f32.mrb[60].mxu1 }
0x1529   : > { %v2593_v57 = vadd.f32 %v2587_v41, %v6088_v61  ;;  %v4847_v43 = vpop.f32.mrb[61].mxu1  ;;  %v2849_v61 = vpack.c.bf16 %v6021_v39, %v6021_v39 }
0x152a   : > { %v2590_v58 = vpop.f32.mrb[62].mxu1 }
0x152b   : > { %v4848_v59 = vpop.f32.mrb[63].mxu1 }
0x1587   : > { %v2652_v60 = vpop.xlane.xlu0 %2651 }
0x1588   : > { %5204 = vrcp.f32 %v2652_v60 }
0x1592   : > { %v5205_v62 = vpop.eup %5204 }
0x15ce   : > { %v2696_v1 = vpop.f32.mrb[64].mxu1 }
0x15cf   : > { %v2703_v3 = vmul.f32 %v5205_v62, %v2696_v1  ;;  %v4859_v4 = vpop.f32.mrb[65].mxu1 }
0x15d0   : > { %v2699_v5 = vpop.f32.mrb[66].mxu1 }
0x15d1   : > { %v2704_v2 = vpack.c.bf16 %v2703_v3, %v2703_v3  ;;  %v4860_v7 = vpop.f32.mrb[67].mxu1 }
0x15d3   : > { %4864 = vmatmul.mubr.msk.bf16.vlgmr.msra.gmra.mrb[40].mxu0 %vm1182_vm3, %v2704_v2 }
0x15d4   : > { %4876 = vmatpush3.bf16.msra.mxu0 %v5152_v6  ;;  %4879 = vmatprep.mubr.msk.bf16.mxu0 %vm5430_vm2, %v5429_v10 }
0x15d5   : > { %4877 = vmatprep.subr.bf16.mxu0 %v5429_v10 }
0x15d8   : > { %4878 = vmatpush3.bf16.msra.mxu0 %v5153_v8 }
0x15d9   : > { %4889 = vmatprep.subr.bf16.mxu0 %v5429_v10 }
0x15db   : > { %4880 = vmatmul.mubr.msk.bf16.vlgmr.msra.gmra.mrb[44].mxu0 %vm1083_vm1, %v2849_v61 }
0x15dc   : > { %4891 = vmatprep.mubr.msk.bf16.mxu0 %vm5430_vm2, %v5429_v10 }
0x16a6   : > { %v2745_v9 = vpop.f32.mrb[40].mxu0 }
0x16a7   : > { %v2751_v11 = vadd.f32 %v2745_v9, %v2593_v57  ;;  %v4865_v13 = vpop.f32.mrb[41].mxu0 }
0x16a8   : > { %v2748_v15 = vpop.f32.mrb[42].mxu0 }
0x16a9   : > { %v2752_v20 = vadd.f32 %v2751_v11, %v5938_v0  ;;  %v4866_v22 = vpop.f32.mrb[43].mxu0 }
0x16ab   : > { %v6139_v39 = vadd.f32 %v2756_v12, %v2752_v20 }
0x16ad   : > { %v2758_v23 = vsel %vm1083_vm1, %v6139_v39, 0.0 }
0x16ae   : > { %2759 = vadd.xlane.f32.xlu0 %v2758_v23  ;;  %v2903_v24 = vpop.f32.mrb[44].mxu0 }
0x16af   : > { %v4881_v25 = vpop.f32.mrb[45].mxu0  ;;  %v2904_v38 = vadd.f32 %v2903_v24, %v2853_v33 }
0x16b0   : > { %v2906_v29 = vpop.f32.mrb[46].mxu0 }
0x16b1   : > { %v4882_v30 = vpop.f32.mrb[47].mxu0  ;;  %v6150_v40 = vpack.c.bf16 %v2904_v38, %v2904_v38 }
0x16b3   : > { %v2920_v54 = vsel %vm1182_vm3, %v6150_v40, 0 }
0x173b   : > { %v2760_v32 = vpop.xlane.xlu0 %2759 }
0x173c   : > { %v2761_v34 = vmul.f32 0.03125, %v2760_v32 }
0x173e   : > { %v2762_v35 = vsub.f32 %v6139_v39, %v2761_v34 }
0x1740   : > { %v2763_v36 = vmul.f32 %v2762_v35, %v2762_v35 }
0x1742   : > { %v2764_v0 = vsel %vm1083_vm1, %v2763_v36, 0.0 }
0x1743   : > { %2765 = vadd.xlane.f32.xlu0 %v2764_v0  ;;  %v2909_v0 = vld [vmem:[%s5750_s6] sm:$0xf] }
0x1744   : > { %v3186_v45 = vsel %vm1244_vm4, %v2909_v0, 0  ;;  %v2911_v0 = vld [vmem:[%s5750_s6 + $0x8] sm:$0xf] }
0x1759   : > { %3027 = vrot.lane.b32.xlu0 %v6150_v40, %s5434_s24 }
0x17d0   : > { %v2766_v14 = vpop.xlane.xlu0 %2765 }
0x17d1   : > { %v2767_v18 = vmul.f32 0.03125, %v2766_v14  ;;  %v2910_v14 = vld [vmem:[%s5750_s6 + $0x4] sm:$0xf] }
0x17d3   : > { %v2768_v63 = vadd.f32 1e-05, %v2767_v18  ;;  %v3140_v18 = vsel %vm1244_vm4, %v2910_v14, 0 }
0x17d4   : > { %v3028_v58 = vpop.permute.xlu0 %3027 }
0x17d5   : > { %5206 = vrsqrt.f32 %v2768_v63  ;;  %v3033_v60 = vsel %vm1182_vm3, %v3028_v58, 0 }
0x17df   : > { %v5207_v47 = vpop.eup %5206 }
0x17e0   : > { %v2770_v21 = vmul.f32 %v5207_v47, %v2762_v35 }
0x17e2   : > { %v2775_v50 = vmul.f32 %v2774_v46, %v2770_v21 }
0x17e4   : > { %v2780_v52 = vadd.f32 %v2779_v48, %v2775_v50 }
0x17e6   : > { %v2785_v53 = vpack.c.bf16 %v2780_v52, %v2780_v52 }
0x17e8   : > { %4872 = vmatmul.mubr.msk.bf16.vlgmr.msra.gmra.mrb[68].mxu1 %vm1083_vm1, %v2785_v53 }
0x17e9   : > { %4884 = vmatpush3.bf16.xpose.msra.mxu1 %v2920_v54  ;;  %4885 = vmatprep.mubr.msk.bf16.mxu1 %vm5430_vm2, %v5429_v10 }
0x17ea   : > { %4895 = vmatprep.subr.bf16.mxu1 %v5429_v10 }
0x18bb   : > { %v2839_v49 = vpop.f32.mrb[68].mxu1 }
0x18bc   : > { %v2840_v51 = vadd.f32 %v2839_v49, %v2789_v55  ;;  %v4873_v31 = vpop.f32.mrb[69].mxu1 }
0x18bd   : > { %v2842_v41 = vpop.f32.mrb[70].mxu1 }
0x18be   : > { %v2913_v57 = vmul.f32 0.35355338, %v2840_v51  ;;  %v4874_v43 = vpop.f32.mrb[71].mxu1 }
0x18c0   : > { %v6170_v59 = vpack.c.bf16 %v2913_v57, %v2913_v57 }
0x18c2   : > { %3025 = vrot.lane.b32.xlu1 %v6170_v59, %s5434_s24  ;;  %4886 = vmatmul.mubr.msk.bf16.vlgmr.msra.gmra.mrb[72].mxu1 %vm1182_vm3, %v6170_v59 }
0x18c3   : > { %4896 = vmatpush3.bf16.xpose.msra.mxu1 %v3033_v60  ;;  %4897 = vmatprep.mubr.msk.bf16.mxu1 %vm5430_vm2, %v5429_v10 }
0x18c4   : > { %4907 = vmatprep.subr.bf16.mxu1 %v5429_v10 }
0x1934   : > { %v3026_v62 = vpop.permute.xlu1 %3025 }
0x1935   : > { %4898 = vmatmul.mubr.msk.bf16.vlgmr.msra.gmra.mrb[76].mxu1 %vm1182_vm3, %v3026_v62 }
0x1936   : > { %4909 = vmatprep.mubr.msk.bf16.mxu1 %vm5430_vm2, %v5429_v10  ;;  %4908 = vmatpush3.bf16.msra.mxu1 %v3140_v18 }
0x1937   : > { %4919 = vmatprep.subr.bf16.mxu1 %v5429_v10 }
0x1995   : > { %v2956_v1 = vpop.f32.mrb[72].mxu1 }
0x1996   : > { %v2957_v3 = vadd.f32 %v2956_v1, %v5843_v44  ;;  %v4887_v4 = vpop.f32.mrb[73].mxu1 }
0x1997   : > { %v2959_v5 = vpop.f32.mrb[74].mxu1 }
0x1998   : > { %v4888_v6 = vpop.f32.mrb[75].mxu1  ;;  %v2962_v2 = vsel %vm1182_vm3, %v2957_v3, -inf }
0x1999   : > { %2963 = vmax.xlane.f32.xlu1 %v2962_v2 }
0x19aa   : > { %2973 = vrot.lane.b32.xlu1 %v6150_v40, %s5432_s11 }
0x1a08   : > { %v3069_v7 = vpop.f32.mrb[76].mxu1 }
0x1a09   : > { %v3070_v8 = vadd.f32 %v3069_v7, %v5843_v44  ;;  %v4899_v61 = vpop.f32.mrb[77].mxu1 }
0x1a0a   : > { %v3072_v9 = vpop.f32.mrb[78].mxu1 }
0x1a0b   : > { %v4900_v11 = vpop.f32.mrb[79].mxu1  ;;  %v3075_v12 = vsel %vm1182_vm3, %v3070_v8, -inf }
0x1a0c   : > { %3076 = vmax.xlane.f32.xlu0 %v3075_v12 }
0x1a22   : > { %3085 = vrot.lane.b32.xlu0 %v6150_v40, %s5433_s12 }
0x1a26   : > { %v2964_v13 = vpop.xlane.xlu1 %2963  ;;  %3230 = vrot.lane.b32.xlu0 %v6150_v40, %s5438_s16 }
0x1a27   : > { %v2965_v15 = vsub.f32 %v2957_v3, %v2964_v13 }
0x1a29   : > { %v2966_v20 = vmul.f32 1.442695, %v2965_v15 }
0x1a2a   : > { %v2974_v22 = vpop.permute.xlu1 %2973  ;;  %3228 = vrot.lane.b32.xlu0 %v6170_v59, %s5438_s16 }
0x1a2b   : > { %5208 = vpow2.f32 %v2966_v20  ;;  %v2979_v23 = vsel %vm1244_vm4, %v2974_v22, 0 }
0x1a2c   : > { %4890 = vmatpush3.bf16.msra.mxu0 %v2979_v23 }
0x1a2d   : > { %4901 = vmatprep.subr.bf16.mxu0 %v5429_v10 }
0x1a35   : > { %v5209_v24 = vpop.eup %5208 }
0x1a36   : > { %v2971_v25 = vpack.c.bf16 %v5209_v24, %v5209_v24  ;;  %v2968_v29 = vsel %vm1182_vm3, %v5209_v24, 0.0 }
0x1a38   : > { %4892 = vmatmul.mubr.msk.bf16.vlgmr.msra.gmra.mrb[48].mxu0 %vm1182_vm3, %v2971_v25 }
0x1a39   : > { %4903 = vmatprep.mubr.msk.bf16.mxu0 %vm5430_vm2, %v5429_v10 }
0x1a49   : > { %2969 = vadd.xlane.f32.xlu0 %v2968_v29 }
0x1a5f   : > { %3388 = vrot.lane.b32.xlu0 %v6150_v40, %s5441_s19 }
0x1a99   : > { %v3077_v30 = vpop.xlane.xlu0 %3076 }
0x1a9a   : > { %v3078_v32 = vsub.f32 %v3070_v8, %v3077_v30 }
0x1a9c   : > { %v3079_v34 = vmul.f32 1.442695, %v3078_v32 }
0x1a9d   : > { %v3086_v35 = vpop.permute.xlu0 %3085 }
0x1a9e   : > { %5210 = vpow2.f32 %v3079_v34  ;;  %v3091_v36 = vsel %vm1244_vm4, %v3086_v35, 0 }
0x1a9f   : > { %4902 = vmatpush3.bf16.msra.mxu0 %v3091_v36 }
0x1aa0   : > { %4913 = vmatprep.subr.bf16.mxu0 %v5429_v10 }
0x1aa1   : > { %v3231_v63 = vpop.permute.xlu0 %3230 }
0x1aa2   : > { %v3236_v62 = vsel %vm1182_vm3, %v3231_v63, 0 }
0x1aa5   : > { %v3229_v46 = vpop.permute.xlu0 %3228 }
0x1aa8   : > { %v5211_v33 = vpop.eup %5210 }
0x1aa9   : > { %v3081_v38 = vsel %vm1182_vm3, %v5211_v33, 0.0  ;;  %v3084_v42 = vpack.c.bf16 %v5211_v33, %v5211_v33  ;;  %v3343_v33 = vsel %vm1244_vm4, %v2911_v0, 0  ;;  %v5157_v0 = vld [vmem:[%s5755_s22 + $0x8] sm:$0xff]  }
0x1aaa   : > { %3082 = vadd.xlane.f32.xlu1 %v3081_v38 }
0x1aab   : > { %4904 = vmatmul.mubr.msk.bf16.vlgmr.msra.gmra.mrb[52].mxu0 %vm1182_vm3, %v3084_v42 }
0x1aac   : > { %4914 = vmatpush3.bf16.msra.mxu0 %v3186_v45  ;;  %4915 = vmatprep.mubr.msk.bf16.mxu0 %vm5430_vm2, %v5429_v10 }
0x1aad   : > { %4925 = vmatprep.subr.bf16.mxu0 %v5429_v10 }
0x1ad6   : > { %v2970_v47 = vpop.xlane.xlu0 %2969 }
0x1ad7   : > { %5212 = vrcp.f32 %v2970_v47 }
0x1ada   : > { %v3389_v32 = vpop.permute.xlu0 %3388 }
0x1adb   : > { %v3394_v36 = vsel %vm1182_vm3, %v3389_v32, 0 }
0x1ae1   : > { %v5213_v21 = vpop.eup %5212 }
0x1b0b   : > { %v3015_v48 = vpop.f32.mrb[48].mxu0 }
0x1b0c   : > { %v3022_v50 = vmul.f32 %v5213_v21, %v3015_v48  ;;  %v4893_v52 = vpop.f32.mrb[49].mxu0 }
0x1b0d   : > { %v3018_v53 = vpop.f32.mrb[50].mxu0 }
0x1b0e   : > { %v3023_v54 = vpack.c.bf16 %v3022_v50, %v3022_v50  ;;  %v4894_v55 = vpop.f32.mrb[51].mxu0 }
0x1b10   : > { %4916 = vmatmul.mubr.msk.bf16.vlgmr.msra.gmra.mrb[56].mxu0 %vm1182_vm3, %v3023_v54 }
0x1b11   : > { %4927 = vmatprep.mubr.msk.bf16.mxu0 %vm5430_vm2, %v5429_v10 }
0x1b37   : > { %v3083_v49 = vpop.xlane.xlu1 %3082 }
0x1b38   : > { %5214 = vrcp.f32 %v3083_v49 }
0x1b42   : > { %v5215_v51 = vpop.eup %5214 }
0x1b7e   : > { %v3127_v31 = vpop.f32.mrb[52].mxu0 }
0x1b7f   : > { %v3134_v41 = vmul.f32 %v5215_v51, %v3127_v31  ;;  %v4905_v57 = vpop.f32.mrb[53].mxu0 }
0x1b80   : > { %v3130_v43 = vpop.f32.mrb[54].mxu0 }
0x1b81   : > { %v3135_v58 = vpack.c.bf16 %v3134_v41, %v3134_v41  ;;  %v4906_v60 = vpop.f32.mrb[55].mxu0 }
0x1b83   : > { %4910 = vmatmul.mubr.msk.bf16.vlgmr.msra.gmra.mrb[80].mxu1 %vm1182_vm3, %v3135_v58 }
0x1b84   : > { %4920 = vmatpush3.bf16.xpose.msra.mxu1 %v3236_v62  ;;  %4921 = vmatprep.mubr.msk.bf16.mxu1 %vm5430_vm2, %v5429_v10 }
0x1b85   : > { %4931 = vmatprep.subr.bf16.mxu1 %v5429_v10 }
0x1b8b   : > { %4922 = vmatmul.mubr.msk.bf16.vlgmr.msra.gmra.mrb[84].mxu1 %vm1182_vm3, %v3229_v46 }
0x1b8c   : > { %4933 = vmatprep.mubr.msk.bf16.mxu1 %vm5430_vm2, %v5429_v10  ;;  %4932 = vmatpush3.bf16.msra.mxu1 %v3343_v33 }
0x1b8d   : > { %4943 = vmatprep.subr.bf16.mxu1 %v5429_v10 }
0x1be3   : > { %v3222_v1 = vpop.f32.mrb[56].mxu0 }
0x1be4   : > { %v4917_v3 = vpop.f32.mrb[57].mxu0 }
0x1be5   : > { %v3225_v4 = vpop.f32.mrb[58].mxu0 }
0x1be6   : > { %v4918_v5 = vpop.f32.mrb[59].mxu0 }
0x1c56   : > { %v3176_v6 = vpop.f32.mrb[80].mxu1 }
0x1c57   : > { %v6226_v2 = vadd.f32 %v3222_v1, %v3176_v6  ;;  %v4911_v7 = vpop.f32.mrb[81].mxu1 }
0x1c58   : > { %v3179_v8 = vpop.f32.mrb[82].mxu1 }
0x1c59   : > { %v4912_v61 = vpop.f32.mrb[83].mxu1 }
0x1c5e   : > { %v3272_v9 = vpop.f32.mrb[84].mxu1 }
0x1c5f   : > { %v3273_v11 = vadd.f32 %v3272_v9, %v5843_v44  ;;  %v4923_v12 = vpop.f32.mrb[85].mxu1 }
0x1c60   : > { %v3275_v13 = vpop.f32.mrb[86].mxu1 }
0x1c61   : > { %v4924_v15 = vpop.f32.mrb[87].mxu1  ;;  %v3278_v20 = vsel %vm1182_vm3, %v3273_v11, -inf }
0x1c62   : > { %3279 = vmax.xlane.f32.xlu1 %v3278_v20  ;;  %v3548_v15 = vrot.slane %v6146_v37, %v5953_v26 }
0x1c73   : > { %3288 = vrot.lane.b32.xlu1 %v6150_v40, %s5437_s17  ;;  %s6566_s17 = sld [smem:[#allocation48_spill]] (!%p4526_p13) }
0x1c77   : > { %3386 = vrot.lane.b32.xlu1 %v6170_v59, %s5441_s19 }
0x1cef   : > { %v3280_v22 = vpop.xlane.xlu1 %3279 }
0x1cf0   : > { %v3281_v23 = vsub.f32 %v3273_v11, %v3280_v22 }
0x1cf2   : > { %v3282_v24 = vmul.f32 1.442695, %v3281_v23 }
0x1cf3   : > { %v3289_v25 = vpop.permute.xlu1 %3288 }
0x1cf4   : > { %5216 = vpow2.f32 %v3282_v24  ;;  %v3294_v29 = vsel %vm1244_vm4, %v3289_v25, 0 }
0x1cf5   : > { %4926 = vmatpush3.bf16.msra.mxu0 %v3294_v29 }
0x1cf6   : > { %4937 = vmatprep.subr.bf16.mxu0 %v5429_v10 }
0x1cf7   : > { %v3387_v59 = vpop.permute.xlu1 %3386 }
0x1cfe   : > { %v5217_v30 = vpop.eup %5216 }
0x1cff   : > { %v3284_v34 = vsel %vm1182_vm3, %v5217_v30, 0.0  ;;  %v3287_v35 = vpack.c.bf16 %v5217_v30, %v5217_v30 }
0x1d00   : > { %3285 = vadd.xlane.f32.xlu1 %v3284_v34 }
0x1d01   : > { %4928 = vmatmul.mubr.msk.bf16.vlgmr.msra.gmra.mrb[60].mxu0 %vm1182_vm3, %v3287_v35 }
0x1d02   : > { %4938 = vmatpush3.bf16.xpose.msra.mxu0 %v3394_v36  ;;  %4939 = vmatprep.mubr.msk.bf16.mxu0 %vm5430_vm2, %v5429_v10 }
0x1d03   : > { %4949 = vmatprep.subr.bf16.mxu0 %v5429_v10 }
0x1d09   : > { %4940 = vmatmul.mubr.msk.bf16.vlgmr.msra.gmra.mrb[64].mxu0 %vm1182_vm3, %v3387_v59  ;;  %v5156_v59 = vld [vmem:[%s5755_s22] sm:$0xff]  }
0x1d0a   : > { %4951 = vmatprep.mubr.msk.bf16.mxu0 %vm5430_vm2, %v5429_v10 }
0x1d11   : > { %3446 = vrot.lane.b32.xlu1 %v6150_v40, %s5440_s8 }
0x1d8d   : > { %v3286_v38 = vpop.xlane.xlu1 %3285 }
0x1d8e   : > { %5218 = vrcp.f32 %v3286_v38 }
0x1d91   : > { %v3447_v63 = vpop.permute.xlu1 %3446 }
0x1d92   : > { %v3452_v48 = vsel %vm1244_vm4, %v3447_v63, 0 }
0x1d98   : > { %v5219_v42 = vpop.eup %5218 }
0x1dd4   : > { %v3330_v45 = vpop.f32.mrb[60].mxu0 }
0x1dd5   : > { %v3337_v14 = vmul.f32 %v5219_v42, %v3330_v45  ;;  %v4929_v18 = vpop.f32.mrb[61].mxu0  ;;  %v5228_v42 = vld [vmem:[%s5765_s7] sm:$0xff] }
0x1dd6   : > { %v3333_v46 = vpop.f32.mrb[62].mxu0  ;;  %v3566_v45 = vrot.slane %v5228_v42, %v5807_v27  ;;  %v3571_v18 = vrot.slane %v5228_v42, %v1814_v56  ;;  %v5161_v56 = vld [vmem:[%s5760_s4 + $0x18] sm:$0xff]  }
0x1dd7   : > { %v3338_v47 = vpack.c.bf16 %v3337_v14, %v3337_v14  ;;  %v4930_v21 = vpop.f32.mrb[63].mxu0 }
0x1dd9   : > { %4934 = vmatmul.mubr.msk.bf16.vlgmr.msra.gmra.mrb[88].mxu1 %vm1182_vm3, %v3338_v47 }
0x1dda   : > { %4944 = vmatpush3.bf16.msra.mxu1 %v3452_v48  ;;  %4945 = vmatprep.mubr.msk.bf16.mxu1 %vm5430_vm2, %v5429_v10  ;;  %v5158_v48 = vld [vmem:[%s5760_s4] sm:$0xff]  }
0x1ddb   : > { %4955 = vmatprep.subr.bf16.mxu1 %v5429_v10 }
0x1ddc   : > { %v3430_v40 = vpop.f32.mrb[64].mxu0 }
0x1ddd   : > { %v3431_v50 = vadd.f32 %v3430_v40, %v5843_v44  ;;  %v4941_v52 = vpop.f32.mrb[65].mxu0  ;;  %v2912_v44 = vld [vmem:[%s5750_s6 + $0xc] sm:$0xf]  ;;  %s6564_s6 = sld [smem:[#allocation47_spill]] (!%p4526_p13) }
0x1dde   : > { %v3433_v53 = vpop.f32.mrb[66].mxu0  ;;  %v3501_v58 = vsel %vm1244_vm4, %v2912_v44, 0  ;;  %v5159_v40 = vld [vmem:[%s5760_s4 + $0x8] sm:$0xff]  }
0x1ddf   : > { %v4942_v54 = vpop.f32.mrb[67].mxu0  ;;  %v3436_v55 = vsel %vm1182_vm3, %v3431_v50, -inf  ;;  %4950 = vmatpush3.bf16.msra.mxu0 %v3501_v58  ;;  %v5163_v52 = vld [vmem:[%s5760_s4 + $0x28] sm:$0xff]   ;;  %v5164_v53 = vld [vmem:[%s5760_s4 + $0x30] sm:$0xff]  }
0x1de0   : > { %3437 = vmax.xlane.f32.xlu0 %v3436_v55  ;;  %4963 = vmatprep.subr.bf16.mxu0 %v5429_v10  ;;  %v5165_v54 = vld [vmem:[%s5760_s4 + $0x38] sm:$0xff]   ;;  %v3581_v55 = vrot.slane %v6146_v37, %v5956_v28  ;;  %v3755_v28 = vrot.slane %v6146_v37, %v5807_v27  ;;  %v3763_v37 = vld [vmem:[#allocation2] sm:$0xff] (!%p4526_p13) }
0x1de3   : > { %v5230_v27 = vld [vmem:[%s6564_s6 + $0x8] sm:$0xff] (!%p4526_p13)  }
0x1e6d   : > { %v3438_v49 = vpop.xlane.xlu0 %3437 }
0x1e6e   : > { %v3439_v51 = vsub.f32 %v3431_v50, %v3438_v49  ;;  %v5162_v50 = vld [vmem:[%s5760_s4 + $0x20] sm:$0xff]  }
0x1e70   : > { %v3440_v31 = vmul.f32 1.442695, %v3439_v51 }
0x1e72   : > { %5220 = vpow2.f32 %v3440_v31 }
0x1e7c   : > { %v5221_v41 = vpop.eup %5220 }
0x1e7d   : > { %v3442_v57 = vsel %vm1182_vm3, %v5221_v41, 0.0  ;;  %v3445_v43 = vpack.c.bf16 %v5221_v41, %v5221_v41 }
0x1e7e   : > { %3443 = vadd.xlane.f32.xlu0 %v3442_v57 }
0x1e7f   : > { %4946 = vmatmul.mubr.msk.bf16.vlgmr.msra.gmra.mrb[92].mxu1 %vm1182_vm3, %v3445_v43 }
0x1e80   : > { %4959 = vmatprep.mubr.msk.bf16.mxu1 %vm5430_vm2, %v5429_v10  ;;  %4956 = vmatpush3.bf16.msra.mxu1 %v5156_v59 }
0x1e81   : > { %4957 = vmatprep.subr.bf16.mxu1 %v5429_v10 }
0x1e84   : > { %4958 = vmatpush3.bf16.msra.mxu1 %v5157_v0 }
0x1eac   : > { %v3379_v60 = vpop.f32.mrb[88].mxu1 }
0x1ead   : > { %v3385_v62 = vadd.f32 %v3379_v60, %v6226_v2  ;;  %v4935_v1 = vpop.f32.mrb[89].mxu1 }
0x1eae   : > { %v3382_v3 = vpop.f32.mrb[90].mxu1 }
0x1eaf   : > { %v4936_v4 = vpop.f32.mrb[91].mxu1 }
0x1f0b   : > { %v3444_v5 = vpop.xlane.xlu0 %3443 }
0x1f0c   : > { %5222 = vrcp.f32 %v3444_v5 }
0x1f16   : > { %v5223_v6 = vpop.eup %5222 }
0x1f52   : > { %v3488_v7 = vpop.f32.mrb[92].mxu1 }
0x1f53   : > { %v3495_v8 = vmul.f32 %v5223_v6, %v3488_v7  ;;  %v4947_v61 = vpop.f32.mrb[93].mxu1 }
0x1f54   : > { %v3491_v9 = vpop.f32.mrb[94].mxu1 }
0x1f55   : > { %v3496_v11 = vpack.c.bf16 %v3495_v8, %v3495_v8  ;;  %v4948_v12 = vpop.f32.mrb[95].mxu1 }
0x1f56   : > { %v5229_v12 = vld [vmem:[%s6564_s6] sm:$0xff] (!%p4526_p13)  }
0x1f57   : > { %4952 = vmatmul.mubr.msk.bf16.vlgmr.msra.gmra.mrb[68].mxu0 %vm1182_vm3, %v3496_v11 }
0x1f58   : > { %4979 = vmatprep.mubr.msk.bf16.mxu0 %vm5430_vm2, %v5429_v10  ;;  %4964 = vmatpush3.bf16.msra.mxu0 %v5158_v48 }
0x1f59   : > { %4965 = vmatprep.subr.bf16.mxu0 %v5429_v10 }
0x1f5c   : > { %4966 = vmatpush3.bf16.msra.mxu0 %v5159_v40 }
0x1f5d   : > { %4967 = vmatprep.subr.bf16.mxu0 %v5429_v10 }
0x1f60   : > { %4968 = vmatpush3.bf16.msra.mxu0 %v5160_v16 }
0x1f61   : > { %4969 = vmatprep.subr.bf16.mxu0 %v5429_v10 }
0x1f64   : > { %4970 = vmatpush3.bf16.msra.mxu0 %v5161_v56 }
0x1f65   : > { %4971 = vmatprep.subr.bf16.mxu0 %v5429_v10 }
0x1f68   : > { %4972 = vmatpush3.bf16.msra.mxu0 %v5162_v50 }
0x1f69   : > { %4973 = vmatprep.subr.bf16.mxu0 %v5429_v10 }
0x1f6c   : > { %4974 = vmatpush3.bf16.msra.mxu0 %v5163_v52 }
0x1f6d   : > { %4975 = vmatprep.subr.bf16.mxu0 %v5429_v10 }
0x1f70   : > { %4976 = vmatpush3.bf16.msra.mxu0 %v5164_v53 }
0x1f71   : > { %4977 = vmatprep.subr.bf16.mxu0 %v5429_v10 }
0x1f74   : > { %4978 = vmatpush3.bf16.msra.mxu0 %v5165_v54 }
0x202a   : > { %v3537_v13 = vpop.f32.mrb[68].mxu0 }
0x202b   : > { %v3543_v2 = vadd.f32 %v3537_v13, %v3385_v62  ;;  %v4953_v20 = vpop.f32.mrb[69].mxu0  ;;  %v5443_v13 = vmov (!%p4526_p13), 0.0  }
0x202c   : > { %v3540_v22 = vpop.f32.mrb[70].mxu0  ;;  %4983 = vmatprep.subr.bf16.mxu0 (!%p4526_p13), %v5443_v13  ;;  %4991 = vmatprep.subr.bf16.mxu1 (!%p4526_p13), %v5443_v13  ;;  %v5232_v20 = vld [vmem:[%s6564_s6 + $0x8] sm:$0xff] (!%p4526_p13)  }
0x202d   : > { %v3544_v23 = vadd.f32 %v3543_v2, %v6139_v39  ;;  %v4954_v24 = vpop.f32.mrb[71].mxu0  ;;  %v5231_v2 = vld [vmem:[%s6564_s6] sm:$0xff] (!%p4526_p13)  }
0x202e   : > { %v6335_v24 = vld [vmem:[%s6565_s21] sm:$0xff] (!%p4526_p13) }
0x202f   : > { %v6271_v25 = vadd.f32 %v3548_v15, %v3544_v23  ;;  %v3768_v15 = vpack.c.bf16 (!%p4526_p13), %v3763_v37, %v3763_v37 }
0x2031   : > { %v3550_v29 = vsel %vm1083_vm1, %v6271_v25, 0.0 }
0x2032   : > { %3551 = vadd.xlane.f32.xlu0 %v3550_v29 }
0x20bf   : > { %v3552_v30 = vpop.xlane.xlu0 %3551 }
0x20c0   : > { %v3553_v32 = vmul.f32 0.03125, %v3552_v30 }
0x20c2   : > { %v3554_v34 = vsub.f32 %v6271_v25, %v3553_v32 }
0x20c4   : > { %v3555_v35 = vmul.f32 %v3554_v34, %v3554_v34 }
0x20c6   : > { %v3556_v36 = vsel %vm1083_vm1, %v3555_v35, 0.0 }
0x20c7   : > { %3557 = vadd.xlane.f32.xlu1 %v3556_v36 }
0x2154   : > { %v3558_v39 = vpop.xlane.xlu1 %3557 }
0x2155   : > { %v3559_v33 = vmul.f32 0.03125, %v3558_v39 }
0x2157   : > { %v3560_v38 = vadd.f32 1e-05, %v3559_v33 }
0x2159   : > { %5224 = vrsqrt.f32 %v3560_v38 }
0x2163   : > { %v5225_v14 = vpop.eup %5224 }
0x2164   : > { %v3562_v63 = vmul.f32 %v5225_v14, %v3554_v34 }
0x2166   : > { %v3567_v46 = vmul.f32 %v3566_v45, %v3562_v63 }
0x2168   : > { %v3572_v47 = vadd.f32 %v3571_v18, %v3567_v46 }
0x216a   : > { %v3577_v21 = vpack.c.bf16 %v3572_v47, %v3572_v47 }
0x216c   : > { %4960 = vmatmul.mubr.msk.bf16.vlgmr.msra.gmra.mrb[96].mxu1 %vm1083_vm1, %v3577_v21 }
0x216d   : > { %4995 = vmatprep.mubr.msk.bf16.mxu1 (!%p4526_p13), %vm5444_vm10, %v5443_v13 }
0x223f   : > { %v3631_v49 = vpop.f32.mrb[96].mxu1 }
0x2240   : > { %v3632_v51 = vadd.f32 %v3631_v49, %v3581_v55  ;;  %v4961_v31 = vpop.f32.mrb[97].mxu1 }
0x2241   : > { %v3634_v41 = vpop.f32.mrb[98].mxu1 }
0x2242   : > { %v3637_v57 = vmul.f32 %v3632_v51, %v3632_v51  ;;  %v4962_v43 = vpop.f32.mrb[99].mxu1 }
0x2244   : > { %v3638_v44 = vmul.f32 %v3637_v57, %v3632_v51 }
0x2246   : > { %v3639_v58 = vmul.f32 0.044715, %v3638_v44 }
0x2248   : > { %v3640_v60 = vadd.f32 %v3639_v58, %v3632_v51 }
0x224a   : > { %v3641_v62 = vmul.f32 0.7978846, %v3640_v60 }
0x224c   : > { %5226 = vtanh.f32 %v3641_v62 }
0x2256   : > { %v5227_v1 = vpop.eup %5226 }
0x2257   : > { %v3643_v3 = vadd.f32 1.0, %v5227_v1 }
0x2259   : > { %v3644_v4 = vmul.f32 0.5, %v3643_v3  ;;  %v5233_v3 = vld [vmem:[%s6566_s17] sm:$0xff] (!%p4526_p13)  }
0x225a   : > { %4992 = vmatpush3.bf16.msra.mxu1 (!%p4526_p13), %v5233_v3 }
0x225b   : > { %v3645_v5 = vmul.f32 %v3644_v4, %v3632_v51  ;;  %4993 = vmatprep.subr.bf16.mxu1 (!%p4526_p13), %v5443_v13  ;;  %v5234_v4 = vld [vmem:[%s6566_s17 + $0x8] sm:$0xff] (!%p4526_p13)  }
0x225d   : > { %v3662_v10 = vpack.c.bf16 %v3645_v5, %v3645_v5 }
0x225e   : > { %4994 = vmatpush3.bf16.msra.mxu1 (!%p4526_p13), %v5234_v4 }
0x225f   : > { %4980 = vmatmul.mubr.bf16.vlgmr.msra.gmra.mrb[72].mxu0 %v3662_v10  ;;  %5007 = vmatprep.subr.bf16.mxu1 (!%p4526_p13), %v5443_v13 }
0x2260   : > { %4984 = vmatpush3.bf16.msra.mxu0 (!%p4526_p13), %v5229_v12  ;;  %4987 = vmatprep.mubr.msk.bf16.mxu0 (!%p4526_p13), %vm5444_vm10, %v5443_v13  ;;  %v3858_v12 = vrot.slane (!%p4526_p13), %v6335_v24, %v5953_v26 }
0x2261   : > { %4985 = vmatprep.subr.bf16.mxu0 (!%p4526_p13), %v5443_v13 }
0x2264   : > { %4986 = vmatpush3.bf16.msra.mxu0 (!%p4526_p13), %v5230_v27 }
0x2265   : > { %4999 = vmatprep.subr.bf16.mxu0 (!%p4526_p13), %v5443_v13 }
0x2267   : > { %4988 = vmatmul.mubr.msk.bf16.vlgmr.msra.gmra.mrb[0].mxu0 (!%p4526_p13), %vm1083_vm1, %v3768_v15 }
0x2268   : > { %5000 = vmatpush3.bf16.msra.mxu0 (!%p4526_p13), %v5231_v2  ;;  %5003 = vmatprep.mubr.msk.bf16.mxu0 (!%p4526_p13), %vm5444_vm10, %v5443_v13  ;;  %v5235_v2 = vld [vmem:[%s6566_s17] sm:$0xff] (!%p4526_p13)  }
0x2269   : > { %5001 = vmatprep.subr.bf16.mxu0 (!%p4526_p13), %v5443_v13 }
0x226c   : > { %5002 = vmatpush3.bf16.msra.mxu0 (!%p4526_p13), %v5232_v20 }
0x2331   : > { %3761 = sbr.rel (%p4526_p13) target bundleno = 9796 (0x2644), region = 128 }
0x2332   : > { %v3745_v6 = vpop.f32.mrb[72].mxu0 }
0x2333   : > { %v3751_v7 = vadd.f32 %v3745_v6, %v6271_v25  ;;  %v4981_v8 = vpop.f32.mrb[73].mxu0  ;;  %v3772_v25 = vrot.slane (!%p4526_p13), %v6335_v24, %v5791_v17 }
0x2334   : > { %v3748_v61 = vpop.f32.mrb[74].mxu0 }
0x2335   : > { %v3756_v9 = vadd.f32 %v3755_v28, %v3751_v7  ;;  %v4982_v11 = vpop.f32.mrb[75].mxu0  ;;  %v3853_v61 = vrot.slane (!%p4526_p13), %v6335_v24, %v5797_v19  ;;  %v5236_v19 = vld [vmem:[%s6566_s17 + $0x8] sm:$0xff] (!%p4526_p13)  }
0x2337   : > { %3757 = vst.msk [vmem:[#allocation3] sm:$0xff] %vm1083_vm1, %v3756_v9 }
0x233a   : > { %v3822_v29 = vpop.f32.mrb[0].mxu0 }
0x233b   : > { %v3823_v30 = vadd.f32 %v3822_v29, %v3772_v25  ;;  %v4989_v32 = vpop.f32.mrb[1].mxu0 }
0x233c   : > { %v3825_v34 = vpop.f32.mrb[2].mxu0 }
0x233d   : > { %v3828_v35 = vmul.f32 %v3823_v30, %v3823_v30  ;;  %v4990_v36 = vpop.f32.mrb[3].mxu0 }
0x233e   : > { %v3928_v22 = vld [vmem:[#allocation3] sm:$0xff] }
0x233f   : > { %v3933_v23 = vpack.c.bf16 %v3928_v22, %v3928_v22  ;;  %v3829_v59 = vmul.f32 %v3828_v35, %v3823_v30 }
0x2341   : > { %5004 = vmatmul.mubr.msk.bf16.vlgmr.msra.gmra.mrb[4].mxu0 %vm1083_vm1, %v3933_v23  ;;  %v3830_v0 = vmul.f32 0.044715, %v3829_v59 }
0x2343   : > { %v3831_v42 = vadd.f32 %v3830_v0, %v3823_v30 }
0x2345   : > { %v3832_v63 = vmul.f32 0.7978846, %v3831_v42 }
0x2347   : > { %5237 = vtanh.f32 %v3832_v63 }
0x2351   : > { %v5238_v48 = vpop.eup %5237 }
0x2352   : > { %v3834_v40 = vadd.f32 1.0, %v5238_v48 }
0x2354   : > { %v3835_v16 = vmul.f32 0.5, %v3834_v40 }
0x2356   : > { %v3836_v56 = vmul.f32 %v3835_v16, %v3823_v30 }
0x2358   : > { %v3837_v50 = vsel %vm1083_vm1, %v3836_v56, 0.0 }
0x2359   : > { %3838 = vadd.xlane.f32.xlu0 %v3837_v50 }
0x23e6   : > { %v3839_v51 = vpop.xlane.xlu0 %3838 }
0x23e7   : > { %v3840_v31 = vmul.f32 0.03125, %v3839_v51 }
0x23e9   : > { %v3841_v41 = vsub.f32 %v3836_v56, %v3840_v31 }
0x23eb   : > { %v3842_v57 = vmul.f32 %v3841_v41, %v3841_v41 }
0x23ed   : > { %v3843_v43 = vsel %vm1083_vm1, %v3842_v57, 0.0 }
0x23ee   : > { %3844 = vadd.xlane.f32.xlu1 %v3843_v43 }
0x2414   : > { %v3983_v39 = vpop.f32.mrb[4].mxu0 }
0x2415   : > { %v3984_v33 = vadd.f32 %v3983_v39, %v3772_v25  ;;  %v5005_v38 = vpop.f32.mrb[5].mxu0  ;;  %v4530_v25 = vld [vmem:[%s6567_s20] ss:$0 sm:$0xff] }
0x2416   : > { %v3986_v45 = vpop.f32.mrb[6].mxu0 }
0x2417   : > { %v3989_v14 = vmul.f32 %v3984_v33, %v3984_v33  ;;  %v5006_v18 = vpop.f32.mrb[7].mxu0 }
0x2419   : > { %v3990_v46 = vmul.f32 %v3989_v14, %v3984_v33 }
0x241b   : > { %v3991_v47 = vmul.f32 0.044715, %v3990_v46 }
0x241d   : > { %v3992_v17 = vadd.f32 %v3991_v47, %v3984_v33 }
0x241f   : > { %v3993_v21 = vmul.f32 0.7978846, %v3992_v17 }
0x2421   : > { %5239 = vtanh.f32 %v3993_v21 }
0x242b   : > { %v5240_v52 = vpop.eup %5239 }
0x242c   : > { %v3995_v53 = vadd.f32 1.0, %v5240_v52 }
0x242e   : > { %v3996_v54 = vmul.f32 0.5, %v3995_v53 }
0x2430   : > { %v3997_v55 = vmul.f32 %v3996_v54, %v3984_v33 }
0x2432   : > { %v3998_v49 = vsel %vm1083_vm1, %v3997_v55, 0.0 }
0x2433   : > { %3999 = vadd.xlane.f32.xlu0 %v3998_v49 }
0x247b   : > { %v3845_v5 = vpop.xlane.xlu1 %3844 }
0x247c   : > { %v3846_v10 = vmul.f32 0.03125, %v3845_v5 }
0x247e   : > { %v3847_v28 = vadd.f32 1e-05, %v3846_v10 }
0x2480   : > { %5241 = vrsqrt.f32 %v3847_v28 }
0x248a   : > { %v5242_v9 = vpop.eup %5241 }
0x248b   : > { %v3849_v11 = vmul.f32 %v5242_v9, %v3841_v41 }
0x248d   : > { %v3854_v27 = vmul.f32 %v3853_v61, %v3849_v11 }
0x248f   : > { %v3859_v37 = vadd.f32 %v3858_v12, %v3854_v27 }
0x2491   : > { %v3864_v15 = vpack.c.bf16 %v3859_v37, %v3859_v37 }
0x2493   : > { %4996 = vmatmul.mubr.msk.bf16.vlgmr.msra.gmra.mrb[0].mxu1 %vm1083_vm1, %v3864_v15 }
0x2494   : > { %5008 = vmatpush3.bf16.msra.mxu1 %v5235_v2  ;;  %5011 = vmatprep.mubr.msk.bf16.mxu1 %vm5444_vm10, %v5443_v13 }
0x2495   : > { %5009 = vmatprep.subr.bf16.mxu1 %v5443_v13 }
0x2498   : > { %5010 = vmatpush3.bf16.msra.mxu1 %v5236_v19 }
0x24c0   : > { %v4000_v44 = vpop.xlane.xlu0 %3999 }
0x24c1   : > { %v4001_v58 = vmul.f32 0.03125, %v4000_v44 }
0x24c3   : > { %v4002_v60 = vsub.f32 %v3997_v55, %v4001_v58 }
0x24c5   : > { %v4003_v62 = vmul.f32 %v4002_v60, %v4002_v60 }
0x24c7   : > { %v4004_v1 = vsel %vm1083_vm1, %v4003_v62, 0.0 }
0x24c8   : > { %4005 = vadd.xlane.f32.xlu1 %v4004_v1 }
0x2555   : > { %v4006_v6 = vpop.xlane.xlu1 %4005 }
0x2556   : > { %v4007_v7 = vmul.f32 0.03125, %v4006_v6 }
0x2558   : > { %v4008_v8 = vadd.f32 1e-05, %v4007_v7 }
0x255a   : > { %5243 = vrsqrt.f32 %v4008_v8 }
0x2564   : > { %v5244_v20 = vpop.eup %5243 }
0x2565   : > { %v4010_v22 = vmul.f32 %v5244_v20, %v4002_v60 }
0x2566   : > { %v3921_v29 = vpop.f32.mrb[0].mxu1 }
0x2567   : > { %v4011_v26 = vmul.f32 %v4010_v22, %v3853_v61  ;;  %v3922_v30 = vadd.f32 %v4530_v25, %v3921_v29  ;;  %v4997_v32 = vpop.f32.mrb[1].mxu1 }
0x2568   : > { %v3924_v34 = vpop.f32.mrb[2].mxu1 }
0x2569   : > { %v4012_v23 = vadd.f32 %v4011_v26, %v3858_v12  ;;  %3927 = vst [vmem:[%s5767_s13] sm:$0xff] %v3922_v30  ;;  %v4998_v35 = vpop.f32.mrb[3].mxu1 }
0x256b   : > { %v4017_v24 = vpack.c.bf16 %v4012_v23, %v4012_v23 }
0x256d   : > { %5012 = vmatmul.mubr.msk.bf16.vlgmr.msra.gmra.mrb[4].mxu1 %vm1083_vm1, %v4017_v24 }
0x2640   : > { %v4074_v36 = vpop.f32.mrb[4].mxu1 }
0x2641   : > { %v4075_v59 = vadd.f32 %v4530_v25, %v4074_v36  ;;  %v5013_v13 = vpop.f32.mrb[5].mxu1 }
0x2642   : > { %v4077_v0 = vpop.f32.mrb[6].mxu1 }
0x2643   : > { %4080 = vst [vmem:[%s5769_s10] sm:$0xff] %v4075_v59  ;;  %v5014_v39 = vpop.f32.mrb[7].mxu1 }
0x2644 PF: > { %s6568_s2 = sld [smem:[#allocation51_spill]]  ;;  %s6570_s22 = sld [smem:[#allocation30_spill]] }
0x2645   : > { %s6571_s4 = sld [smem:[#allocation26_spill]]  ;;  %s4100_s9 = sshll.u32 %s5767_s13, 4  ;;  %s6378_s9 = int_to_ptr.vmem [resolvable:$true] %s4100_s9 }
0x2646   : > { %s6572_s24 = sld [smem:[#allocation52_spill]]  ;;  %s5290_s30 = scalar_lea.vmem %s6378_s9, 128 }
0x2647   : > { %p5291_p0 = scmp.ne.s32.totalorder %s6378_s9, %s5290_s30  ;;  %s5445_s16 = smov [#allocation10]  }
0x2648   : > { %s5294_s0 = sshll.u32 %s5445_s16, 4  ;;  %s5295_s0 = int_to_ptr.vmem [resolvable:$false] %s5294_s0 }
0x2649   : > { %s5296_s13 = scalar_lea.vmem %s5295_s0, 256  ;;  %p5297_p8 = scmp.lt.s32.totalorder %s6378_s9, %s5295_s0 }
0x264a   : > { %s6569_s29 = smov %s6568_s2  ;;  %s6375_s7 = scalar_lea.hbm %s6568_s2, %s5832_s27 }
0x264b   : > { %s4082_s5 = scalar_lea.sflag [#allocation5], %s6570_s22  ;;  %p6574_p2 = scmp.ne.s32.totalorder %s6571_s4, 0 }
0x264c   : > { %s6573_s3 = smov %s6572_s24  ;;  %s6384_s21 = scalar_lea.hbm %s6572_s24, %s5832_s27 }
0x264d   : > { %p5292_p6 = pnand %p5291_p0, %p6574_p2  ;;  %p5298_p11 = scmp.lt.s32.totalorder %s5296_s13, %s5290_s30 }
0x264f   : > { %p5293_p7 = pneg %p5292_p6  ;;  %p5299_p12 = por %p5298_p11, %p5297_p8 }
0x2651   : > { %p5300_p1 = pnand %p5299_p12, %p5293_p7 }
0x2653   : > { %5303 = shalt.err (!%p5300_p1)
}
0x2654   : > { %s5304_s27 = scalar_lea.hbm %s6375_s7, 128  ;;  %s5308_s18 = scalar_lea.hbm %s6569_s29, 256 }
0x2655   : > { %p5305_p4 = scmp.ne.s32.totalorder %s6375_s7, %s5304_s27  ;;  %p5309_p9 = scmp.lt.u32.totalorder %s6375_s7, %s6569_s29 }
0x2656   : > { %p5310_p10 = scmp.lt.u32.totalorder %s5308_s18, %s5304_s27  ;;  %p5312_p0 = scmp.lt.u32.totalorder %s5304_s27, %s6375_s7 }
0x2657   : > { %p5306_p5 = pnand %p5305_p4, %p6574_p2 }
0x2658   : > { %p5311_p13 = por %p5310_p10, %p5309_p9 }
0x2659   : > { %p5307_p3 = pneg %p5306_p5 }
0x265a   : > { %p5313_p6 = por %p5312_p0, %p5311_p13 }
0x265c   : > { %p5314_p7 = pnand %p5313_p6, %p5307_p3 }
0x265e   : > { %5317 = shalt.err (!%p5314_p7)
}
0x265f   : > { %5027 = dma.vmem_to_hbm [thread:$0]  (%p6574_p2), %s6378_s9, 128, %s6375_s7, %s4082_s5  }
0x2660   : > { %s4113_s28 = sshll.u32 %s5769_s10, 4  ;;  %s4087_s20 = scalar_lea.sflag [#allocation12], %s6570_s22  ;;  %s4114_s28 = int_to_ptr.vmem [resolvable:$true] %s4113_s28 }
0x2661   : > { %s5318_s1 = scalar_lea.vmem %s4114_s28, 128  ;;  %s5446_s26 = smov [#allocation11]  }
0x2662   : > { %p5319_p8 = scmp.ne.s32.totalorder %s4114_s28, %s5318_s1  ;;  %s5322_s2 = sshll.u32 %s5446_s26, 4  ;;  %s5323_s2 = int_to_ptr.vmem [resolvable:$false] %s5322_s2 }
0x2663   : > { %s5324_s11 = scalar_lea.vmem %s5323_s2, 256  ;;  %p5325_p1 = scmp.lt.s32.totalorder %s4114_s28, %s5323_s2 }
0x2664   : > { %p5320_p11 = pnand %p5319_p8, %p6574_p2  ;;  %p5326_p4 = scmp.lt.s32.totalorder %s5324_s11, %s5318_s1 }
0x2666   : > { %p5321_p12 = pneg %p5320_p11  ;;  %p5327_p5 = por %p5326_p4, %p5325_p1 }
0x2668   : > { %p5328_p3 = pnand %p5327_p5, %p5321_p12 }
0x266a   : > { %5331 = shalt.err (!%p5328_p3)
}
0x266b   : > { %s5332_s10 = scalar_lea.hbm %s6384_s21, 128  ;;  %s5336_s9 = scalar_lea.hbm %s6573_s3, 256 }
0x266c   : > { %p5333_p9 = scmp.ne.s32.totalorder %s6384_s21, %s5332_s10  ;;  %p5337_p0 = scmp.lt.u32.totalorder %s6384_s21, %s6573_s3 }
0x266d   : > { %p5338_p6 = scmp.lt.u32.totalorder %s5336_s9, %s5332_s10  ;;  %p5340_p8 = scmp.lt.u32.totalorder %s5332_s10, %s6384_s21 }
0x266e   : > { %p5334_p10 = pnand %p5333_p9, %p6574_p2 }
0x266f   : > { %p5339_p7 = por %p5338_p6, %p5337_p0 }
0x2670   : > { %p5335_p13 = pneg %p5334_p10 }
0x2671   : > { %p5341_p11 = por %p5340_p8, %p5339_p7 }
0x2673   : > { %p5342_p12 = pnand %p5341_p11, %p5335_p13 }
0x2675   : > { %5345 = shalt.err (!%p5342_p12)
}
0x2676   : > { %5028 = dma.vmem_to_hbm [thread:$0]  (%p6574_p2), %s4114_s28, 128, %s6384_s21, %s4087_s20  }
0x2677 PF: > { %s6575_s5 = sld [smem:[#allocation24_spill]]  ;;  %s6576_s30 = sld [smem:[#allocation17_spill]] }
0x2678   : > { %s6577_s16 = sld [smem:[#allocation28_spill]] }
0x267d   : > { %p5054_p1 = scmp.ge.s32.totalorder %s6575_s5, 2  ;;  %s4125_s0 = sand.u32 1, %s6576_s30  }
0x267e   : > { %p6578_p4 = scmp.ne.s32.totalorder %s6577_s16, 0  ;;  %s4126_s13 = scalar_lea.sflag [#allocation5], %s4125_s0 }
0x2680   : > { %p5042_p5 = pnand %p5054_p1, %p6578_p4 }
0x2682   : > { %5387 = dma.done.wait (!%p5042_p5), %s4126_s13, 128  }
0x2683   : > { %5389 = vsyncadd (!%p5042_p5), %s4126_s13, 4294967168  ;;  %s4135_s27 = scalar_lea.sflag [#allocation12], %s4125_s0 }
0x2684   : > { %5391 = dma.done.wait (!%p5042_p5), %s4135_s27, 128  }
0x2685   : > { %5393 = vsyncadd (!%p5042_p5), %s4135_s27, 4294967168  ;;  %s42_s2 = sadd.s32 1, %s6575_s5   ;;  %s6579_s4 = sld [smem:[#allocation18_spill]] }
0x2686   : > { %p39_p3 = scmp.ge.s32.totalorder %s42_s2, 6   ;;  %s6580_s30 = sld [smem:[#allocation19_spill]] }
0x2687   : > { %s6581_s24 = sld [smem:[#allocation29_spill]]  ;;  %s6582_s25 = sld [smem:[#allocation22_spill]] }
0x2688   : > { %s6583_s5 = sld [smem:[#allocation23_spill]]  ;;  %s6584_s1 = sld [smem:[#allocation25_spill]] }
0x2689   : > { %s6585_s26 = sld [smem:[#allocation27_spill]]  ;;  %41 = sbr.rel (!%p39_p3) target bundleno = 32 (0x20), region = 223 }
0x2690   :  { %4140 = vsyncpa [#allocation5], 1 }
0x2691   :  { %4142 = vsyncpa [#allocation5 + $0x1], 1 }
0x2692   :  { %4143 = vsyncpa [#allocation12], 1 }
0x2693   :  { %4145 = vsyncpa [#allocation12 + $0x1], 1 }
0x2694   :  { %4146 = vsyncpa [#allocation6], 1 }
0x2695   :  { %4148 = vsyncpa [#allocation6 + $0x1], 1 }
0x2696   :  { %4149 = vsyncpa [#allocation8], 1 }

</bundles_post_ra>
